<compile_context>
chip_gen: v7x
topology: tpu7x:2x2x1
jax: 0.10.0
libtpu: 0.0.40
codegen_flags: <defaults>
</compile_context>

<pallas_src>
import functools
import math

import jax
import jax.numpy as jnp
from jax import lax
from jax.experimental import pallas as pl
from jax.experimental.pallas import tpu as pltpu


_PLANE = 32 * 32  # flattened 32x32 plane -> 1024 lanes (8 vregs)


def _net_kernel(org_ref, pre_ref, qp_ref, bmat_ref, b1_ref,
                wt_ref, wp_ref, b2_ref, w3_ref, b3_ref,
                wfc_ref, fcq_ref, fcb_ref, out_ref):
    f32 = jnp.float32
    bf16 = jnp.bfloat16

    # ---- NC1: Conv2d(1,1,3,s=1,p=1) + ReLU as ONE MXU matmul ----------------
    # bmat is the banded (1024,1024) conv matrix (zero 'same'-padding folded
    # into the band).  bf16 operands == default single-pass MXU precision.
    org_b = org_ref[...].astype(bf16)                               # (BN, 1024)
    t = jnp.dot(org_b, bmat_ref[...], preferred_element_type=f32)   # (BN, 1024)
    t = jnp.maximum(t + b1_ref[...], 0.0)

    # ---- NC2: Conv2d(2,4,16,s=16) + ReLU as two MXU matmuls -----------------
    y = (jnp.dot(t.astype(bf16), wt_ref[...], preferred_element_type=f32)
         + jnp.dot(pre_ref[...].astype(bf16), wp_ref[...],
                   preferred_element_type=f32))
    y = jnp.maximum(y + b2_ref[...], 0.0)            # (BN, 16), cols = (oc, oy, ox)

    # ---- NC3_1 / NC3_2 fused (Conv2d(4,9,2,s=2) on a (4,2,2) input == matvec)
    h = jnp.maximum(jnp.dot(y, w3_ref[...], preferred_element_type=f32)
                    + b3_ref[...], 0.0)              # (BN, 18) = [h1 | h2]

    # ---- FC1 (same weights for x1 and x2, as in the reference forward);
    # qp folded in as a rank-1 term (no lane concats anywhere).
    qps = qp_ref[...] * (1.0 / 64.0) - 0.5           # (BN, 1)
    out_ref[...] = (jnp.dot(h, wfc_ref[...], preferred_element_type=f32)
                    + qps * fcq_ref[...] + fcb_ref[...])   # (BN, 4) = [x1 | x2]


def _round_up(x, m):
    return ((x + m - 1) // m) * m


def _prepare_params(params):
    """One-time host/XLA reshuffle of PyTorch-layout params into lane-dense,
    matmul-friendly constants consumed by the kernel."""
    f32 = jnp.float32
    bf16 = jnp.bfloat16
    idx = jnp.arange(_PLANE)
    yy, xx = idx // 32, idx % 32

    # NC1 as a banded (1024,1024) matrix.  Row i = input pixel (yi,xi),
    # column j = output pixel (yo,xo); entry = w1[yi-yo+1, xi-xo+1] when that
    # tap exists (this also encodes the zero 'same' padding at the borders).
    w1 = params["w1"][0, 0].astype(f32)                       # (3, 3)
    dy = yy[:, None] - yy[None, :] + 1                        # (1024, 1024)
    dx = xx[:, None] - xx[None, :] + 1
    valid = (dy >= 0) & (dy < 3) & (dx >= 0) & (dx < 3)
    taps = w1[jnp.clip(dy, 0, 2), jnp.clip(dx, 0, 2)]
    bmat = jnp.where(valid, taps, 0.0).astype(bf16)           # ~2 MiB in VMEM
    b1 = params["b1"].astype(f32).reshape(1, 1)

    # NC2: patch-expanded weights.  Column j = oc*4 + oy*2 + ox; input row
    # i = y*32 + x contributes w2[oc, c, y%16, x%16] iff (y//16, x//16)==(oy, ox).
    pos = (yy // 16) * 2 + (xx // 16)                         # (1024,) in {0..3}
    onehot = (pos[:, None] == jnp.arange(4)[None, :]).astype(f32)   # (1024, 4)
    ky, kx = yy % 16, xx % 16
    w2 = params["w2"].astype(f32)                             # (4, 2, 16, 16)
    vt = w2[:, 0][:, ky, kx]                                  # (4, 1024)  (channel T)
    vp = w2[:, 1][:, ky, kx]                                  # (4, 1024)  (channel pre)
    wt_exp = (vt.T[:, :, None] * onehot[:, None, :]).reshape(_PLANE, 16).astype(bf16)
    wp_exp = (vp.T[:, :, None] * onehot[:, None, :]).reshape(_PLANE, 16).astype(bf16)
    b2 = jnp.repeat(params["b2"].astype(f32), 4).reshape(1, 16)

    # NC3_1 | NC3_2 fused: flat input order (ic, oy, ox) matches y's columns.
    w31 = params["w31"].astype(f32).reshape(9, 16).T          # (16, 9)
    w32 = params["w32"].astype(f32).reshape(9, 16).T
    w3 = jnp.concatenate([w31, w32], axis=1)                  # (16, 18)
    b3 = jnp.concatenate([params["b31"], params["b32"]]).astype(f32).reshape(1, 18)

    # FC1 (used for BOTH heads, faithfully; FC2 exists in __init__ but is never
    # used in forward).  Block-diagonal so one dot produces [x1 | x2].
    fc_w = params["fc1_w"].astype(f32)                        # (2, 10)
    fc9 = fc_w[:, :9].T                                       # (9, 2)
    wfc = jnp.zeros((18, 4), f32)
    wfc = wfc.at[:9, 0:2].set(fc9)
    wfc = wfc.at[9:, 2:4].set(fc9)
    fcq = jnp.tile(fc_w[:, 9], 2).reshape(1, 4)               # qp weight row
    fcb = jnp.tile(params["fc1_b"].astype(f32), 2).reshape(1, 4)

    return bmat, b1, wt_exp, wp_exp, b2, w3, b3, wfc, fcq, fcb


def _forward(org, pre, qp, consts, *, block_batch):
    N = org.shape[0]

    # Batch tile: multiple of 8 sublanes; >= 2 grid steps whenever N >= 16 so
    # the "parallel" batch axis can shard across both v7x TensorCores; capped
    # at block_batch so double-buffered f32 I/O + the 2 MiB bf16 NC1 matrix
    # stay well inside the explicit 48 MiB VMEM budget on v5e/v6e/v7x.
    BN = max(8, min(block_batch, _round_up(-(-N // 2), 8)))
    grid = pl.cdiv(N, BN)

    # Free contiguous reshapes; no wrapper-side pad/cast HBM passes.  Partial
    # tail block: OOB reads are garbage but rows are independent and OOB
    # writes are masked, so valid rows are unaffected.
    org_f = org.reshape(N, _PLANE)
    pre_f = pre.reshape(N, _PLANE)
    qp_f = qp.reshape(N, 1)

    def cspec(shape):
        return pl.BlockSpec(shape, lambda n, _nd=len(shape): (0,) * _nd)

    grid_spec = pltpu.PrefetchScalarGridSpec(
        num_scalar_prefetch=0,
        grid=(grid,),
        in_specs=[
            pl.BlockSpec((BN, _PLANE), lambda n: (n, 0)),     # org (flat planes)
            pl.BlockSpec((BN, _PLANE), lambda n: (n, 0)),     # pre (flat planes)
            pl.BlockSpec((BN, 1), lambda n: (n, 0)),          # qp
            cspec((_PLANE, _PLANE)),                          # NC1 banded matrix (bf16)
            cspec((1, 1)),                                    # NC1 bias
            cspec((_PLANE, 16)), cspec((_PLANE, 16)),         # NC2 expanded weights (bf16)
            cspec((1, 16)),                                   # NC2 bias (repeated)
            cspec((16, 18)), cspec((1, 18)),                  # NC3_1|NC3_2 fused
            cspec((18, 4)), cspec((1, 4)), cspec((1, 4)),     # FC1 fused, qp row, bias
        ],
        out_specs=pl.BlockSpec((BN, 4), lambda n: (n, 0)),
    )

    out = pl.pallas_call(
        _net_kernel,
        out_shape=jax.ShapeDtypeStruct((N, 4), jnp.float32),
        grid_spec=grid_spec,
        compiler_params=pltpu.CompilerParams(
            dimension_semantics=("parallel",),                # batch is embarrassingly parallel
            vmem_limit_bytes=48 * 1024 * 1024),
    )(org_f, pre_f, qp_f, *consts)

    return out[:, 0:2], out[:, 2:4]


def make_net32x32(params, *, block_batch=512):
    """Prepare kernel constants ONCE and return a jitted forward callable
    (org, pre, qp) -> (x1, x2).  Reuse the returned callable across batches."""
    consts = _prepare_params(params)        # tiny, executed once at build time
    fwd = jax.jit(functools.partial(_forward, block_batch=block_batch))
    return lambda org, pre, qp: fwd(org, pre, qp, consts)


def net32x32_pallas(org, pre, qp, params, *, block_batch=512):
    """One-off convenience wrapper (prefer make_net32x32 for repeated calls)."""
    return make_net32x32(params, block_batch=block_batch)(org, pre, qp)


def init_params(key):
    def uniform(k, shape, fan_in):
        bound = 1.0 / math.sqrt(fan_in)
        return jax.random.uniform(k, shape, jnp.float32, -bound, bound)

    ks = jax.random.split(key, 12)
    p = {}
    p["w1"] = uniform(ks[0], (1, 1, 3, 3), 1 * 3 * 3)
    p["b1"] = uniform(ks[1], (1,), 1 * 3 * 3)
    p["w2"] = uniform(ks[2], (4, 2, 16, 16), 2 * 16 * 16)
    p["b2"] = uniform(ks[3], (4,), 2 * 16 * 16)
    p["w31"] = uniform(ks[4], (9, 4, 2, 2), 4 * 2 * 2)
    p["b31"] = uniform(ks[5], (9,), 4 * 2 * 2)
    p["w32"] = uniform(ks[6], (9, 4, 2, 2), 4 * 2 * 2)
    p["b32"] = uniform(ks[7], (9,), 4 * 2 * 2)
    p["fc1_w"] = uniform(ks[8], (2, 10), 10)
    p["fc1_b"] = uniform(ks[9], (2,), 10)
    p["fc2_w"] = uniform(ks[10], (2, 10), 10)   # defined in __init__ but unused in forward
    p["fc2_b"] = uniform(ks[11], (2,), 10)
    return p


def ref_forward(org, pre, qp, p):
    """Pure-JAX reference mirroring the PyTorch forward exactly (f32/HIGHEST)."""
    dn = ("NCHW", "OIHW", "NCHW")
    hp = lax.Precision.HIGHEST

    def conv(x, w, b, stride, pad):
        y = lax.conv_general_dilated(x, w, (stride, stride), pad,
                                     dimension_numbers=dn, precision=hp)
        return y + b.reshape(1, -1, 1, 1)

    T = jax.nn.relu(conv(org, p["w1"], p["b1"], 1, ((1, 1), (1, 1))))
    T = jax.nn.relu(conv(jnp.concatenate([T, pre], axis=1), p["w2"], p["b2"], 16,
                         ((0, 0), (0, 0))))
    T1 = jax.nn.relu(conv(T, p["w31"], p["b31"], 2, ((0, 0), (0, 0))))[:, :, 0, 0]
    T2 = jax.nn.relu(conv(T, p["w32"], p["b32"], 2, ((0, 0), (0, 0))))[:, :, 0, 0]
    qps = qp / 64.0 - 0.5
    f1 = jnp.concatenate([T1, qps], axis=1)
    f2 = jnp.concatenate([T2, qps], axis=1)
    x1 = jnp.dot(f1, p["fc1_w"].T, precision=hp) + p["fc1_b"]
    x2 = jnp.dot(f2, p["fc1_w"].T, precision=hp) + p["fc1_b"]
    return x1, x2


if __name__ == "__main__":
    key = jax.random.PRNGKey(0)
    params = init_params(jax.random.fold_in(key, 0))

    net = make_net32x32(params)                     # prepared constants reused
    net_small = make_net32x32(params, block_batch=16)

    def check(n, fwd):
        k1, k2, k3 = jax.random.split(jax.random.fold_in(key, n), 3)
        org = jax.random.normal(k1, (n, 1, 32, 32), jnp.float32)
        pre = jax.random.normal(k2, (n, 1, 32, 32), jnp.float32)
        qp = jax.random.uniform(k3, (n, 1), jnp.float32, 0.0, 64.0)

        x1, x2 = fwd(org, pre, qp)
        jax.block_until_ready((x1, x2))

        r1, r2 = ref_forward(org, pre, qp, params)
        assert x1.shape == (n, 2) and x2.shape == (n, 2)
        # Kernel contractions run at bf16 (default single-pass) MXU precision
        # through two K=1024 stages; reference uses f32/HIGHEST.  1e-2 keeps a
        # comfortable margin while still catching any structural bug (which
        # would be off by O(0.1-1)).
        assert jnp.allclose(x1, r1, atol=1e-2, rtol=1e-2), (x1, r1)
        assert jnp.allclose(x2, r2, atol=1e-2, rtol=1e-2), (x2, r2)

    check(4, net)          # single (oversized, partially-masked) batch block
    check(37, net)         # 2 grid steps (>=2 for v7x TC sharding) + partial tail
    check(37, net_small)   # 3 grid steps with BN=16
    print("KERNEL_OK")
</pallas_src>

<mosaic_0001>
module attributes {stable_mosaic.version = 11 : i64} {
  func.func @_net_kernel(%arg0: i32, %arg1: memref<8x1024xf32, #tpu.memory_space<vmem>>, %arg2: memref<8x1024xf32, #tpu.memory_space<vmem>>, %arg3: memref<8x1xf32, #tpu.memory_space<vmem>>, %arg4: memref<1024x1024xbf16, #tpu.memory_space<vmem>>, %arg5: memref<1x1xf32, #tpu.memory_space<vmem>>, %arg6: memref<1024x16xbf16, #tpu.memory_space<vmem>>, %arg7: memref<1024x16xbf16, #tpu.memory_space<vmem>>, %arg8: memref<1x16xf32, #tpu.memory_space<vmem>>, %arg9: memref<16x18xf32, #tpu.memory_space<vmem>>, %arg10: memref<1x18xf32, #tpu.memory_space<vmem>>, %arg11: memref<18x4xf32, #tpu.memory_space<vmem>>, %arg12: memref<1x4xf32, #tpu.memory_space<vmem>>, %arg13: memref<1x4xf32, #tpu.memory_space<vmem>>, %arg14: memref<8x4xf32, #tpu.memory_space<vmem>>) attributes {dimension_semantics = [#tpu.dimension_semantics<parallel>], iteration_bounds = array<i64: 1>, scalar_prefetch = 0 : i64, scratch_operands = 0 : i64, tpu.core_type = #tpu.core_type<tc>, window_params = [{transform_indices = @transform_0, window_bounds = array<i64: 8, 1024>}, {transform_indices = @transform_1, window_bounds = array<i64: 8, 1024>}, {transform_indices = @transform_2, window_bounds = array<i64: 8, 1>}, {pipeline_mode = #tpu.pipeline_mode<synchronous>, transform_indices = @transform_3, window_bounds = array<i64: 1024, 1024>}, {pipeline_mode = #tpu.pipeline_mode<synchronous>, transform_indices = @transform_4, window_bounds = array<i64: 1, 1>}, {pipeline_mode = #tpu.pipeline_mode<synchronous>, transform_indices = @transform_5, window_bounds = array<i64: 1024, 16>}, {pipeline_mode = #tpu.pipeline_mode<synchronous>, transform_indices = @transform_6, window_bounds = array<i64: 1024, 16>}, {pipeline_mode = #tpu.pipeline_mode<synchronous>, transform_indices = @transform_7, window_bounds = array<i64: 1, 16>}, {pipeline_mode = #tpu.pipeline_mode<synchronous>, transform_indices = @transform_8, window_bounds = array<i64: 16, 18>}, {pipeline_mode = #tpu.pipeline_mode<synchronous>, transform_indices = @transform_9, window_bounds = array<i64: 1, 18>}, {pipeline_mode = #tpu.pipeline_mode<synchronous>, transform_indices = @transform_10, window_bounds = array<i64: 18, 4>}, {pipeline_mode = #tpu.pipeline_mode<synchronous>, transform_indices = @transform_11, window_bounds = array<i64: 1, 4>}, {pipeline_mode = #tpu.pipeline_mode<synchronous>, transform_indices = @transform_12, window_bounds = array<i64: 1, 4>}, {transform_indices = @transform_13, window_bounds = array<i64: 8, 4>}]} {
    %c0 = arith.constant 0 : index
    %c0_0 = arith.constant 0 : index
    %0 = vector.load %arg1[%c0, %c0_0] : memref<8x1024xf32, #tpu.memory_space<vmem>>, vector<8x1024xf32>
    %1 = arith.truncf %0 : vector<8x1024xf32> to vector<8x1024xbf16>
    %c0_1 = arith.constant 0 : index
    %c0_2 = arith.constant 0 : index
    %2 = vector.load %arg4[%c0_1, %c0_2] : memref<1024x1024xbf16, #tpu.memory_space<vmem>>, vector<1024x1024xbf16>
    %cst = arith.constant dense<0.000000e+00> : vector<8x1024xf32>
    %3 = tpu.matmul %1, %2, %cst {dimension_numbers = #tpu.dot_dimension_numbers<[1], [0], [0], [1], [0, 0, 1, 1], [], []>} : vector<8x1024xbf16>, vector<1024x1024xbf16>, vector<8x1024xf32> -> vector<8x1024xf32>
    %c0_3 = arith.constant 0 : index
    %c0_4 = arith.constant 0 : index
    %4 = vector.load %arg5[%c0_3, %c0_4] : memref<1x1xf32, #tpu.memory_space<vmem>>, vector<1x1xf32>
    %5 = vector.broadcast %4 : vector<1x1xf32> to vector<8x1024xf32>
    %6 = arith.addf %3, %5 : vector<8x1024xf32>
    %cst_5 = arith.constant 0.000000e+00 : f32
    %7 = vector.broadcast %cst_5 : f32 to vector<8x1024xf32>
    %8 = arith.maximumf %6, %7 : vector<8x1024xf32>
    %9 = arith.truncf %8 : vector<8x1024xf32> to vector<8x1024xbf16>
    %c0_6 = arith.constant 0 : index
    %c0_7 = arith.constant 0 : index
    %10 = vector.load %arg6[%c0_6, %c0_7] : memref<1024x16xbf16, #tpu.memory_space<vmem>>, vector<1024x16xbf16>
    %cst_8 = arith.constant dense<0.000000e+00> : vector<8x16xf32>
    %11 = tpu.matmul %9, %10, %cst_8 {dimension_numbers = #tpu.dot_dimension_numbers<[1], [0], [0], [1], [0, 0, 1, 1], [], []>} : vector<8x1024xbf16>, vector<1024x16xbf16>, vector<8x16xf32> -> vector<8x16xf32>
    %c0_9 = arith.constant 0 : index
    %c0_10 = arith.constant 0 : index
    %12 = vector.load %arg2[%c0_9, %c0_10] : memref<8x1024xf32, #tpu.memory_space<vmem>>, vector<8x1024xf32>
    %13 = arith.truncf %12 : vector<8x1024xf32> to vector<8x1024xbf16>
    %c0_11 = arith.constant 0 : index
    %c0_12 = arith.constant 0 : index
    %14 = vector.load %arg7[%c0_11, %c0_12] : memref<1024x16xbf16, #tpu.memory_space<vmem>>, vector<1024x16xbf16>
    %cst_13 = arith.constant dense<0.000000e+00> : vector<8x16xf32>
    %15 = tpu.matmul %13, %14, %cst_13 {dimension_numbers = #tpu.dot_dimension_numbers<[1], [0], [0], [1], [0, 0, 1, 1], [], []>} : vector<8x1024xbf16>, vector<1024x16xbf16>, vector<8x16xf32> -> vector<8x16xf32>
    %16 = arith.addf %11, %15 : vector<8x16xf32>
    %c0_14 = arith.constant 0 : index
    %c0_15 = arith.constant 0 : index
    %17 = vector.load %arg8[%c0_14, %c0_15] : memref<1x16xf32, #tpu.memory_space<vmem>>, vector<1x16xf32>
    %18 = vector.broadcast %17 : vector<1x16xf32> to vector<8x16xf32>
    %19 = arith.addf %16, %18 : vector<8x16xf32>
    %cst_16 = arith.constant 0.000000e+00 : f32
    %20 = vector.broadcast %cst_16 : f32 to vector<8x16xf32>
    %21 = arith.maximumf %19, %20 : vector<8x16xf32>
    %c0_17 = arith.constant 0 : index
    %c0_18 = arith.constant 0 : index
    %22 = vector.load %arg9[%c0_17, %c0_18] : memref<16x18xf32, #tpu.memory_space<vmem>>, vector<16x18xf32>
    %cst_19 = arith.constant dense<0.000000e+00> : vector<8x18xf32>
    %23 = tpu.matmul %21, %22, %cst_19 {dimension_numbers = #tpu.dot_dimension_numbers<[1], [0], [0], [1], [0, 0, 1, 1], [], []>} : vector<8x16xf32>, vector<16x18xf32>, vector<8x18xf32> -> vector<8x18xf32>
    %c0_20 = arith.constant 0 : index
    %c0_21 = arith.constant 0 : index
    %24 = vector.load %arg10[%c0_20, %c0_21] : memref<1x18xf32, #tpu.memory_space<vmem>>, vector<1x18xf32>
    %25 = vector.broadcast %24 : vector<1x18xf32> to vector<8x18xf32>
    %26 = arith.addf %23, %25 : vector<8x18xf32>
    %cst_22 = arith.constant 0.000000e+00 : f32
    %27 = vector.broadcast %cst_22 : f32 to vector<8x18xf32>
    %28 = arith.maximumf %26, %27 : vector<8x18xf32>
    %c0_23 = arith.constant 0 : index
    %c0_24 = arith.constant 0 : index
    %29 = vector.load %arg3[%c0_23, %c0_24] : memref<8x1xf32, #tpu.memory_space<vmem>>, vector<8x1xf32>
    %cst_25 = arith.constant 1.562500e-02 : f32
    %30 = vector.broadcast %cst_25 : f32 to vector<8x1xf32>
    %31 = arith.mulf %29, %30 : vector<8x1xf32>
    %cst_26 = arith.constant 5.000000e-01 : f32
    %32 = vector.broadcast %cst_26 : f32 to vector<8x1xf32>
    %33 = arith.subf %31, %32 : vector<8x1xf32>
    %c0_27 = arith.constant 0 : index
    %c0_28 = arith.constant 0 : index
    %34 = vector.load %arg11[%c0_27, %c0_28] : memref<18x4xf32, #tpu.memory_space<vmem>>, vector<18x4xf32>
    %cst_29 = arith.constant dense<0.000000e+00> : vector<8x4xf32>
    %35 = tpu.matmul %28, %34, %cst_29 {dimension_numbers = #tpu.dot_dimension_numbers<[1], [0], [0], [1], [0, 0, 1, 1], [], []>} : vector<8x18xf32>, vector<18x4xf32>, vector<8x4xf32> -> vector<8x4xf32>
    %c0_30 = arith.constant 0 : index
    %c0_31 = arith.constant 0 : index
    %36 = vector.load %arg12[%c0_30, %c0_31] : memref<1x4xf32, #tpu.memory_space<vmem>>, vector<1x4xf32>
    %37 = vector.broadcast %33 : vector<8x1xf32> to vector<8x4xf32>
    %38 = vector.broadcast %36 : vector<1x4xf32> to vector<8x4xf32>
    %39 = arith.mulf %37, %38 : vector<8x4xf32>
    %40 = arith.addf %35, %39 : vector<8x4xf32>
    %c0_32 = arith.constant 0 : index
    %c0_33 = arith.constant 0 : index
    %41 = vector.load %arg13[%c0_32, %c0_33] : memref<1x4xf32, #tpu.memory_space<vmem>>, vector<1x4xf32>
    %42 = vector.broadcast %41 : vector<1x4xf32> to vector<8x4xf32>
    %43 = arith.addf %40, %42 : vector<8x4xf32>
    %c0_34 = arith.constant 0 : index
    %c0_35 = arith.constant 0 : index
    %44 = vector.load %arg14[%c0_34, %c0_35] : memref<8x4xf32, #tpu.memory_space<vmem>>, vector<8x4xf32>
    tpu.vector_store %arg14[%c0_34, %c0_35], %43 {strides = array<i32>} : memref<8x4xf32, #tpu.memory_space<vmem>>, vector<8x4xf32>,
    return
  }
  func.func @transform_0(%arg0: i32) -> (i32, i32) {
    %c0_i32 = arith.constant 0 : i32
    %c0_i32_0 = arith.constant 0 : i32
    return %arg0, %c0_i32 : i32, i32
  }
  func.func @transform_1(%arg0: i32) -> (i32, i32) {
    %c0_i32 = arith.constant 0 : i32
    %c0_i32_0 = arith.constant 0 : i32
    return %arg0, %c0_i32 : i32, i32
  }
  func.func @transform_2(%arg0: i32) -> (i32, i32) {
    %c0_i32 = arith.constant 0 : i32
    %c0_i32_0 = arith.constant 0 : i32
    return %arg0, %c0_i32 : i32, i32
  }
  func.func @transform_3(%arg0: i32) -> (i32, i32) {
    %c0_i32 = arith.constant 0 : i32
    %c0_i32_0 = arith.constant 0 : i32
    %c0_i32_1 = arith.constant 0 : i32
    return %c0_i32, %c0_i32_0 : i32, i32
  }
  func.func @transform_4(%arg0: i32) -> (i32, i32) {
    %c0_i32 = arith.constant 0 : i32
    %c0_i32_0 = arith.constant 0 : i32
    %c0_i32_1 = arith.constant 0 : i32
    return %c0_i32, %c0_i32_0 : i32, i32
  }
  func.func @transform_5(%arg0: i32) -> (i32, i32) {
    %c0_i32 = arith.constant 0 : i32
    %c0_i32_0 = arith.constant 0 : i32
    %c0_i32_1 = arith.constant 0 : i32
    return %c0_i32, %c0_i32_0 : i32, i32
  }
  func.func @transform_6(%arg0: i32) -> (i32, i32) {
    %c0_i32 = arith.constant 0 : i32
    %c0_i32_0 = arith.constant 0 : i32
    %c0_i32_1 = arith.constant 0 : i32
    return %c0_i32, %c0_i32_0 : i32, i32
  }
  func.func @transform_7(%arg0: i32) -> (i32, i32) {
    %c0_i32 = arith.constant 0 : i32
    %c0_i32_0 = arith.constant 0 : i32
    %c0_i32_1 = arith.constant 0 : i32
    return %c0_i32, %c0_i32_0 : i32, i32
  }
  func.func @transform_8(%arg0: i32) -> (i32, i32) {
    %c0_i32 = arith.constant 0 : i32
    %c0_i32_0 = arith.constant 0 : i32
    %c0_i32_1 = arith.constant 0 : i32
    return %c0_i32, %c0_i32_0 : i32, i32
  }
  func.func @transform_9(%arg0: i32) -> (i32, i32) {
    %c0_i32 = arith.constant 0 : i32
    %c0_i32_0 = arith.constant 0 : i32
    %c0_i32_1 = arith.constant 0 : i32
    return %c0_i32, %c0_i32_0 : i32, i32
  }
  func.func @transform_10(%arg0: i32) -> (i32, i32) {
    %c0_i32 = arith.constant 0 : i32
    %c0_i32_0 = arith.constant 0 : i32
    %c0_i32_1 = arith.constant 0 : i32
    return %c0_i32, %c0_i32_0 : i32, i32
  }
  func.func @transform_11(%arg0: i32) -> (i32, i32) {
    %c0_i32 = arith.constant 0 : i32
    %c0_i32_0 = arith.constant 0 : i32
    %c0_i32_1 = arith.constant 0 : i32
    return %c0_i32, %c0_i32_0 : i32, i32
  }
  func.func @transform_12(%arg0: i32) -> (i32, i32) {
    %c0_i32 = arith.constant 0 : i32
    %c0_i32_0 = arith.constant 0 : i32
    %c0_i32_1 = arith.constant 0 : i32
    return %c0_i32, %c0_i32_0 : i32, i32
  }
  func.func @transform_13(%arg0: i32) -> (i32, i32) {
    %c0_i32 = arith.constant 0 : i32
    %c0_i32_0 = arith.constant 0 : i32
    return %arg0, %c0_i32 : i32, i32
  }
}

</mosaic_0001>

<bundles_post_ra>
// kernel: _forward.1
= control target key start
LH: loop header
LB: loop body
LE: loop exit
PB: predicated region body
PF: predicated region fallthrough
CT: control target
= control target key end

     0   :  { %s7475_s0 = inlined_call_operand.vmem [shape: f32[4,1024], index: 0, kind: input, shape index: {}]   ;;  %s7476_s1 = inlined_call_operand.vmem [shape: f32[4,1024], index: 1, kind: input, shape index: {}]   ;;  %s7477_s2 = inlined_call_operand.vmem [shape: f32[4,1], index: 2, kind: input, shape index: {}]   ;;  %s7478_s3 = inlined_call_operand.hbm [shape: bf16[1024,1024], index: 3, kind: input, shape index: {}]   ;;  %s7479_s4 = inlined_call_operand.<no memory space> [shape: f32[1,1], index: 4, kind: input, shape index: {}]   ;;  %s7480_s5 = inlined_call_operand.vmem [shape: bf16[1024,16], index: 5, kind: input, shape index: {}]   ;;  %s7481_s6 = inlined_call_operand.vmem [shape: bf16[1024,16], index: 6, kind: input, shape index: {}]   ;;  %s7482_s7 = inlined_call_operand.hbm [shape: f32[1,16], index: 7, kind: input, shape index: {}]   ;;  %s7483_s8 = inlined_call_operand.hbm [shape: f32[16,18], index: 8, kind: input, shape index: {}]   ;;  %s7484_s9 = inlined_call_operand.hbm [shape: f32[1,18], index: 9, kind: input, shape index: {}]   ;;  %s7485_s10 = inlined_call_operand.vmem [shape: f32[18,4], index: 10, kind: input, shape index: {}]   ;;  %s7486_s11 = inlined_call_operand.hbm [shape: f32[1,4], index: 11, kind: input, shape index: {}]   ;;  %s7487_s12 = inlined_call_operand.hbm [shape: f32[1,4], index: 12, kind: input, shape index: {}]   ;;  %s7488_s13 = inlined_call_operand.vmem [shape: f32[4,4], index: 13, kind: output, shape index: {}]  }
   0x1   :  { %v18_v0 = vstv %s7479_s4 }
   0x2   :  { %19 = vst [vmem:[#allocation2] sm:$0x1] %v18_v0 }
   0x3   :  { %20 = vsyncpa [#allocation4], 0 }
   0x4   :  { %21 = vsyncpa [#allocation6], 0 }
   0x5   :  { %22 = vsyncpa [#allocation9], 0 }
   0x6   :  { %23 = vsyncpa [#allocation12], 0  ;;  %s6735_s27 = smov [#allocation5]   ;;  %s6736_s29 = smov [#allocation8]  }
   0x7   :  { %s54_s28 = sshll.u32 %s6735_s27, 4  ;;  %s76_s30 = sshll.u32 %s6736_s29, 4  ;;  %s55_s28 = int_to_ptr.vmem [resolvable:$true] %s54_s28  ;;  %s77_s30 = int_to_ptr.vmem [resolvable:$true] %s76_s30 }
   0x8   :  { %s6595_s16 = scalar_lea.hbm %s7482_s7, 16 }
   0x9   :  { %p6596_p0 = scmp.ne.s32.totalorder %s7482_s7, %s6595_s16  ;;  %p6599_p1 = scmp.lt.u32.totalorder %s6595_s16, %s7482_s7 }
   0xb   :  { %p6601_p2 = pnand %p6599_p1, %p6596_p0 }
   0xd   :  { %6604 = shalt.err (!%p6601_p2)
}
   0xe   :  { %s6605_s20 = scalar_lea.vmem %s55_s28, 16  ;;  %s6609_s21 = scalar_lea.vmem %s55_s28, 32 }
   0xf   :  { %p6606_p3 = scmp.ne.s32.totalorder %s55_s28, %s6605_s20  ;;  %p6610_p4 = scmp.lt.s32.totalorder %s55_s28, %s55_s28 }
  0x10   :  { %p6611_p5 = scmp.lt.s32.totalorder %s6609_s21, %s6605_s20 }
  0x12   :  { %p6612_p6 = por %p6611_p5, %p6610_p4 }
  0x14   :  { %p6613_p7 = pnand %p6612_p6, %p6606_p3 }
  0x16   :  { %6616 = shalt.err (!%p6613_p7)
}
  0x17   :  { %57 = dma.hbm_to_vmem [thread:$0]  %s7482_s7, 16, %s55_s28, [#allocation6]  }
  0x18   :  { %s6617_s26 = scalar_lea.hbm %s7484_s9, 16 }
  0x19   :  { %p6618_p8 = scmp.ne.s32.totalorder %s7484_s9, %s6617_s26  ;;  %p6621_p9 = scmp.lt.u32.totalorder %s6617_s26, %s7484_s9 }
  0x1b   :  { %p6623_p10 = pnand %p6621_p9, %p6618_p8 }
  0x1d   :  { %6626 = shalt.err (!%p6623_p10)
}
  0x1e   :  { %s6627_s16 = scalar_lea.vmem %s77_s30, 16  ;;  %s6631_s17 = scalar_lea.vmem %s77_s30, 32 }
  0x1f   :  { %p6628_p11 = scmp.ne.s32.totalorder %s77_s30, %s6627_s16  ;;  %p6632_p12 = scmp.lt.s32.totalorder %s77_s30, %s77_s30 }
  0x20   :  { %p6633_p13 = scmp.lt.s32.totalorder %s6631_s17, %s6627_s16 }
  0x22   :  { %p6634_p0 = por %p6633_p13, %p6632_p12 }
  0x24   :  { %p6635_p1 = pnand %p6634_p0, %p6628_p11 }
  0x26   :  { %6638 = shalt.err (!%p6635_p1)
}
  0x27   :  { %79 = dma.hbm_to_vmem [thread:$0]  %s7484_s9, 16, %s77_s30, [#allocation9]  }
  0x28   :  { %s6737_s18 = smov [#allocation3]   ;;  %s6639_s21 = scalar_lea.hbm %s7478_s3, 65536 }
  0x29   :  { %s35_s4 = sshll.u32 %s6737_s18, 4  ;;  %p6640_p2 = scmp.ne.s32.totalorder %s7478_s3, %s6639_s21  ;;  %s36_s4 = int_to_ptr.vmem [resolvable:$true] %s35_s4 }
  0x2a   :  { %p6643_p3 = scmp.lt.u32.totalorder %s6639_s21, %s7478_s3 }
  0x2c   :  { %p6645_p4 = pnand %p6643_p3, %p6640_p2 }
  0x2e   :  { %6648 = shalt.err (!%p6645_p4)
}
  0x2f   :  { %s6649_s26 = scalar_lea.vmem %s36_s4, 65536  ;;  %p6654_p6 = scmp.lt.s32.totalorder %s36_s4, %s36_s4 }
  0x30   :  { %p6650_p5 = scmp.ne.s32.totalorder %s36_s4, %s6649_s26  ;;  %p6655_p7 = scmp.lt.s32.totalorder %s6649_s26, %s6649_s26 }
  0x32   :  { %p6656_p8 = por %p6655_p7, %p6654_p6 }
  0x34   :  { %p6657_p9 = pnand %p6656_p8, %p6650_p5 }
  0x36   :  { %6660 = shalt.err (!%p6657_p9)
}
  0x37   :  { %s6738_s9 = smov 512   ;;  %s6739_s30 = smov 32  }
  0x38   :  { %41 = dma.hbm_to_vmem [thread:$0]  %s7478_s3, 65536, %s36_s4, [#allocation4], %s6738_s9, %s6738_s9, %s6739_s30  }
  0x39   :  { %s6740_s14 = smov [#allocation7]   ;;  %s6661_s7 = scalar_lea.hbm %s7483_s8, 256 }
  0x3a   :  { %s63_s15 = sshll.u32 %s6740_s14, 4  ;;  %p6662_p10 = scmp.ne.s32.totalorder %s7483_s8, %s6661_s7  ;;  %s64_s15 = int_to_ptr.vmem [resolvable:$true] %s63_s15 }
  0x3b   :  { %p6665_p11 = scmp.lt.u32.totalorder %s6661_s7, %s7483_s8 }
  0x3d   :  { %p6667_p12 = pnand %p6665_p11, %p6662_p10 }
  0x3f   :  { %6670 = shalt.err (!%p6667_p12)
}
  0x40   :  { %s6671_s21 = scalar_lea.vmem %s64_s15, 256  ;;  %p6676_p0 = scmp.lt.s32.totalorder %s64_s15, %s64_s15 }
  0x41   :  { %p6672_p13 = scmp.ne.s32.totalorder %s64_s15, %s6671_s21  ;;  %p6677_p1 = scmp.lt.s32.totalorder %s6671_s21, %s6671_s21 }
  0x43   :  { %p6678_p2 = por %p6677_p1, %p6676_p0 }
  0x45   :  { %p6679_p3 = pnand %p6678_p2, %p6672_p13 }
  0x47   :  { %6682 = shalt.err (!%p6679_p3)
}
  0x48   :  { %s6741_s3 = smov 128   ;;  %s6742_s4 = smov 8  }
  0x49   :  { %69 = dma.hbm_to_vmem [thread:$0]  %s7483_s8, 256, %s64_s15, [#allocation6], %s6741_s3, %s6741_s3, %s6742_s4  }
  0x4a   :  { %s6743_s24 = smov [#allocation10]   ;;  %s6744_s26 = smov [#allocation11]  }
  0x4b   :  { %s88_s25 = sshll.u32 %s6743_s24, 4  ;;  %s98_s9 = sshll.u32 %s6744_s26, 4  ;;  %s89_s25 = int_to_ptr.vmem [resolvable:$true] %s88_s25  ;;  %s99_s9 = int_to_ptr.vmem [resolvable:$true] %s98_s9 }
  0x4c   :  { %s6683_s29 = scalar_lea.hbm %s7486_s11, 16 }
  0x4d   :  { %p6684_p4 = scmp.ne.s32.totalorder %s7486_s11, %s6683_s29  ;;  %p6687_p5 = scmp.lt.u32.totalorder %s6683_s29, %s7486_s11 }
  0x4f   :  { %p6689_p6 = pnand %p6687_p5, %p6684_p4 }
  0x51   :  { %6692 = shalt.err (!%p6689_p6)
}
  0x52   :  { %s6693_s8 = scalar_lea.vmem %s89_s25, 16  ;;  %s6697_s15 = scalar_lea.vmem %s89_s25, 32 }
  0x53   :  { %p6694_p7 = scmp.ne.s32.totalorder %s89_s25, %s6693_s8  ;;  %p6698_p8 = scmp.lt.s32.totalorder %s89_s25, %s89_s25 }
  0x54   :  { %p6699_p9 = scmp.lt.s32.totalorder %s6697_s15, %s6693_s8 }
  0x56   :  { %p6700_p10 = por %p6699_p9, %p6698_p8 }
  0x58   :  { %p6701_p11 = pnand %p6700_p10, %p6694_p7 }
  0x5a   :  { %6704 = shalt.err (!%p6701_p11)
}
  0x5b   :  { %91 = dma.hbm_to_vmem [thread:$0]  %s7486_s11, 16, %s89_s25, [#allocation9]  }
  0x5c   :  { %s6705_s21 = scalar_lea.hbm %s7487_s12, 16 }
  0x5d   :  { %p6706_p12 = scmp.ne.s32.totalorder %s7487_s12, %s6705_s21  ;;  %p6709_p13 = scmp.lt.u32.totalorder %s6705_s21, %s7487_s12 }
  0x5f   :  { %p6711_p0 = pnand %p6709_p13, %p6706_p12 }
  0x61   :  { %6714 = shalt.err (!%p6711_p0)
}
  0x62   :  { %s6715_s24 = scalar_lea.vmem %s99_s9, 16  ;;  %s6719_s26 = scalar_lea.vmem %s99_s9, 32 }
  0x63   :  { %p6716_p1 = scmp.ne.s32.totalorder %s99_s9, %s6715_s24  ;;  %p6720_p2 = scmp.lt.s32.totalorder %s99_s9, %s99_s9 }
  0x64   :  { %p6721_p3 = scmp.lt.s32.totalorder %s6719_s26, %s6715_s24 }
  0x66   :  { %p6722_p4 = por %p6721_p3, %p6720_p2 }
  0x68   :  { %p6723_p5 = pnand %p6722_p4, %p6716_p1 }
  0x6a   :  { %6726 = shalt.err (!%p6723_p5)
}
  0x6b   :  { %101 = dma.hbm_to_vmem [thread:$0]  %s7487_s12, 16, %s99_s9, [#allocation12]  }
  0x6c   :  { %6727 = dma.done.wait [#allocation4], 65536  }
  0x6d   :  { %6728 = vsyncadd [#allocation4], 4294901760 }
  0x6e   :  { %6729 = dma.done.wait [#allocation6], 272  }
  0x6f   :  { %6730 = vsyncadd [#allocation6], 4294967024 }
  0x70   :  { %6731 = dma.done.wait [#allocation9], 32  }
  0x71   :  { %6732 = vsyncadd [#allocation9], 4294967264 }
  0x72   :  { %6733 = dma.done.wait [#allocation12], 16  }
  0x73   :  { %6734 = vsyncadd [#allocation12], 4294967280  ;;  %v161_v1 = vld [vmem:[#allocation3] sm:$0xff]  ;;  %v162_v3 = vld [vmem:[#allocation3 + $0x8] sm:$0xff]  ;;  %vm6747_vm0 = vmmov 0   ;;  %vm5317_vm1 = vcmask 130048  }
  0x74   :  { %v165_v2 = vld [vmem:[#allocation3 + $0x20] sm:$0xff]  ;;  %v166_v5 = vld [vmem:[#allocation3 + $0x28] sm:$0xff]  ;;  %vm5415_vm2 = vcmask 1041408   ;;  %vm5411_vm3 = vcmask 146432   ;;  %vm5497_vm4 = vcmask 31744  }
  0x75   :  { %v5544_v4 = vcombine.high %v161_v1, %v165_v2  ;;  %v5543_v6 = vcombine.low %v161_v1, %v165_v2  ;;  %v169_v7 = vld [vmem:[#allocation3 + $0x40] sm:$0xff]  ;;  %v5546_v9 = vcombine.high %v162_v3, %v166_v5  ;;  %v5545_v10 = vcombine.low %v162_v3, %v166_v5  ;;  %v170_v12 = vld [vmem:[#allocation3 + $0x48] sm:$0xff] }
  0x76   :  { %v173_v8 = vld [vmem:[#allocation3 + $0x60] sm:$0xff]  ;;  %v174_v13 = vld [vmem:[#allocation3 + $0x68] sm:$0xff] }
  0x77   :  { %v5552_v11 = vcombine.high %v169_v7, %v173_v8  ;;  %v177_v14 = vld [vmem:[#allocation3 + $0x80] sm:$0xff]  ;;  %3243 = vmatprep.subr.bf16.mxu0 %v5544_v4  ;;  %v5554_v15 = vcombine.high %v170_v12, %v174_v13  ;;  %v178_v17 = vld [vmem:[#allocation3 + $0x88] sm:$0xff]  ;;  %3407 = vmatprep.subr.bf16.mxu1 %v5546_v9  ;;  %v5551_v19 = vcombine.low %v169_v7, %v173_v8 }
  0x78   :  { %v181_v16 = vld [vmem:[#allocation3 + $0xa0] sm:$0xff]  ;;  %v182_v18 = vld [vmem:[#allocation3 + $0xa8] sm:$0xff]  ;;  %3244 = vmatpush1.bf16.msra.mxu0 %v5543_v6  ;;  %3408 = vmatpush1.bf16.msra.mxu1 %v5545_v10  ;;  %v5553_v20 = vcombine.low %v170_v12, %v174_v13 }
  0x79   :  { %3245 = vmatprep.subr.bf16.mxu0 %v5552_v11  ;;  %v5560_v21 = vcombine.high %v177_v14, %v181_v16  ;;  %3409 = vmatprep.subr.bf16.mxu1 %v5554_v15  ;;  %v5562_v22 = vcombine.high %v178_v17, %v182_v18  ;;  %v185_v23 = vld [vmem:[#allocation3 + $0xc0] sm:$0xff]  ;;  %v186_v25 = vld [vmem:[#allocation3 + $0xc8] sm:$0xff]  ;;  %v5559_v27 = vcombine.low %v177_v14, %v181_v16 }
  0x7a   :  { %v189_v24 = vld [vmem:[#allocation3 + $0xe0] sm:$0xff]  ;;  %v190_v26 = vld [vmem:[#allocation3 + $0xe8] sm:$0xff]  ;;  %v5561_v28 = vcombine.low %v178_v17, %v182_v18 }
  0x7b   :  { %v5568_v29 = vcombine.high %v185_v23, %v189_v24  ;;  %v5570_v30 = vcombine.high %v186_v25, %v190_v26  ;;  %v193_v31 = vld [vmem:[#allocation3 + $0x100] sm:$0xff]  ;;  %v194_v33 = vld [vmem:[#allocation3 + $0x108] sm:$0xff]  ;;  %v5567_v35 = vcombine.low %v185_v23, %v189_v24  ;;  %v5569_v36 = vcombine.low %v186_v25, %v190_v26 }
  0x7c   :  { %3246 = vmatpush1.bf16.msra.mxu0 %v5551_v19  ;;  %3410 = vmatpush1.bf16.msra.mxu1 %v5553_v20  ;;  %v197_v32 = vld [vmem:[#allocation3 + $0x120] sm:$0xff]  ;;  %v198_v34 = vld [vmem:[#allocation3 + $0x128] sm:$0xff] }
  0x7d   :  { %3247 = vmatprep.subr.bf16.mxu0 %v5560_v21  ;;  %3411 = vmatprep.subr.bf16.mxu1 %v5562_v22  ;;  %v5576_v37 = vcombine.high %v193_v31, %v197_v32  ;;  %v5578_v38 = vcombine.high %v194_v33, %v198_v34  ;;  %v201_v39 = vld [vmem:[#allocation3 + $0x140] sm:$0xff]  ;;  %v202_v41 = vld [vmem:[#allocation3 + $0x148] sm:$0xff]  ;;  %v5575_v43 = vcombine.low %v193_v31, %v197_v32 }
  0x7e   :  { %v205_v40 = vld [vmem:[#allocation3 + $0x160] sm:$0xff]  ;;  %v206_v42 = vld [vmem:[#allocation3 + $0x168] sm:$0xff]  ;;  %v5577_v44 = vcombine.low %v194_v33, %v198_v34 }
  0x7f   :  { %v5584_v45 = vcombine.high %v201_v39, %v205_v40  ;;  %v5586_v46 = vcombine.high %v202_v41, %v206_v42  ;;  %v209_v47 = vld [vmem:[#allocation3 + $0x180] sm:$0xff]  ;;  %v210_v49 = vld [vmem:[#allocation3 + $0x188] sm:$0xff]  ;;  %v5583_v51 = vcombine.low %v201_v39, %v205_v40  ;;  %v5585_v52 = vcombine.low %v202_v41, %v206_v42 }
  0x80   :  { %3248 = vmatpush1.bf16.msra.mxu0 %v5559_v27  ;;  %3412 = vmatpush1.bf16.msra.mxu1 %v5561_v28  ;;  %v213_v48 = vld [vmem:[#allocation3 + $0x1a0] sm:$0xff]  ;;  %v214_v50 = vld [vmem:[#allocation3 + $0x1a8] sm:$0xff] }
  0x81   :  { %3249 = vmatprep.subr.bf16.mxu0 %v5568_v29  ;;  %3413 = vmatprep.subr.bf16.mxu1 %v5570_v30  ;;  %v5592_v53 = vcombine.high %v209_v47, %v213_v48  ;;  %v6897_v54 = vld [vmem:[%s7475_s0] sm:$0xff]  ;;  %v5594_v56 = vcombine.high %v210_v49, %v214_v50  ;;  %v218_v60 = vld [vmem:[#allocation3 + $0x1c8] sm:$0xff]  ;;  %v5591_v62 = vcombine.low %v209_v47, %v213_v48 }
  0x82   :  { %v6902_v55 = vld [vmem:[%s7475_s0 + $0x20] sm:$0xff]  ;;  %v222_v61 = vld [vmem:[#allocation3 + $0x1e8] sm:$0xff]  ;;  %v5593_v0 = vcombine.low %v210_v49, %v214_v50 }
  0x83   :  { %v217_v57 = vld [vmem:[#allocation3 + $0x1c0] sm:$0xff]  ;;  %v138_v59 = vcombine.high %v6897_v54, %v6902_v55  ;;  %v5602_v2 = vcombine.high %v218_v60, %v222_v61  ;;  %v226_v5 = vld [vmem:[#allocation3 + $0x208] sm:$0xff]  ;;  %v5601_v8 = vcombine.low %v218_v60, %v222_v61 }
  0x84   :  { %3250 = vmatpush1.bf16.msra.mxu0 %v5567_v35  ;;  %3414 = vmatpush1.bf16.msra.mxu1 %v5569_v36  ;;  %v221_v58 = vld [vmem:[#allocation3 + $0x1e0] sm:$0xff]  ;;  %v230_v6 = vld [vmem:[#allocation3 + $0x228] sm:$0xff] }
  0x85   :  { %3251 = vmatprep.subr.bf16.mxu0 %v5576_v37  ;;  %3415 = vmatprep.subr.bf16.mxu1 %v5578_v38  ;;  %v6906_v63 = vpack.c.bf16 %v138_v59, %v138_v59  ;;  %v5600_v1 = vcombine.high %v217_v57, %v221_v58  ;;  %v225_v3 = vld [vmem:[#allocation3 + $0x200] sm:$0xff]  ;;  %v5599_v7 = vcombine.low %v217_v57, %v221_v58  ;;  %v234_v13 = vld [vmem:[#allocation3 + $0x248] sm:$0xff] }
  0x86   :  { %v229_v4 = vld [vmem:[#allocation3 + $0x220] sm:$0xff]  ;;  %v5610_v10 = vcombine.high %v226_v5, %v230_v6  ;;  %v238_v14 = vld [vmem:[#allocation3 + $0x268] sm:$0xff]  ;;  %v5609_v16 = vcombine.low %v226_v5, %v230_v6 }
  0x87   :  { %3275 = vmatprep.mubr.bf16.mxu0 %v6906_v63  ;;  %3439 = vmatprep.mubr.bf16.mxu1 %v6906_v63  ;;  %v5608_v9 = vcombine.high %v225_v3, %v229_v4  ;;  %v233_v11 = vld [vmem:[#allocation3 + $0x240] sm:$0xff]  ;;  %v5607_v15 = vcombine.low %v225_v3, %v229_v4  ;;  %v5618_v18 = vcombine.high %v234_v13, %v238_v14  ;;  %v242_v21 = vld [vmem:[#allocation3 + $0x288] sm:$0xff] }
  0x88   :  { %3252 = vmatpush1.bf16.msra.mxu0 %v5575_v43  ;;  %3416 = vmatpush1.bf16.msra.mxu1 %v5577_v44  ;;  %v237_v12 = vld [vmem:[#allocation3 + $0x260] sm:$0xff]  ;;  %v246_v22 = vld [vmem:[#allocation3 + $0x2a8] sm:$0xff]  ;;  %v5617_v24 = vcombine.low %v234_v13, %v238_v14 }
  0x89   :  { %3253 = vmatprep.subr.bf16.mxu0 %v5584_v45  ;;  %3417 = vmatprep.subr.bf16.mxu1 %v5586_v46  ;;  %v5616_v17 = vcombine.high %v233_v11, %v237_v12  ;;  %v241_v19 = vld [vmem:[#allocation3 + $0x280] sm:$0xff]  ;;  %v5615_v23 = vcombine.low %v233_v11, %v237_v12  ;;  %v5626_v26 = vcombine.high %v242_v21, %v246_v22  ;;  %v250_v29 = vld [vmem:[#allocation3 + $0x2c8] sm:$0xff] }
  0x8a   :  { %v245_v20 = vld [vmem:[#allocation3 + $0x2a0] sm:$0xff]  ;;  %v254_v30 = vld [vmem:[#allocation3 + $0x2e8] sm:$0xff]  ;;  %v5625_v32 = vcombine.low %v242_v21, %v246_v22 }
  0x8b   :  { %v5624_v25 = vcombine.high %v241_v19, %v245_v20  ;;  %v249_v27 = vld [vmem:[#allocation3 + $0x2c0] sm:$0xff]  ;;  %v5623_v31 = vcombine.low %v241_v19, %v245_v20  ;;  %v5634_v34 = vcombine.high %v250_v29, %v254_v30  ;;  %v258_v37 = vld [vmem:[#allocation3 + $0x308] sm:$0xff]  ;;  %v5633_v40 = vcombine.low %v250_v29, %v254_v30 }
  0x8c   :  { %3254 = vmatpush1.bf16.msra.mxu0 %v5583_v51  ;;  %3418 = vmatpush1.bf16.msra.mxu1 %v5585_v52  ;;  %v253_v28 = vld [vmem:[#allocation3 + $0x2e0] sm:$0xff]  ;;  %v262_v38 = vld [vmem:[#allocation3 + $0x328] sm:$0xff] }
  0x8d   :  { %3255 = vmatprep.subr.bf16.mxu0 %v5592_v53  ;;  %3419 = vmatprep.subr.bf16.mxu1 %v5594_v56  ;;  %v5632_v33 = vcombine.high %v249_v27, %v253_v28  ;;  %v257_v35 = vld [vmem:[#allocation3 + $0x300] sm:$0xff]  ;;  %v5631_v39 = vcombine.low %v249_v27, %v253_v28  ;;  %v5642_v42 = vcombine.high %v258_v37, %v262_v38  ;;  %v266_v45 = vld [vmem:[#allocation3 + $0x348] sm:$0xff] }
  0x8e   :  { %v261_v36 = vld [vmem:[#allocation3 + $0x320] sm:$0xff]  ;;  %v270_v46 = vld [vmem:[#allocation3 + $0x368] sm:$0xff]  ;;  %v5641_v48 = vcombine.low %v258_v37, %v262_v38 }
  0x8f   :  { %v5640_v41 = vcombine.high %v257_v35, %v261_v36  ;;  %v265_v43 = vld [vmem:[#allocation3 + $0x340] sm:$0xff]  ;;  %v5639_v47 = vcombine.low %v257_v35, %v261_v36  ;;  %v5650_v50 = vcombine.high %v266_v45, %v270_v46  ;;  %v274_v53 = vld [vmem:[#allocation3 + $0x388] sm:$0xff]  ;;  %v5649_v58 = vcombine.low %v266_v45, %v270_v46 }
  0x90   :  { %3256 = vmatpush1.bf16.msra.mxu0 %v5591_v62  ;;  %3420 = vmatpush1.bf16.msra.mxu1 %v5593_v0  ;;  %v269_v44 = vld [vmem:[#allocation3 + $0x360] sm:$0xff]  ;;  %v278_v56 = vld [vmem:[#allocation3 + $0x3a8] sm:$0xff] }
  0x91   :  { %3257 = vmatprep.subr.bf16.mxu0 %v5600_v1  ;;  %3421 = vmatprep.subr.bf16.mxu1 %v5602_v2  ;;  %v5648_v49 = vcombine.high %v265_v43, %v269_v44  ;;  %v273_v51 = vld [vmem:[#allocation3 + $0x380] sm:$0xff]  ;;  %v5647_v57 = vcombine.low %v265_v43, %v269_v44  ;;  %v5658_v60 = vcombine.high %v274_v53, %v278_v56  ;;  %v282_v0 = vld [vmem:[#allocation3 + $0x3c8] sm:$0xff] }
  0x92   :  { %v277_v52 = vld [vmem:[#allocation3 + $0x3a0] sm:$0xff]  ;;  %v286_v1 = vld [vmem:[#allocation3 + $0x3e8] sm:$0xff]  ;;  %v5657_v3 = vcombine.low %v274_v53, %v278_v56 }
  0x93   :  { %v5656_v59 = vcombine.high %v273_v51, %v277_v52  ;;  %v281_v61 = vld [vmem:[#allocation3 + $0x3c0] sm:$0xff]  ;;  %v5655_v2 = vcombine.low %v273_v51, %v277_v52  ;;  %v5666_v5 = vcombine.high %v282_v0, %v286_v1  ;;  %v5665_v14 = vcombine.low %v282_v0, %v286_v1  ;;  %v298_v19 = vld [vmem:[#allocation3 + $0x448] sm:$0xff] }
  0x94   :  { %3258 = vmatpush1.bf16.msra.mxu0 %v5599_v7  ;;  %3422 = vmatpush1.bf16.msra.mxu1 %v5601_v8  ;;  %v285_v62 = vld [vmem:[#allocation3 + $0x3e0] sm:$0xff]  ;;  %v290_v8 = vld [vmem:[#allocation3 + $0x408] sm:$0xff] }
  0x95   :  { %3259 = vmatprep.subr.bf16.mxu0 %v5608_v9  ;;  %3423 = vmatprep.subr.bf16.mxu1 %v5610_v10  ;;  %v5664_v4 = vcombine.high %v281_v61, %v285_v62  ;;  %v289_v6 = vld [vmem:[#allocation3 + $0x400] sm:$0xff]  ;;  %v294_v9 = vld [vmem:[#allocation3 + $0x428] sm:$0xff]  ;;  %v137_v10 = vcombine.low %v6897_v54, %v6902_v55  ;;  %v5663_v13 = vcombine.low %v281_v61, %v285_v62 }
  0x96   :  { %v293_v7 = vld [vmem:[#allocation3 + $0x420] sm:$0xff]  ;;  %v302_v20 = vld [vmem:[#allocation3 + $0x468] sm:$0xff]  ;;  %v5673_v22 = vcombine.low %v290_v8, %v294_v9 }
  0x97   :  { %v6915_v11 = vld [vmem:[%s7475_s0 + $0x8] sm:$0xff]  ;;  %v5671_v21 = vcombine.low %v289_v6, %v293_v7 }
  0x98   :  { %3260 = vmatpush1.bf16.msra.mxu0 %v5607_v15  ;;  %3424 = vmatpush1.bf16.msra.mxu1 %v5609_v16  ;;  %v6920_v12 = vld [vmem:[%s7475_s0 + $0x28] sm:$0xff]  ;;  %v5672_v15 = vcombine.high %v289_v6, %v293_v7  ;;  %v5674_v16 = vcombine.high %v290_v8, %v294_v9 }
  0x99   :  { %3261 = vmatprep.subr.bf16.mxu0 %v5616_v17  ;;  %3425 = vmatprep.subr.bf16.mxu1 %v5618_v18  ;;  %v297_v17 = vld [vmem:[#allocation3 + $0x440] sm:$0xff]  ;;  %v140_v55 = vcombine.high %v6915_v11, %v6920_v12  ;;  %v6924_v18 = vpack.c.bf16 %v137_v10, %v137_v10  ;;  %v306_v27 = vld [vmem:[#allocation3 + $0x488] sm:$0xff] }
  0x9a   :  { %v301_v54 = vld [vmem:[#allocation3 + $0x460] sm:$0xff]  ;;  %v310_v29 = vld [vmem:[#allocation3 + $0x4a8] sm:$0xff] }
  0x9b   :  { %v6926_v28 = vpack.c.bf16 %v140_v55, %v140_v55  ;;  %v5679_v30 = vcombine.low %v297_v17, %v301_v54  ;;  %v314_v35 = vld [vmem:[#allocation3 + $0x4c8] sm:$0xff]  ;;  %v5690_v36 = vcombine.high %v306_v27, %v310_v29 }
  0x9c   :  { %3262 = vmatpush1.bf16.msra.mxu0 %v5615_v23  ;;  %3426 = vmatpush1.bf16.msra.mxu1 %v5617_v24  ;;  %v5680_v23 = vcombine.high %v297_v17, %v301_v54  ;;  %v5682_v24 = vcombine.high %v298_v19, %v302_v20  ;;  %v318_v37 = vld [vmem:[#allocation3 + $0x4e8] sm:$0xff] }
  0x9d   :  { %3263 = vmatprep.subr.bf16.mxu0 %v5624_v25  ;;  %3427 = vmatprep.subr.bf16.mxu1 %v5626_v26  ;;  %v305_v25 = vld [vmem:[#allocation3 + $0x480] sm:$0xff]  ;;  %v322_v43 = vld [vmem:[#allocation3 + $0x508] sm:$0xff]  ;;  %v5698_v44 = vcombine.high %v314_v35, %v318_v37 }
  0x9e   :  { %v309_v26 = vld [vmem:[#allocation3 + $0x4a0] sm:$0xff]  ;;  %v326_v45 = vld [vmem:[#allocation3 + $0x528] sm:$0xff] }
  0x9f   :  { %v5687_v38 = vcombine.low %v305_v25, %v309_v26  ;;  %v330_v51 = vld [vmem:[#allocation3 + $0x548] sm:$0xff]  ;;  %v5706_v52 = vcombine.high %v322_v43, %v326_v45 }
  0xa0   :  { %3264 = vmatpush1.bf16.msra.mxu0 %v5623_v31  ;;  %3428 = vmatpush1.bf16.msra.mxu1 %v5625_v32  ;;  %v5681_v31 = vcombine.low %v298_v19, %v302_v20  ;;  %v5688_v32 = vcombine.high %v305_v25, %v309_v26  ;;  %v334_v53 = vld [vmem:[#allocation3 + $0x568] sm:$0xff] }
  0xa1   :  { %3265 = vmatprep.subr.bf16.mxu0 %v5632_v33  ;;  %3429 = vmatprep.subr.bf16.mxu1 %v5634_v34  ;;  %v313_v33 = vld [vmem:[#allocation3 + $0x4c0] sm:$0xff]  ;;  %v338_v61 = vld [vmem:[#allocation3 + $0x588] sm:$0xff]  ;;  %v5714_v62 = vcombine.high %v330_v51, %v334_v53 }
  0xa2   :  { %v317_v34 = vld [vmem:[#allocation3 + $0x4e0] sm:$0xff]  ;;  %v342_v0 = vld [vmem:[#allocation3 + $0x5a8] sm:$0xff] }
  0xa3   :  { %v5695_v46 = vcombine.low %v313_v33, %v317_v34  ;;  %v346_v6 = vld [vmem:[#allocation3 + $0x5c8] sm:$0xff]  ;;  %v5722_v7 = vcombine.high %v338_v61, %v342_v0  ;;  %v5721_v10 = vcombine.low %v338_v61, %v342_v0 }
  0xa4   :  { %3266 = vmatpush1.bf16.msra.mxu0 %v5631_v39  ;;  %3430 = vmatpush1.bf16.msra.mxu1 %v5633_v40  ;;  %v5689_v39 = vcombine.low %v306_v27, %v310_v29  ;;  %v5696_v40 = vcombine.high %v313_v33, %v317_v34  ;;  %v350_v8 = vld [vmem:[#allocation3 + $0x5e8] sm:$0xff] }
  0xa5   :  { %3267 = vmatprep.subr.bf16.mxu0 %v5640_v41  ;;  %3431 = vmatprep.subr.bf16.mxu1 %v5642_v42  ;;  %v321_v41 = vld [vmem:[#allocation3 + $0x500] sm:$0xff]  ;;  %v5730_v17 = vcombine.high %v346_v6, %v350_v8  ;;  %v358_v54 = vld [vmem:[#allocation3 + $0x628] sm:$0xff]  ;;  %v5729_v19 = vcombine.low %v346_v6, %v350_v8 }
  0xa6   :  { %v325_v42 = vld [vmem:[#allocation3 + $0x520] sm:$0xff]  ;;  %v366_v25 = vld [vmem:[#allocation3 + $0x668] sm:$0xff] }
  0xa7   :  { %v5703_v56 = vcombine.low %v321_v41, %v325_v42  ;;  %v374_v34 = vld [vmem:[#allocation3 + $0x6a8] sm:$0xff] }
  0xa8   :  { %3268 = vmatpush1.bf16.msra.mxu0 %v5639_v47  ;;  %3432 = vmatpush1.bf16.msra.mxu1 %v5641_v48  ;;  %v5697_v47 = vcombine.low %v314_v35, %v318_v37  ;;  %v5704_v48 = vcombine.high %v321_v41, %v325_v42  ;;  %v382_v42 = vld [vmem:[#allocation3 + $0x6e8] sm:$0xff] }
  0xa9   :  { %3269 = vmatprep.subr.bf16.mxu0 %v5648_v49  ;;  %3433 = vmatprep.subr.bf16.mxu1 %v5650_v50  ;;  %v329_v49 = vld [vmem:[#allocation3 + $0x540] sm:$0xff] }
  0xaa   :  { %v333_v50 = vld [vmem:[#allocation3 + $0x560] sm:$0xff] }
  0xab   :  { %v5711_v1 = vcombine.low %v329_v49, %v333_v50 }
  0xac   :  { %3270 = vmatpush1.bf16.msra.mxu0 %v5647_v57  ;;  %3434 = vmatpush1.bf16.msra.mxu1 %v5649_v58  ;;  %v5705_v57 = vcombine.low %v322_v43, %v326_v45  ;;  %v5712_v58 = vcombine.high %v329_v49, %v333_v50  ;;  %v390_v50 = vld [vmem:[#allocation3 + $0x728] sm:$0xff] }
  0xad   :  { %3271 = vmatprep.subr.bf16.mxu0 %v5656_v59  ;;  %3435 = vmatprep.subr.bf16.mxu1 %v5658_v60  ;;  %v337_v59 = vld [vmem:[#allocation3 + $0x580] sm:$0xff] }
  0xae   :  { %v341_v60 = vld [vmem:[#allocation3 + $0x5a0] sm:$0xff] }
  0xaf   :  { %v5719_v9 = vcombine.low %v337_v59, %v341_v60 }
  0xb0   :  { %3272 = vmatpush1.bf16.msra.mxu0 %v5655_v2  ;;  %3436 = vmatpush1.bf16.msra.mxu1 %v5657_v3  ;;  %v5713_v2 = vcombine.low %v330_v51, %v334_v53  ;;  %v5720_v3 = vcombine.high %v337_v59, %v341_v60  ;;  %v398_v60 = vld [vmem:[#allocation3 + $0x768] sm:$0xff] }
  0xb1   :  { %3273 = vmatprep.subr.bf16.mxu0 %v5664_v4  ;;  %3437 = vmatprep.subr.bf16.mxu1 %v5666_v5  ;;  %v345_v4 = vld [vmem:[#allocation3 + $0x5c0] sm:$0xff] }
  0xb2   :  { %v349_v5 = vld [vmem:[#allocation3 + $0x5e0] sm:$0xff] }
  0xb3   :  { %v5727_v55 = vcombine.low %v345_v4, %v349_v5 }
  0xb4   :  { %3274 = vmatpush1.bf16.msra.mxu0 %v5663_v13  ;;  %3438 = vmatpush1.bf16.msra.mxu1 %v5665_v14  ;;  %v5728_v13 = vcombine.high %v345_v4, %v349_v5  ;;  %v353_v14 = vld [vmem:[#allocation3 + $0x600] sm:$0xff]  ;;  %v406_v5 = vld [vmem:[#allocation3 + $0x7a8] sm:$0xff] }
  0xb5   :  { %3284 = vmatprep.subr.bf16.mxu0 %v5672_v15  ;;  %3448 = vmatprep.subr.bf16.mxu1 %v5674_v16  ;;  %v357_v15 = vld [vmem:[#allocation3 + $0x620] sm:$0xff]  ;;  %v354_v16 = vld [vmem:[#allocation3 + $0x608] sm:$0xff] }
  0xb6   :  { %v5736_v20 = vcombine.high %v353_v14, %v357_v15  ;;  %v5735_v26 = vcombine.low %v353_v14, %v357_v15  ;;  %v5737_v27 = vcombine.low %v354_v16, %v358_v54  ;;  %v414_v15 = vld [vmem:[#allocation3 + $0x7e8] sm:$0xff] }
  0xb7   :  { %3276 = vmatmul.mubr.bf16.vlgmr.msra.gmra.mrb[0].mxu0 %v6924_v18  ;;  %3440 = vmatmul.mubr.bf16.vlgmr.msra.gmra.mrb[0].mxu1 %v6924_v18 }
  0xb8   :  { %3285 = vmatpush1.bf16.msra.mxu0 %v5671_v21  ;;  %3449 = vmatpush1.bf16.msra.mxu1 %v5673_v22  ;;  %v361_v21 = vld [vmem:[#allocation3 + $0x640] sm:$0xff] }
  0xb9   :  { %3286 = vmatprep.subr.bf16.mxu0 %v5680_v23  ;;  %3450 = vmatprep.subr.bf16.mxu1 %v5682_v24  ;;  %v365_v22 = vld [vmem:[#allocation3 + $0x660] sm:$0xff]  ;;  %v362_v23 = vld [vmem:[#allocation3 + $0x648] sm:$0xff]  ;;  %v5738_v24 = vcombine.high %v354_v16, %v358_v54 }
  0xba   :  { %3316 = vmatprep.mubr.bf16.mxu0 %v6926_v28  ;;  %3480 = vmatprep.mubr.bf16.mxu1 %v6926_v28  ;;  %v5744_v29 = vcombine.high %v361_v21, %v365_v22  ;;  %v5746_v33 = vcombine.high %v362_v23, %v366_v25  ;;  %v5743_v35 = vcombine.low %v361_v21, %v365_v22  ;;  %v421_v54 = vld [vmem:[#allocation3 + $0x820] sm:$0xff]  ;;  %v422_v21 = vld [vmem:[#allocation3 + $0x828] sm:$0xff] }
  0xbb   :  { %v6935_v22 = vld [vmem:[%s7475_s0 + $0x10] sm:$0xff] }
  0xbc   :  { %3287 = vmatpush1.bf16.msra.mxu0 %v5679_v30  ;;  %3451 = vmatpush1.bf16.msra.mxu1 %v5681_v31  ;;  %v369_v30 = vld [vmem:[#allocation3 + $0x680] sm:$0xff] }
  0xbd   :  { %3288 = vmatprep.subr.bf16.mxu0 %v5688_v32  ;;  %3452 = vmatprep.subr.bf16.mxu1 %v5690_v36  ;;  %v373_v31 = vld [vmem:[#allocation3 + $0x6a0] sm:$0xff]  ;;  %v370_v32 = vld [vmem:[#allocation3 + $0x688] sm:$0xff]  ;;  %v5745_v36 = vcombine.low %v362_v23, %v366_v25  ;;  %v139_v25 = vcombine.low %v6915_v11, %v6920_v12 }
  0xbe   :  { %v5752_v37 = vcombine.high %v369_v30, %v373_v31  ;;  %v5754_v41 = vcombine.high %v370_v32, %v374_v34  ;;  %v5751_v43 = vcombine.low %v369_v30, %v373_v31  ;;  %v425_v30 = vld [vmem:[#allocation3 + $0x840] sm:$0xff] }
  0xc0   :  { %3289 = vmatpush1.bf16.msra.mxu0 %v5687_v38  ;;  %3453 = vmatpush1.bf16.msra.mxu1 %v5689_v39  ;;  %v377_v38 = vld [vmem:[#allocation3 + $0x6c0] sm:$0xff] }
  0xc1   :  { %3290 = vmatprep.subr.bf16.mxu0 %v5696_v40  ;;  %3454 = vmatprep.subr.bf16.mxu1 %v5698_v44  ;;  %v381_v39 = vld [vmem:[#allocation3 + $0x6e0] sm:$0xff]  ;;  %v378_v40 = vld [vmem:[#allocation3 + $0x6c8] sm:$0xff]  ;;  %v5753_v44 = vcombine.low %v370_v32, %v374_v34 }
  0xc2   :  { %v5760_v45 = vcombine.high %v377_v38, %v381_v39  ;;  %v5762_v49 = vcombine.high %v378_v40, %v382_v42  ;;  %v5759_v51 = vcombine.low %v377_v38, %v381_v39  ;;  %v429_v32 = vld [vmem:[#allocation3 + $0x860] sm:$0xff]  ;;  %v430_v34 = vld [vmem:[#allocation3 + $0x868] sm:$0xff] }
  0xc3   :  { %v5808_v12 = vcombine.high %v425_v30, %v429_v32  ;;  %v433_v38 = vld [vmem:[#allocation3 + $0x880] sm:$0xff] }
  0xc4   :  { %3291 = vmatpush1.bf16.msra.mxu0 %v5695_v46  ;;  %3455 = vmatpush1.bf16.msra.mxu1 %v5697_v47  ;;  %v385_v46 = vld [vmem:[#allocation3 + $0x700] sm:$0xff] }
  0xc5   :  { %3292 = vmatprep.subr.bf16.mxu0 %v5704_v48  ;;  %3456 = vmatprep.subr.bf16.mxu1 %v5706_v52  ;;  %v389_v47 = vld [vmem:[#allocation3 + $0x720] sm:$0xff]  ;;  %v386_v48 = vld [vmem:[#allocation3 + $0x708] sm:$0xff]  ;;  %v5761_v52 = vcombine.low %v378_v40, %v382_v42 }
  0xc6   :  { %v5768_v53 = vcombine.high %v385_v46, %v389_v47  ;;  %v5770_v59 = vcombine.high %v386_v48, %v390_v50  ;;  %v5767_v61 = vcombine.low %v385_v46, %v389_v47  ;;  %v437_v39 = vld [vmem:[#allocation3 + $0x8a0] sm:$0xff]  ;;  %v434_v40 = vld [vmem:[#allocation3 + $0x888] sm:$0xff] }
  0xc7   :  { %v438_v42 = vld [vmem:[#allocation3 + $0x8a8] sm:$0xff]  ;;  %v5816_v46 = vcombine.high %v433_v38, %v437_v39  ;;  %v441_v47 = vld [vmem:[#allocation3 + $0x8c0] sm:$0xff] }
  0xc8   :  { %3293 = vmatpush1.bf16.msra.mxu0 %v5703_v56  ;;  %3457 = vmatpush1.bf16.msra.mxu1 %v5705_v57  ;;  %v393_v56 = vld [vmem:[#allocation3 + $0x740] sm:$0xff] }
  0xc9   :  { %3294 = vmatprep.subr.bf16.mxu0 %v5712_v58  ;;  %3458 = vmatprep.subr.bf16.mxu1 %v5714_v62  ;;  %v397_v57 = vld [vmem:[#allocation3 + $0x760] sm:$0xff]  ;;  %v394_v58 = vld [vmem:[#allocation3 + $0x748] sm:$0xff]  ;;  %v5769_v62 = vcombine.low %v386_v48, %v390_v50  ;;  %v5818_v50 = vcombine.high %v434_v40, %v438_v42 }
  0xca   :  { %v5776_v0 = vcombine.high %v393_v56, %v397_v57  ;;  %v5778_v4 = vcombine.high %v394_v58, %v398_v60  ;;  %v5775_v6 = vcombine.low %v393_v56, %v397_v57  ;;  %v445_v48 = vld [vmem:[#allocation3 + $0x8e0] sm:$0xff] }
  0xcb   :  { %v5824_v56 = vcombine.high %v441_v47, %v445_v48  ;;  %v449_v57 = vld [vmem:[#allocation3 + $0x900] sm:$0xff] }
  0xcc   :  { %3295 = vmatpush1.bf16.msra.mxu0 %v5711_v1  ;;  %3459 = vmatpush1.bf16.msra.mxu1 %v5713_v2  ;;  %v401_v1 = vld [vmem:[#allocation3 + $0x780] sm:$0xff] }
  0xcd   :  { %3296 = vmatprep.subr.bf16.mxu0 %v5720_v3  ;;  %3460 = vmatprep.subr.bf16.mxu1 %v5722_v7  ;;  %v405_v2 = vld [vmem:[#allocation3 + $0x7a0] sm:$0xff]  ;;  %v402_v3 = vld [vmem:[#allocation3 + $0x788] sm:$0xff]  ;;  %v5777_v7 = vcombine.low %v394_v58, %v398_v60 }
  0xce   :  { %v5784_v8 = vcombine.high %v401_v1, %v405_v2  ;;  %v5786_v14 = vcombine.high %v402_v3, %v406_v5  ;;  %v5783_v16 = vcombine.low %v401_v1, %v405_v2  ;;  %v453_v58 = vld [vmem:[#allocation3 + $0x920] sm:$0xff] }
  0xcf   :  { %v5832_v1 = vcombine.high %v449_v57, %v453_v58  ;;  %v457_v2 = vld [vmem:[#allocation3 + $0x940] sm:$0xff] }
  0xd0   :  { %3297 = vmatpush1.bf16.msra.mxu0 %v5719_v9  ;;  %3461 = vmatpush1.bf16.msra.mxu1 %v5721_v10  ;;  %v409_v9 = vld [vmem:[#allocation3 + $0x7c0] sm:$0xff] }
  0xd1   :  { %3298 = vmatprep.subr.bf16.mxu0 %v5728_v13  ;;  %3462 = vmatprep.subr.bf16.mxu1 %v5730_v17  ;;  %v413_v10 = vld [vmem:[#allocation3 + $0x7e0] sm:$0xff]  ;;  %v410_v13 = vld [vmem:[#allocation3 + $0x7c8] sm:$0xff] }
  0xd2   :  { %v417_v17 = vld [vmem:[#allocation3 + $0x800] sm:$0xff]  ;;  %v5794_v23 = vcombine.high %v410_v13, %v414_v15 }
  0xd4   :  { %3299 = vmatpush1.bf16.msra.mxu0 %v5727_v55  ;;  %3463 = vmatpush1.bf16.msra.mxu1 %v5729_v19  ;;  %v5785_v55 = vcombine.low %v402_v3, %v406_v5  ;;  %v5792_v19 = vcombine.high %v409_v9, %v413_v10  ;;  %v461_v3 = vld [vmem:[#allocation3 + $0x960] sm:$0xff] }
  0xd5   :  { %3300 = vmatprep.subr.bf16.mxu0 %v5736_v20  ;;  %3464 = vmatprep.subr.bf16.mxu1 %v5738_v24  ;;  %v418_v20 = vld [vmem:[#allocation3 + $0x808] sm:$0xff] }
  0xd6   :  { %v6940_v24 = vld [vmem:[%s7475_s0 + $0x30] sm:$0xff]  ;;  %v5802_v31 = vcombine.high %v418_v20, %v422_v21  ;;  %v5801_v11 = vcombine.low %v418_v20, %v422_v21  ;;  %v477_v20 = vld [vmem:[#allocation3 + $0x9e0] sm:$0xff] }
  0xd7   :  { %v474_v21 = vld [vmem:[#allocation3 + $0x9c8] sm:$0xff] }
  0xd8   :  { %3301 = vmatpush1.bf16.msra.mxu0 %v5735_v26  ;;  %3465 = vmatpush1.bf16.msra.mxu1 %v5737_v27  ;;  %v5791_v26 = vcombine.low %v409_v9, %v413_v10  ;;  %v5793_v27 = vcombine.low %v410_v13, %v414_v15  ;;  %v5840_v9 = vcombine.high %v457_v2, %v461_v3  ;;  %v465_v10 = vld [vmem:[#allocation3 + $0x980] sm:$0xff] }
  0xd9   :  { %3302 = vmatprep.subr.bf16.mxu0 %v5744_v29  ;;  %3466 = vmatprep.subr.bf16.mxu1 %v5746_v33  ;;  %v5800_v29 = vcombine.high %v417_v17, %v421_v54  ;;  %v426_v33 = vld [vmem:[#allocation3 + $0x848] sm:$0xff]  ;;  %v469_v13 = vld [vmem:[#allocation3 + $0x9a0] sm:$0xff] }
  0xdc   :  { %3303 = vmatpush1.bf16.msra.mxu0 %v5743_v35  ;;  %3467 = vmatpush1.bf16.msra.mxu1 %v5745_v36  ;;  %v142_v35 = vcombine.high %v6935_v22, %v6940_v24  ;;  %v6946_v36 = vpack.c.bf16 %v139_v25, %v139_v25  ;;  %v478_v25 = vld [vmem:[#allocation3 + $0x9e8] sm:$0xff] }
  0xdd   :  { %3304 = vmatprep.subr.bf16.mxu0 %v5752_v37  ;;  %3468 = vmatprep.subr.bf16.mxu1 %v5754_v41  ;;  %v5799_v37 = vcombine.low %v417_v17, %v421_v54  ;;  %v5810_v41 = vcombine.high %v426_v33, %v430_v34  ;;  %v5839_v17 = vcombine.low %v457_v2, %v461_v3  ;;  %v517_v2 = vld [vmem:[#allocation3 + $0xb20] sm:$0xff]  ;;  %v514_v3 = vld [vmem:[#allocation3 + $0xb08] sm:$0xff] }
  0xe0   :  { %3305 = vmatpush1.bf16.msra.mxu0 %v5751_v43  ;;  %3469 = vmatpush1.bf16.msra.mxu1 %v5753_v44  ;;  %v6948_v43 = vpack.c.bf16 %v142_v35, %v142_v35  ;;  %v5807_v44 = vcombine.low %v425_v30, %v429_v32  ;;  %v481_v30 = vld [vmem:[#allocation3 + $0xa00] sm:$0xff]  ;;  %v482_v32 = vld [vmem:[#allocation3 + $0xa08] sm:$0xff] }
  0xe1   :  { %3306 = vmatprep.subr.bf16.mxu0 %v5760_v45  ;;  %3470 = vmatprep.subr.bf16.mxu1 %v5762_v49  ;;  %v5809_v45 = vcombine.low %v426_v33, %v430_v34  ;;  %v442_v49 = vld [vmem:[#allocation3 + $0x8c8] sm:$0xff]  ;;  %v5858_v33 = vcombine.high %v474_v21, %v478_v25 }
  0xe2   :  { %v486_v34 = vld [vmem:[#allocation3 + $0xa28] sm:$0xff] }
  0xe4   :  { %3307 = vmatpush1.bf16.msra.mxu0 %v5759_v51  ;;  %3471 = vmatpush1.bf16.msra.mxu1 %v5761_v52  ;;  %v446_v51 = vld [vmem:[#allocation3 + $0x8e8] sm:$0xff]  ;;  %v5815_v52 = vcombine.low %v433_v38, %v437_v39  ;;  %v493_v38 = vld [vmem:[#allocation3 + $0xa60] sm:$0xff] }
  0xe5   :  { %3308 = vmatprep.subr.bf16.mxu0 %v5768_v53  ;;  %3472 = vmatprep.subr.bf16.mxu1 %v5770_v59  ;;  %v5817_v53 = vcombine.low %v434_v40, %v438_v42  ;;  %v450_v59 = vld [vmem:[#allocation3 + $0x908] sm:$0xff]  ;;  %v5826_v60 = vcombine.high %v442_v49, %v446_v51  ;;  %v5866_v40 = vcombine.high %v482_v32, %v486_v34 }
  0xe6   :  { %v490_v39 = vld [vmem:[#allocation3 + $0xa48] sm:$0xff] }
  0xe8   :  { %3309 = vmatpush1.bf16.msra.mxu0 %v5767_v61  ;;  %3473 = vmatpush1.bf16.msra.mxu1 %v5769_v62  ;;  %v454_v61 = vld [vmem:[#allocation3 + $0x928] sm:$0xff]  ;;  %v5823_v62 = vcombine.low %v441_v47, %v445_v48  ;;  %v501_v47 = vld [vmem:[#allocation3 + $0xaa0] sm:$0xff] }
  0xe9   :  { %3310 = vmatprep.subr.bf16.mxu0 %v5776_v0  ;;  %3474 = vmatprep.subr.bf16.mxu1 %v5778_v4  ;;  %v5825_v0 = vcombine.low %v442_v49, %v446_v51  ;;  %v458_v4 = vld [vmem:[#allocation3 + $0x948] sm:$0xff]  ;;  %v5834_v5 = vcombine.high %v450_v59, %v454_v61 }
  0xea   :  { %v498_v48 = vld [vmem:[#allocation3 + $0xa88] sm:$0xff] }
  0xec   :  { %3311 = vmatpush1.bf16.msra.mxu0 %v5775_v6  ;;  %3475 = vmatpush1.bf16.msra.mxu1 %v5777_v7  ;;  %v462_v6 = vld [vmem:[#allocation3 + $0x968] sm:$0xff]  ;;  %v5831_v7 = vcombine.low %v449_v57, %v453_v58  ;;  %v509_v57 = vld [vmem:[#allocation3 + $0xae0] sm:$0xff] }
  0xed   :  { %3312 = vmatprep.subr.bf16.mxu0 %v5784_v8  ;;  %3476 = vmatprep.subr.bf16.mxu1 %v5786_v14  ;;  %v5833_v8 = vcombine.low %v450_v59, %v454_v61  ;;  %v466_v14 = vld [vmem:[#allocation3 + $0x988] sm:$0xff]  ;;  %v5842_v15 = vcombine.high %v458_v4, %v462_v6  ;;  %v5841_v54 = vcombine.low %v458_v4, %v462_v6 }
  0xee   :  { %v506_v58 = vld [vmem:[#allocation3 + $0xac8] sm:$0xff] }
  0xf0   :  { %3313 = vmatpush1.bf16.msra.mxu0 %v5783_v16  ;;  %3477 = vmatpush1.bf16.msra.mxu1 %v5785_v55  ;;  %v470_v16 = vld [vmem:[#allocation3 + $0x9a8] sm:$0xff]  ;;  %v5848_v55 = vcombine.high %v465_v10, %v469_v13 }
  0xf1   :  { %3314 = vmatprep.subr.bf16.mxu0 %v5792_v19  ;;  %3478 = vmatprep.subr.bf16.mxu1 %v5794_v23  ;;  %v473_v19 = vld [vmem:[#allocation3 + $0x9c0] sm:$0xff]  ;;  %v5850_v23 = vcombine.high %v466_v14, %v470_v16 }
  0xf2   :  { %v5855_v35 = vcombine.low %v473_v19, %v477_v20 }
  0xf4   :  { %3315 = vmatpush1.bf16.msra.mxu0 %v5791_v26  ;;  %3479 = vmatpush1.bf16.msra.mxu1 %v5793_v27  ;;  %v5847_v26 = vcombine.low %v465_v10, %v469_v13  ;;  %v5849_v27 = vcombine.low %v466_v14, %v470_v16  ;;  %v525_v10 = vld [vmem:[#allocation3 + $0xb60] sm:$0xff]  ;;  %v522_v13 = vld [vmem:[#allocation3 + $0xb48] sm:$0xff] }
  0xf5   :  { %3325 = vmatprep.subr.bf16.mxu0 %v5800_v29  ;;  %3489 = vmatprep.subr.bf16.mxu1 %v5802_v31  ;;  %v5856_v29 = vcombine.high %v473_v19, %v477_v20  ;;  %v485_v31 = vld [vmem:[#allocation3 + $0xa20] sm:$0xff]  ;;  %v530_v20 = vld [vmem:[#allocation3 + $0xb88] sm:$0xff] }
  0xf6   :  { %v5863_v42 = vcombine.low %v481_v30, %v485_v31  ;;  %v533_v19 = vld [vmem:[#allocation3 + $0xba0] sm:$0xff] }
  0xf7   :  { %3317 = vmatmul.mubr.bf16.vlgmr.msra.gmra.mrb[0].mxu0 %v6946_v36  ;;  %3481 = vmatmul.mubr.bf16.vlgmr.msra.gmra.mrb[0].mxu1 %v6946_v36 }
  0xf8   :  { %3326 = vmatpush1.bf16.msra.mxu0 %v5799_v37  ;;  %3490 = vmatpush1.bf16.msra.mxu1 %v5801_v11  ;;  %v5857_v37 = vcombine.low %v474_v21, %v478_v25  ;;  %v5864_v11 = vcombine.high %v481_v30, %v485_v31  ;;  %v541_v30 = vld [vmem:[#allocation3 + $0xbe0] sm:$0xff]  ;;  %v538_v31 = vld [vmem:[#allocation3 + $0xbc8] sm:$0xff] }
  0xf9   :  { %3327 = vmatprep.subr.bf16.mxu0 %v5808_v12  ;;  %3491 = vmatprep.subr.bf16.mxu1 %v5810_v41  ;;  %v489_v12 = vld [vmem:[#allocation3 + $0xa40] sm:$0xff]  ;;  %v494_v41 = vld [vmem:[#allocation3 + $0xa68] sm:$0xff] }
  0xfa   :  { %3357 = vmatprep.mubr.bf16.mxu0 %v6948_v43  ;;  %3521 = vmatprep.mubr.bf16.mxu1 %v6948_v43  ;;  %v5874_v49 = vcombine.high %v490_v39, %v494_v41  ;;  %v5871_v51 = vcombine.low %v489_v12, %v493_v38 }
  0xfc   :  { %3328 = vmatpush1.bf16.msra.mxu0 %v5807_v44  ;;  %3492 = vmatpush1.bf16.msra.mxu1 %v5809_v45  ;;  %v5865_v44 = vcombine.low %v482_v32, %v486_v34  ;;  %v5872_v45 = vcombine.high %v489_v12, %v493_v38  ;;  %v546_v38 = vld [vmem:[#allocation3 + $0xc08] sm:$0xff] }
  0xfd   :  { %3329 = vmatprep.subr.bf16.mxu0 %v5816_v46  ;;  %3493 = vmatprep.subr.bf16.mxu1 %v5818_v50  ;;  %v497_v46 = vld [vmem:[#allocation3 + $0xa80] sm:$0xff]  ;;  %v502_v50 = vld [vmem:[#allocation3 + $0xaa8] sm:$0xff] }
  0xfe   :  { %v5882_v59 = vcombine.high %v498_v48, %v502_v50  ;;  %v5879_v61 = vcombine.low %v497_v46, %v501_v47 }
 0x100   :  { %3330 = vmatpush1.bf16.msra.mxu0 %v5815_v52  ;;  %3494 = vmatpush1.bf16.msra.mxu1 %v5817_v53  ;;  %v5873_v52 = vcombine.low %v490_v39, %v494_v41  ;;  %v5880_v53 = vcombine.high %v497_v46, %v501_v47  ;;  %v550_v39 = vld [vmem:[#allocation3 + $0xc28] sm:$0xff] }
 0x101   :  { %3331 = vmatprep.subr.bf16.mxu0 %v5824_v56  ;;  %3495 = vmatprep.subr.bf16.mxu1 %v5826_v60  ;;  %v505_v56 = vld [vmem:[#allocation3 + $0xac0] sm:$0xff]  ;;  %v510_v60 = vld [vmem:[#allocation3 + $0xae8] sm:$0xff] }
 0x102   :  { %v5890_v4 = vcombine.high %v506_v58, %v510_v60  ;;  %v5887_v6 = vcombine.low %v505_v56, %v509_v57 }
 0x104   :  { %3332 = vmatpush1.bf16.msra.mxu0 %v5823_v62  ;;  %3496 = vmatpush1.bf16.msra.mxu1 %v5825_v0  ;;  %v5881_v62 = vcombine.low %v498_v48, %v502_v50  ;;  %v5888_v0 = vcombine.high %v505_v56, %v509_v57  ;;  %v553_v48 = vld [vmem:[#allocation3 + $0xc40] sm:$0xff]  ;;  %v554_v50 = vld [vmem:[#allocation3 + $0xc48] sm:$0xff] }
 0x105   :  { %3333 = vmatprep.subr.bf16.mxu0 %v5832_v1  ;;  %3497 = vmatprep.subr.bf16.mxu1 %v5834_v5  ;;  %v513_v1 = vld [vmem:[#allocation3 + $0xb00] sm:$0xff]  ;;  %v518_v5 = vld [vmem:[#allocation3 + $0xb28] sm:$0xff] }
 0x106   :  { %v5898_v14 = vcombine.high %v514_v3, %v518_v5  ;;  %v5895_v16 = vcombine.low %v513_v1, %v517_v2 }
 0x108   :  { %3334 = vmatpush1.bf16.msra.mxu0 %v5831_v7  ;;  %3498 = vmatpush1.bf16.msra.mxu1 %v5833_v8  ;;  %v5889_v7 = vcombine.low %v506_v58, %v510_v60  ;;  %v5896_v8 = vcombine.high %v513_v1, %v517_v2  ;;  %v561_v58 = vld [vmem:[#allocation3 + $0xc80] sm:$0xff]  ;;  %v562_v60 = vld [vmem:[#allocation3 + $0xc88] sm:$0xff] }
 0x109   :  { %3335 = vmatprep.subr.bf16.mxu0 %v5840_v9  ;;  %3499 = vmatprep.subr.bf16.mxu1 %v5842_v15  ;;  %v521_v9 = vld [vmem:[#allocation3 + $0xb40] sm:$0xff]  ;;  %v526_v15 = vld [vmem:[#allocation3 + $0xb68] sm:$0xff] }
 0x10a   :  { %v5906_v21 = vcombine.high %v522_v13, %v526_v15  ;;  %v5903_v25 = vcombine.low %v521_v9, %v525_v10 }
 0x10c   :  { %3336 = vmatpush1.bf16.msra.mxu0 %v5839_v17  ;;  %3500 = vmatpush1.bf16.msra.mxu1 %v5841_v54  ;;  %v5897_v17 = vcombine.low %v514_v3, %v518_v5  ;;  %v5904_v54 = vcombine.high %v521_v9, %v525_v10  ;;  %v569_v5 = vld [vmem:[#allocation3 + $0xcc0] sm:$0xff] }
 0x10d   :  { %3337 = vmatprep.subr.bf16.mxu0 %v5848_v55  ;;  %3501 = vmatprep.subr.bf16.mxu1 %v5850_v23  ;;  %v529_v55 = vld [vmem:[#allocation3 + $0xb80] sm:$0xff]  ;;  %v534_v23 = vld [vmem:[#allocation3 + $0xba8] sm:$0xff] }
 0x10e   :  { %v5914_v32 = vcombine.high %v530_v20, %v534_v23  ;;  %v5911_v34 = vcombine.low %v529_v55, %v533_v19 }
 0x110   :  { %3338 = vmatpush1.bf16.msra.mxu0 %v5847_v26  ;;  %3502 = vmatpush1.bf16.msra.mxu1 %v5849_v27  ;;  %v5905_v26 = vcombine.low %v522_v13, %v526_v15  ;;  %v5912_v27 = vcombine.high %v529_v55, %v533_v19  ;;  %v577_v15 = vld [vmem:[#allocation3 + $0xd00] sm:$0xff] }
 0x111   :  { %3339 = vmatprep.subr.bf16.mxu0 %v5856_v29  ;;  %3503 = vmatprep.subr.bf16.mxu1 %v5858_v33  ;;  %v537_v29 = vld [vmem:[#allocation3 + $0xbc0] sm:$0xff]  ;;  %v542_v33 = vld [vmem:[#allocation3 + $0xbe8] sm:$0xff] }
 0x112   :  { %v5920_v12 = vcombine.high %v537_v29, %v541_v30  ;;  %v5922_v41 = vcombine.high %v538_v31, %v542_v33  ;;  %v5921_v46 = vcombine.low %v538_v31, %v542_v33  ;;  %v593_v33 = vld [vmem:[#allocation3 + $0xd80] sm:$0xff] }
 0x114   :  { %3340 = vmatpush1.bf16.msra.mxu0 %v5855_v35  ;;  %3504 = vmatpush1.bf16.msra.mxu1 %v5857_v37  ;;  %v545_v35 = vld [vmem:[#allocation3 + $0xc00] sm:$0xff] }
 0x115   :  { %3341 = vmatprep.subr.bf16.mxu0 %v5864_v11  ;;  %3505 = vmatprep.subr.bf16.mxu1 %v5866_v40  ;;  %v549_v37 = vld [vmem:[#allocation3 + $0xc20] sm:$0xff]  ;;  %v5913_v11 = vcombine.low %v530_v20, %v534_v23  ;;  %v6957_v40 = vld [vmem:[%s7475_s0 + $0x18] sm:$0xff] }
 0x116   :  { %v5928_v47 = vcombine.high %v545_v35, %v549_v37  ;;  %v5927_v57 = vcombine.low %v545_v35, %v549_v37  ;;  %v585_v23 = vld [vmem:[#allocation3 + $0xd40] sm:$0xff]  ;;  %v594_v35 = vld [vmem:[#allocation3 + $0xd88] sm:$0xff] }
 0x117   :  { %v598_v37 = vld [vmem:[#allocation3 + $0xda8] sm:$0xff] }
 0x118   :  { %3342 = vmatpush1.bf16.msra.mxu0 %v5863_v42  ;;  %3506 = vmatpush1.bf16.msra.mxu1 %v5865_v44  ;;  %v6962_v42 = vld [vmem:[%s7475_s0 + $0x38] sm:$0xff]  ;;  %v141_v44 = vcombine.low %v6935_v22, %v6940_v24  ;;  %v5929_v22 = vcombine.low %v546_v38, %v550_v39 }
 0x119   :  { %3343 = vmatprep.subr.bf16.mxu0 %v5872_v45  ;;  %3507 = vmatprep.subr.bf16.mxu1 %v5874_v49  ;;  %v5919_v45 = vcombine.low %v537_v29, %v541_v30  ;;  %v557_v49 = vld [vmem:[#allocation3 + $0xc60] sm:$0xff] }
 0x11a   :  { %v6968_v56 = vpack.c.bf16 %v141_v44, %v141_v44  ;;  %v5936_v24 = vcombine.high %v553_v48, %v557_v49  ;;  %v5935_v1 = vcombine.low %v553_v48, %v557_v49  ;;  %v601_v44 = vld [vmem:[#allocation3 + $0xdc0] sm:$0xff]  ;;  %v606_v48 = vld [vmem:[#allocation3 + $0xde8] sm:$0xff] }
 0x11c   :  { %3344 = vmatpush1.bf16.msra.mxu0 %v5871_v51  ;;  %3508 = vmatpush1.bf16.msra.mxu1 %v5873_v52  ;;  %v5930_v51 = vcombine.high %v546_v38, %v550_v39  ;;  %v558_v52 = vld [vmem:[#allocation3 + $0xc68] sm:$0xff]  ;;  %v5542_v39 = vld [vmem:[#allocation2] ss:$0 sm:$0xff] }
 0x11d   :  { %3345 = vmatprep.subr.bf16.mxu0 %v5880_v53  ;;  %3509 = vmatprep.subr.bf16.mxu1 %v5882_v59  ;;  %v144_v53 = vcombine.high %v6957_v40, %v6962_v42  ;;  %v565_v59 = vld [vmem:[#allocation3 + $0xca0] sm:$0xff]  ;;  %v5937_v2 = vcombine.low %v554_v50, %v558_v52 }
 0x11e   :  { %v5944_v3 = vcombine.high %v561_v58, %v565_v59  ;;  %v5943_v9 = vcombine.low %v561_v58, %v565_v59 }
 0x120   :  { %3346 = vmatpush1.bf16.msra.mxu0 %v5879_v61  ;;  %3510 = vmatpush1.bf16.msra.mxu1 %v5881_v62  ;;  %v5938_v61 = vcombine.high %v554_v50, %v558_v52  ;;  %v566_v62 = vld [vmem:[#allocation3 + $0xca8] sm:$0xff]  ;;  %v5977_v50 = vcombine.low %v594_v35, %v598_v37 }
 0x121   :  { %3347 = vmatprep.subr.bf16.mxu0 %v5888_v0  ;;  %3511 = vmatprep.subr.bf16.mxu1 %v5890_v4  ;;  %v6970_v0 = vpack.c.bf16 %v144_v53, %v144_v53  ;;  %v5946_v4 = vcombine.high %v562_v60, %v566_v62  ;;  %v5945_v10 = vcombine.low %v562_v60, %v566_v62  ;;  %v609_v53 = vld [vmem:[#allocation3 + $0xe00] sm:$0xff] }
 0x122   :  { %v617_v62 = vld [vmem:[#allocation3 + $0xe40] sm:$0xff] }
 0x124   :  { %3348 = vmatpush1.bf16.msra.mxu0 %v5887_v6  ;;  %3512 = vmatpush1.bf16.msra.mxu1 %v5889_v7  ;;  %v573_v6 = vld [vmem:[#allocation3 + $0xce0] sm:$0xff]  ;;  %v570_v7 = vld [vmem:[#allocation3 + $0xcc8] sm:$0xff] }
 0x125   :  { %3349 = vmatprep.subr.bf16.mxu0 %v5896_v8  ;;  %3513 = vmatprep.subr.bf16.mxu1 %v5898_v14  ;;  %v574_v8 = vld [vmem:[#allocation3 + $0xce8] sm:$0xff]  ;;  %v5952_v13 = vcombine.high %v569_v5, %v573_v6  ;;  %v5951_v55 = vcombine.low %v569_v5, %v573_v6 }
 0x126   :  { %v5954_v14 = vcombine.high %v570_v7, %v574_v8  ;;  %v5953_v19 = vcombine.low %v570_v7, %v574_v8  ;;  %v625_v8 = vld [vmem:[#allocation3 + $0xe80] sm:$0xff] }
 0x128   :  { %3350 = vmatpush1.bf16.msra.mxu0 %v5895_v16  ;;  %3514 = vmatpush1.bf16.msra.mxu1 %v5897_v17  ;;  %v581_v16 = vld [vmem:[#allocation3 + $0xd20] sm:$0xff]  ;;  %v578_v17 = vld [vmem:[#allocation3 + $0xd08] sm:$0xff] }
 0x129   :  { %3351 = vmatprep.subr.bf16.mxu0 %v5904_v54  ;;  %3515 = vmatprep.subr.bf16.mxu1 %v5906_v21  ;;  %v582_v54 = vld [vmem:[#allocation3 + $0xd28] sm:$0xff]  ;;  %v5960_v20 = vcombine.high %v577_v15, %v581_v16  ;;  %v5959_v29 = vcombine.low %v577_v15, %v581_v16 }
 0x12a   :  { %v5962_v21 = vcombine.high %v578_v17, %v582_v54  ;;  %v5961_v30 = vcombine.low %v578_v17, %v582_v54  ;;  %v633_v54 = vld [vmem:[#allocation3 + $0xec0] sm:$0xff] }
 0x12c   :  { %3352 = vmatpush1.bf16.msra.mxu0 %v5903_v25  ;;  %3516 = vmatpush1.bf16.msra.mxu1 %v5905_v26  ;;  %v589_v25 = vld [vmem:[#allocation3 + $0xd60] sm:$0xff]  ;;  %v586_v26 = vld [vmem:[#allocation3 + $0xd48] sm:$0xff] }
 0x12d   :  { %3353 = vmatprep.subr.bf16.mxu0 %v5912_v27  ;;  %3517 = vmatprep.subr.bf16.mxu1 %v5914_v32  ;;  %v590_v27 = vld [vmem:[#allocation3 + $0xd68] sm:$0xff]  ;;  %v5968_v31 = vcombine.high %v585_v23, %v589_v25 }
 0x12e   :  { %v5970_v32 = vcombine.high %v586_v26, %v590_v27 }
 0x130   :  { %3354 = vmatpush1.bf16.msra.mxu0 %v5911_v34  ;;  %3518 = vmatpush1.bf16.msra.mxu1 %v5913_v11  ;;  %v597_v34 = vld [vmem:[#allocation3 + $0xda0] sm:$0xff]  ;;  %v5967_v11 = vcombine.low %v585_v23, %v589_v25 }
 0x131   :  { %3355 = vmatprep.subr.bf16.mxu0 %v5920_v12  ;;  %3519 = vmatprep.subr.bf16.mxu1 %v5922_v41  ;;  %v5969_v12 = vcombine.low %v586_v26, %v590_v27  ;;  %v5976_v38 = vcombine.high %v593_v33, %v597_v34  ;;  %v5978_v41 = vcombine.high %v594_v35, %v598_v37  ;;  %v641_v27 = vld [vmem:[#allocation3 + $0xf00] sm:$0xff] }
 0x132   :  { %v5975_v49 = vcombine.low %v593_v33, %v597_v34  ;;  %v649_v37 = vld [vmem:[#allocation3 + $0xf40] sm:$0xff] }
 0x134   :  { %3356 = vmatpush1.bf16.msra.mxu0 %v5919_v45  ;;  %3520 = vmatpush1.bf16.msra.mxu1 %v5921_v46  ;;  %v605_v45 = vld [vmem:[#allocation3 + $0xde0] sm:$0xff]  ;;  %v6745_v46 = vmov 0  }
 0x135   :  { %3366 = vmatprep.subr.bf16.mxu0 %v5928_v47  ;;  %3530 = vmatprep.subr.bf16.mxu1 %v5930_v51  ;;  %v602_v47 = vld [vmem:[#allocation3 + $0xdc8] sm:$0xff]  ;;  %v5984_v51 = vcombine.high %v601_v44, %v605_v45  ;;  %v5983_v58 = vcombine.low %v601_v44, %v605_v45 }
 0x136   :  { %6466 = vset.pattern.permute.xlu0 %v6745_v46  ;;  %v5986_v52 = vcombine.high %v602_v47, %v606_v48  ;;  %v5985_v59 = vcombine.low %v602_v47, %v606_v48  ;;  %v657_v46 = vld [vmem:[#allocation3 + $0xf80] sm:$0xff]  ;;  %v658_v48 = vld [vmem:[#allocation3 + $0xf88] sm:$0xff] }
 0x137   :  { %3358 = vmatmul.mubr.bf16.vlgmr.msra.gmra.mrb[0].mxu0 %v6968_v56  ;;  %3522 = vmatmul.mubr.bf16.vlgmr.msra.gmra.mrb[0].mxu1 %v6968_v56  ;;  %v661_v47 = vld [vmem:[#allocation3 + $0xfa0] sm:$0xff] }
 0x138   :  { %3367 = vmatpush1.bf16.msra.mxu0 %v5927_v57  ;;  %3531 = vmatpush1.bf16.msra.mxu1 %v5929_v22  ;;  %v613_v57 = vld [vmem:[#allocation3 + $0xe20] sm:$0xff]  ;;  %v610_v22 = vld [vmem:[#allocation3 + $0xe08] sm:$0xff] }
 0x139   :  { %3368 = vmatprep.subr.bf16.mxu0 %v5936_v24  ;;  %3532 = vmatprep.subr.bf16.mxu1 %v5938_v61  ;;  %v614_v24 = vld [vmem:[#allocation3 + $0xe28] sm:$0xff]  ;;  %v5992_v60 = vcombine.high %v609_v53, %v613_v57 }
 0x13a   :  { %3398 = vmatprep.mubr.bf16.mxu0 %v6970_v0  ;;  %3562 = vmatprep.mubr.bf16.mxu1 %v6970_v0  ;;  %v5994_v61 = vcombine.high %v610_v22, %v614_v24  ;;  %v5993_v5 = vcombine.low %v610_v22, %v614_v24  ;;  %v669_v22 = vld [vmem:[#allocation3 + $0xfe0] sm:$0xff]  ;;  %v666_v24 = vld [vmem:[#allocation3 + $0xfc8] sm:$0xff] }
 0x13b   :  { %680 = vperm.xlu0 %6466, %v5542_v39  }
 0x13c   :  { %3369 = vmatpush1.bf16.msra.mxu0 %v5935_v1  ;;  %3533 = vmatpush1.bf16.msra.mxu1 %v5937_v2  ;;  %v621_v1 = vld [vmem:[#allocation3 + $0xe60] sm:$0xff]  ;;  %v618_v2 = vld [vmem:[#allocation3 + $0xe48] sm:$0xff] }
 0x13d   :  { %3370 = vmatprep.subr.bf16.mxu0 %v5944_v3  ;;  %3534 = vmatprep.subr.bf16.mxu1 %v5946_v4  ;;  %v622_v3 = vld [vmem:[#allocation3 + $0xe68] sm:$0xff]  ;;  %v5991_v4 = vcombine.low %v609_v53, %v613_v57  ;;  %v6000_v6 = vcombine.high %v617_v62, %v621_v1  ;;  %v665_v57 = vld [vmem:[#allocation3 + $0xfc0] sm:$0xff] }
 0x13e   :  { %v6002_v7 = vcombine.high %v618_v2, %v622_v3  ;;  %v6001_v15 = vcombine.low %v618_v2, %v622_v3  ;;  %v167_v2 = vld [vmem:[#allocation3 + $0x30] sm:$0xff]  ;;  %v143_v3 = vcombine.low %v6957_v40, %v6962_v42 }
 0x140   :  { %3371 = vmatpush1.bf16.msra.mxu0 %v5943_v9  ;;  %3535 = vmatpush1.bf16.msra.mxu1 %v5945_v10  ;;  %v629_v9 = vld [vmem:[#allocation3 + $0xea0] sm:$0xff]  ;;  %v626_v10 = vld [vmem:[#allocation3 + $0xe88] sm:$0xff] }
 0x141   :  { %3372 = vmatprep.subr.bf16.mxu0 %v5952_v13  ;;  %3536 = vmatprep.subr.bf16.mxu1 %v5954_v14  ;;  %v630_v13 = vld [vmem:[#allocation3 + $0xea8] sm:$0xff]  ;;  %v5999_v14 = vcombine.low %v617_v62, %v621_v1  ;;  %v6008_v16 = vcombine.high %v625_v8, %v629_v9  ;;  %v163_v1 = vld [vmem:[#allocation3 + $0x10] sm:$0xff] }
 0x142   :  { %v6010_v17 = vcombine.high %v626_v10, %v630_v13  ;;  %v6009_v23 = vcombine.low %v626_v10, %v630_v13  ;;  %v171_v10 = vld [vmem:[#allocation3 + $0x50] sm:$0xff] }
 0x143   :  { %v175_v13 = vld [vmem:[#allocation3 + $0x70] sm:$0xff] }
 0x144   :  { %3373 = vmatpush1.bf16.msra.mxu0 %v5951_v55  ;;  %3537 = vmatpush1.bf16.msra.mxu1 %v5953_v19  ;;  %v637_v55 = vld [vmem:[#allocation3 + $0xee0] sm:$0xff]  ;;  %v634_v19 = vld [vmem:[#allocation3 + $0xec8] sm:$0xff]  ;;  %v5556_v42 = vcombine.high %v171_v10, %v175_v13 }
 0x145   :  { %3374 = vmatprep.subr.bf16.mxu0 %v5960_v20  ;;  %3538 = vmatprep.subr.bf16.mxu1 %v5962_v21  ;;  %v638_v20 = vld [vmem:[#allocation3 + $0xee8] sm:$0xff]  ;;  %v6007_v21 = vcombine.low %v625_v8, %v629_v9  ;;  %v6016_v25 = vcombine.high %v633_v54, %v637_v55  ;;  %v5548_v8 = vcombine.high %v163_v1, %v167_v2 }
 0x146   :  { %v6018_v26 = vcombine.high %v634_v19, %v638_v20  ;;  %v6017_v33 = vcombine.low %v634_v19, %v638_v20  ;;  %v183_v19 = vld [vmem:[#allocation3 + $0xb0] sm:$0xff]  ;;  %v180_v20 = vld [vmem:[#allocation3 + $0x98] sm:$0xff] }
 0x148   :  { %3375 = vmatpush1.bf16.msra.mxu0 %v5959_v29  ;;  %3539 = vmatpush1.bf16.msra.mxu1 %v5961_v30  ;;  %v645_v29 = vld [vmem:[#allocation3 + $0xf20] sm:$0xff]  ;;  %v642_v30 = vld [vmem:[#allocation3 + $0xf08] sm:$0xff] }
 0x149   :  { %3376 = vmatprep.subr.bf16.mxu0 %v5968_v31  ;;  %3540 = vmatprep.subr.bf16.mxu1 %v5970_v32  ;;  %v646_v31 = vld [vmem:[#allocation3 + $0xf28] sm:$0xff]  ;;  %v6015_v32 = vcombine.low %v633_v54, %v637_v55  ;;  %v6024_v34 = vcombine.high %v641_v27, %v645_v29  ;;  %v6023_v39 = vcombine.low %v641_v27, %v645_v29  ;;  %v179_v55 = vld [vmem:[#allocation3 + $0x90] sm:$0xff] }
 0x14a   :  { %v6026_v35 = vcombine.high %v642_v30, %v646_v31  ;;  %v187_v29 = vld [vmem:[#allocation3 + $0xd0] sm:$0xff] }
 0x14c   :  { %3377 = vmatpush1.bf16.msra.mxu0 %v5967_v11  ;;  %3541 = vmatpush1.bf16.msra.mxu1 %v5969_v12  ;;  %v653_v11 = vld [vmem:[#allocation3 + $0xf60] sm:$0xff]  ;;  %v650_v12 = vld [vmem:[#allocation3 + $0xf48] sm:$0xff] }
 0x14d   :  { %3378 = vmatprep.subr.bf16.mxu0 %v5976_v38  ;;  %3542 = vmatprep.subr.bf16.mxu1 %v5978_v41  ;;  %v654_v38 = vld [vmem:[#allocation3 + $0xf68] sm:$0xff]  ;;  %v6025_v41 = vcombine.low %v642_v30, %v646_v31  ;;  %v6032_v44 = vcombine.high %v649_v37, %v653_v11  ;;  %v191_v30 = vld [vmem:[#allocation3 + $0xf0] sm:$0xff]  ;;  %v188_v31 = vld [vmem:[#allocation3 + $0xd8] sm:$0xff] }
 0x14e   :  { %v6034_v45 = vcombine.high %v650_v12, %v654_v38 }
 0x150   :  { %3379 = vmatpush1.bf16.msra.mxu0 %v5975_v49  ;;  %3543 = vmatpush1.bf16.msra.mxu1 %v5977_v50  ;;  %v662_v49 = vld [vmem:[#allocation3 + $0xfa8] sm:$0xff]  ;;  %v6031_v50 = vcombine.low %v649_v37, %v653_v11  ;;  %v195_v11 = vld [vmem:[#allocation3 + $0x110] sm:$0xff] }
 0x151   :  { %3380 = vmatprep.subr.bf16.mxu0 %v5984_v51  ;;  %3544 = vmatprep.subr.bf16.mxu1 %v5986_v52  ;;  %v6033_v51 = vcombine.low %v650_v12, %v654_v38  ;;  %v6040_v52 = vcombine.high %v657_v46, %v661_v47  ;;  %v6042_v53 = vcombine.high %v658_v48, %v662_v49  ;;  %v199_v12 = vld [vmem:[#allocation3 + $0x130] sm:$0xff]  ;;  %v196_v38 = vld [vmem:[#allocation3 + $0x118] sm:$0xff] }
 0x154   :  { %3381 = vmatpush1.bf16.msra.mxu0 %v5983_v58  ;;  %3545 = vmatpush1.bf16.msra.mxu1 %v5985_v59  ;;  %v670_v58 = vld [vmem:[#allocation3 + $0xfe8] sm:$0xff]  ;;  %v6039_v59 = vcombine.low %v657_v46, %v661_v47  ;;  %v203_v46 = vld [vmem:[#allocation3 + $0x150] sm:$0xff] }
 0x155   :  { %3382 = vmatprep.subr.bf16.mxu0 %v5992_v60  ;;  %3546 = vmatprep.subr.bf16.mxu1 %v5994_v61  ;;  %v6041_v60 = vcombine.low %v658_v48, %v662_v49  ;;  %v6048_v61 = vcombine.high %v665_v57, %v669_v22  ;;  %v6050_v62 = vcombine.high %v666_v24, %v670_v58  ;;  %v207_v47 = vld [vmem:[#allocation3 + $0x170] sm:$0xff]  ;;  %v204_v48 = vld [vmem:[#allocation3 + $0x158] sm:$0xff] }
 0x156   :  { %v208_v49 = vld [vmem:[#allocation3 + $0x178] sm:$0xff] }
 0x158   :  { %3383 = vmatpush1.bf16.msra.mxu0 %v5991_v4  ;;  %3547 = vmatpush1.bf16.msra.mxu1 %v5993_v5  ;;  %v164_v4 = vld [vmem:[#allocation3 + $0x18] sm:$0xff] }
 0x159   :  { %3384 = vmatprep.subr.bf16.mxu0 %v6000_v6  ;;  %3548 = vmatprep.subr.bf16.mxu1 %v6002_v7  ;;  %v168_v5 = vld [vmem:[#allocation3 + $0x38] sm:$0xff]  ;;  %v6047_v6 = vcombine.low %v665_v57, %v669_v22  ;;  %v6049_v7 = vcombine.low %v666_v24, %v670_v58  ;;  %v211_v57 = vld [vmem:[#allocation3 + $0x190] sm:$0xff] }
 0x15a   :  { %v5550_v9 = vcombine.high %v164_v4, %v168_v5  ;;  %v5549_v40 = vcombine.low %v164_v4, %v168_v5  ;;  %v215_v22 = vld [vmem:[#allocation3 + $0x1b0] sm:$0xff]  ;;  %v212_v24 = vld [vmem:[#allocation3 + $0x198] sm:$0xff] }
 0x15b   :  { %v216_v58 = vld [vmem:[#allocation3 + $0x1b8] sm:$0xff]  ;;  %v5595_v5 = vcombine.low %v211_v57, %v215_v22 }
 0x15c   :  { %3385 = vmatpush1.bf16.msra.mxu0 %v5999_v14  ;;  %3549 = vmatpush1.bf16.msra.mxu1 %v6001_v15  ;;  %v6978_v14 = vpack.c.bf16 %v143_v3, %v143_v3  ;;  %v172_v15 = vld [vmem:[#allocation3 + $0x58] sm:$0xff] }
 0x15d   :  { %3386 = vmatprep.subr.bf16.mxu0 %v6008_v16  ;;  %3550 = vmatprep.subr.bf16.mxu1 %v6010_v17  ;;  %v176_v16 = vld [vmem:[#allocation3 + $0x78] sm:$0xff]  ;;  %v5547_v17 = vcombine.low %v163_v1, %v167_v2  ;;  %v219_v1 = vld [vmem:[#allocation3 + $0x1d0] sm:$0xff] }
 0x15e   :  { %v5558_v54 = vcombine.high %v172_v15, %v176_v16  ;;  %v223_v2 = vld [vmem:[#allocation3 + $0x1f0] sm:$0xff]  ;;  %v220_v3 = vld [vmem:[#allocation3 + $0x1d8] sm:$0xff] }
 0x15f   :  { %v224_v4 = vld [vmem:[#allocation3 + $0x1f8] sm:$0xff] }
 0x160   :  { %3387 = vmatpush1.bf16.msra.mxu0 %v6007_v21  ;;  %3551 = vmatpush1.bf16.msra.mxu1 %v6009_v23  ;;  %v184_v21 = vld [vmem:[#allocation3 + $0xb8] sm:$0xff]  ;;  %v5555_v23 = vcombine.low %v171_v10, %v175_v13  ;;  %v231_v10 = vld [vmem:[#allocation3 + $0x230] sm:$0xff] }
 0x161   :  { %3388 = vmatprep.subr.bf16.mxu0 %v6016_v25  ;;  %3552 = vmatprep.subr.bf16.mxu1 %v6018_v26  ;;  %v5557_v25 = vcombine.low %v172_v15, %v176_v16  ;;  %v5564_v26 = vcombine.high %v179_v55, %v183_v19  ;;  %v5566_v27 = vcombine.high %v180_v20, %v184_v21  ;;  %v228_v13 = vld [vmem:[#allocation3 + $0x218] sm:$0xff] }
 0x162   :  { %v232_v15 = vld [vmem:[#allocation3 + $0x238] sm:$0xff]  ;;  %v5603_v16 = vcombine.low %v219_v1, %v223_v2 }
 0x164   :  { %3389 = vmatpush1.bf16.msra.mxu0 %v6015_v32  ;;  %3553 = vmatpush1.bf16.msra.mxu1 %v6017_v33  ;;  %v192_v32 = vld [vmem:[#allocation3 + $0xf8] sm:$0xff]  ;;  %v5563_v33 = vcombine.low %v179_v55, %v183_v19  ;;  %v239_v55 = vld [vmem:[#allocation3 + $0x270] sm:$0xff] }
 0x165   :  { %3390 = vmatprep.subr.bf16.mxu0 %v6024_v34  ;;  %3554 = vmatprep.subr.bf16.mxu1 %v6026_v35  ;;  %v5565_v34 = vcombine.low %v180_v20, %v184_v21  ;;  %v5572_v35 = vcombine.high %v187_v29, %v191_v30  ;;  %v5574_v37 = vcombine.high %v188_v31, %v192_v32  ;;  %v236_v19 = vld [vmem:[#allocation3 + $0x258] sm:$0xff] }
 0x166   :  { %v240_v20 = vld [vmem:[#allocation3 + $0x278] sm:$0xff] }
 0x168   :  { %3391 = vmatpush1.bf16.msra.mxu0 %v6023_v39  ;;  %3555 = vmatpush1.bf16.msra.mxu1 %v6025_v41  ;;  %v200_v39 = vld [vmem:[#allocation3 + $0x138] sm:$0xff]  ;;  %v5571_v41 = vcombine.low %v187_v29, %v191_v30  ;;  %v247_v29 = vld [vmem:[#allocation3 + $0x2b0] sm:$0xff] }
 0x169   :  { %3392 = vmatprep.subr.bf16.mxu0 %v6032_v44  ;;  %3556 = vmatprep.subr.bf16.mxu1 %v6034_v45  ;;  %v5573_v44 = vcombine.low %v188_v31, %v192_v32  ;;  %v5580_v45 = vcombine.high %v195_v11, %v199_v12  ;;  %v244_v30 = vld [vmem:[#allocation3 + $0x298] sm:$0xff] }
 0x16a   :  { %v248_v31 = vld [vmem:[#allocation3 + $0x2b8] sm:$0xff] }
 0x16c   :  { %3393 = vmatpush1.bf16.msra.mxu0 %v6031_v50  ;;  %3557 = vmatpush1.bf16.msra.mxu1 %v6033_v51  ;;  %v5579_v50 = vcombine.low %v195_v11, %v199_v12  ;;  %v5581_v51 = vcombine.low %v196_v38, %v200_v39  ;;  %v255_v11 = vld [vmem:[#allocation3 + $0x2f0] sm:$0xff]  ;;  %v252_v12 = vld [vmem:[#allocation3 + $0x2d8] sm:$0xff] }
 0x16d   :  { %3394 = vmatprep.subr.bf16.mxu0 %v6040_v52  ;;  %3558 = vmatprep.subr.bf16.mxu1 %v6042_v53  ;;  %v5588_v52 = vcombine.high %v203_v46, %v207_v47  ;;  %v5590_v53 = vcombine.high %v204_v48, %v208_v49 }
 0x170   :  { %3395 = vmatpush1.bf16.msra.mxu0 %v6039_v59  ;;  %3559 = vmatpush1.bf16.msra.mxu1 %v6041_v60  ;;  %v5587_v59 = vcombine.low %v203_v46, %v207_v47  ;;  %v5589_v60 = vcombine.low %v204_v48, %v208_v49  ;;  %v263_v46 = vld [vmem:[#allocation3 + $0x330] sm:$0xff]  ;;  %v260_v47 = vld [vmem:[#allocation3 + $0x318] sm:$0xff] }
 0x171   :  { %3396 = vmatprep.subr.bf16.mxu0 %v6048_v61  ;;  %3560 = vmatprep.subr.bf16.mxu1 %v6050_v62  ;;  %v5596_v61 = vcombine.high %v211_v57, %v215_v22  ;;  %v5598_v62 = vcombine.high %v212_v24, %v216_v58  ;;  %v264_v48 = vld [vmem:[#allocation3 + $0x338] sm:$0xff]  ;;  %v271_v57 = vld [vmem:[#allocation3 + $0x370] sm:$0xff] }
 0x172   :  { %v268_v22 = vld [vmem:[#allocation3 + $0x358] sm:$0xff] }
 0x174   :  { %3397 = vmatpush1.bf16.msra.mxu0 %v6047_v6  ;;  %3561 = vmatpush1.bf16.msra.mxu1 %v6049_v7  ;;  %v5597_v6 = vcombine.low %v212_v24, %v216_v58  ;;  %v5604_v7 = vcombine.high %v219_v1, %v223_v2  ;;  %v272_v24 = vld [vmem:[#allocation3 + $0x378] sm:$0xff]  ;;  %v279_v1 = vld [vmem:[#allocation3 + $0x3b0] sm:$0xff] }
 0x175   :  { %3571 = vmatprep.subr.bf16.mxu0 %v5548_v8  ;;  %3735 = vmatprep.subr.bf16.mxu1 %v5550_v9  ;;  %v5606_v8 = vcombine.high %v220_v3, %v224_v4  ;;  %v227_v9 = vld [vmem:[#allocation3 + $0x210] sm:$0xff]  ;;  %v276_v2 = vld [vmem:[#allocation3 + $0x398] sm:$0xff] }
 0x176   :  { %v5611_v21 = vcombine.low %v227_v9, %v231_v10 }
 0x177   :  { %3399 = vmatmul.mubr.bf16.vlgmr.msra.gmra.mrb[0].mxu0 %v6978_v14  ;;  %3563 = vmatmul.mubr.bf16.vlgmr.msra.gmra.mrb[0].mxu1 %v6978_v14 }
 0x178   :  { %3572 = vmatpush1.bf16.msra.mxu0 %v5547_v17  ;;  %3736 = vmatpush1.bf16.msra.mxu1 %v5549_v40  ;;  %v5605_v17 = vcombine.low %v220_v3, %v224_v4  ;;  %v5612_v40 = vcombine.high %v227_v9, %v231_v10  ;;  %v280_v3 = vld [vmem:[#allocation3 + $0x3b8] sm:$0xff]  ;;  %v287_v9 = vld [vmem:[#allocation3 + $0x3f0] sm:$0xff] }
 0x179   :  { %3573 = vmatprep.subr.bf16.mxu0 %v5556_v42  ;;  %3737 = vmatprep.subr.bf16.mxu1 %v5558_v54  ;;  %v5614_v42 = vcombine.high %v228_v13, %v232_v15  ;;  %v235_v54 = vld [vmem:[#allocation3 + $0x250] sm:$0xff]  ;;  %v284_v10 = vld [vmem:[#allocation3 + $0x3d8] sm:$0xff] }
 0x17a   :  { %3603 = vmatprep.mubr.bf16.mxu0 %v6906_v63  ;;  %3767 = vmatprep.mubr.bf16.mxu1 %v6906_v63  ;;  %v5582_v63 = vcombine.high %v196_v38, %v200_v39  ;;  %v5619_v32 = vcombine.low %v235_v54, %v239_v55  ;;  %v256_v38 = vld [vmem:[#allocation3 + $0x2f8] sm:$0xff] }
 0x17c   :  { %3574 = vmatpush1.bf16.msra.mxu0 %v5555_v23  ;;  %3738 = vmatpush1.bf16.msra.mxu1 %v5557_v25  ;;  %v5613_v23 = vcombine.low %v228_v13, %v232_v15  ;;  %v5620_v25 = vcombine.high %v235_v54, %v239_v55  ;;  %v288_v13 = vld [vmem:[#allocation3 + $0x3f8] sm:$0xff]  ;;  %v295_v54 = vld [vmem:[#allocation3 + $0x430] sm:$0xff] }
 0x17d   :  { %3575 = vmatprep.subr.bf16.mxu0 %v5564_v26  ;;  %3739 = vmatprep.subr.bf16.mxu1 %v5566_v27  ;;  %v5622_v26 = vcombine.high %v236_v19, %v240_v20  ;;  %v243_v27 = vld [vmem:[#allocation3 + $0x290] sm:$0xff]  ;;  %v292_v55 = vld [vmem:[#allocation3 + $0x418] sm:$0xff] }
 0x17e   :  { %v5627_v39 = vcombine.low %v243_v27, %v247_v29 }
 0x180   :  { %3576 = vmatpush1.bf16.msra.mxu0 %v5563_v33  ;;  %3740 = vmatpush1.bf16.msra.mxu1 %v5565_v34  ;;  %v5621_v33 = vcombine.low %v236_v19, %v240_v20  ;;  %v5628_v34 = vcombine.high %v243_v27, %v247_v29  ;;  %v296_v19 = vld [vmem:[#allocation3 + $0x438] sm:$0xff]  ;;  %v303_v27 = vld [vmem:[#allocation3 + $0x470] sm:$0xff] }
 0x181   :  { %3577 = vmatprep.subr.bf16.mxu0 %v5572_v35  ;;  %3741 = vmatprep.subr.bf16.mxu1 %v5574_v37  ;;  %v5630_v35 = vcombine.high %v244_v30, %v248_v31  ;;  %v251_v37 = vld [vmem:[#allocation3 + $0x2d0] sm:$0xff]  ;;  %v300_v29 = vld [vmem:[#allocation3 + $0x458] sm:$0xff] }
 0x182   :  { %v5635_v49 = vcombine.low %v251_v37, %v255_v11 }
 0x184   :  { %3578 = vmatpush1.bf16.msra.mxu0 %v5571_v41  ;;  %3742 = vmatpush1.bf16.msra.mxu1 %v5573_v44  ;;  %v5629_v41 = vcombine.low %v244_v30, %v248_v31  ;;  %v5636_v44 = vcombine.high %v251_v37, %v255_v11  ;;  %v304_v30 = vld [vmem:[#allocation3 + $0x478] sm:$0xff]  ;;  %v311_v37 = vld [vmem:[#allocation3 + $0x4b0] sm:$0xff] }
 0x185   :  { %3579 = vmatprep.subr.bf16.mxu0 %v5580_v45  ;;  %3743 = vmatprep.subr.bf16.mxu1 %v5582_v63  ;;  %v5638_v45 = vcombine.high %v252_v12, %v256_v38  ;;  %v259_v63 = vld [vmem:[#allocation3 + $0x310] sm:$0xff]  ;;  %v308_v11 = vld [vmem:[#allocation3 + $0x498] sm:$0xff] }
 0x186   :  { %v5643_v58 = vcombine.low %v259_v63, %v263_v46 }
 0x188   :  { %3580 = vmatpush1.bf16.msra.mxu0 %v5579_v50  ;;  %3744 = vmatpush1.bf16.msra.mxu1 %v5581_v51  ;;  %v5637_v50 = vcombine.low %v252_v12, %v256_v38  ;;  %v5644_v51 = vcombine.high %v259_v63, %v263_v46  ;;  %v312_v12 = vld [vmem:[#allocation3 + $0x4b8] sm:$0xff]  ;;  %v319_v63 = vld [vmem:[#allocation3 + $0x4f0] sm:$0xff] }
 0x189   :  { %3581 = vmatprep.subr.bf16.mxu0 %v5588_v52  ;;  %3745 = vmatprep.subr.bf16.mxu1 %v5590_v53  ;;  %v5646_v52 = vcombine.high %v260_v47, %v264_v48  ;;  %v267_v53 = vld [vmem:[#allocation3 + $0x350] sm:$0xff]  ;;  %v316_v46 = vld [vmem:[#allocation3 + $0x4d8] sm:$0xff] }
 0x18a   :  { %v5651_v4 = vcombine.low %v267_v53, %v271_v57 }
 0x18c   :  { %3582 = vmatpush1.bf16.msra.mxu0 %v5587_v59  ;;  %3746 = vmatpush1.bf16.msra.mxu1 %v5589_v60  ;;  %v5645_v59 = vcombine.low %v260_v47, %v264_v48  ;;  %v5652_v60 = vcombine.high %v267_v53, %v271_v57  ;;  %v320_v47 = vld [vmem:[#allocation3 + $0x4f8] sm:$0xff] }
 0x18d   :  { %3583 = vmatprep.subr.bf16.mxu0 %v5596_v61  ;;  %3747 = vmatprep.subr.bf16.mxu1 %v5598_v62  ;;  %v5654_v61 = vcombine.high %v268_v22, %v272_v24  ;;  %v275_v62 = vld [vmem:[#allocation3 + $0x390] sm:$0xff]  ;;  %v324_v53 = vld [vmem:[#allocation3 + $0x518] sm:$0xff] }
 0x18e   :  { %v5659_v15 = vcombine.low %v275_v62, %v279_v1  ;;  %v328_v57 = vld [vmem:[#allocation3 + $0x538] sm:$0xff] }
 0x190   :  { %3584 = vmatpush1.bf16.msra.mxu0 %v5595_v5  ;;  %3748 = vmatpush1.bf16.msra.mxu1 %v5597_v6  ;;  %v5653_v5 = vcombine.low %v268_v22, %v272_v24  ;;  %v5660_v6 = vcombine.high %v275_v62, %v279_v1  ;;  %v5701_v24 = vcombine.low %v316_v46, %v320_v47  ;;  %v336_v62 = vld [vmem:[#allocation3 + $0x578] sm:$0xff] }
 0x191   :  { %3585 = vmatprep.subr.bf16.mxu0 %v5604_v7  ;;  %3749 = vmatprep.subr.bf16.mxu1 %v5606_v8  ;;  %v5662_v7 = vcombine.high %v276_v2, %v280_v3  ;;  %v283_v8 = vld [vmem:[#allocation3 + $0x3d0] sm:$0xff] }
 0x192   :  { %v5667_v20 = vcombine.low %v283_v8, %v287_v9 }
 0x194   :  { %3586 = vmatpush1.bf16.msra.mxu0 %v5603_v16  ;;  %3750 = vmatpush1.bf16.msra.mxu1 %v5605_v17  ;;  %v5661_v16 = vcombine.low %v276_v2, %v280_v3  ;;  %v5668_v17 = vcombine.high %v283_v8, %v287_v9  ;;  %v5709_v2 = vcombine.low %v324_v53, %v328_v57  ;;  %v344_v8 = vld [vmem:[#allocation3 + $0x5b8] sm:$0xff] }
 0x195   :  { %3587 = vmatprep.subr.bf16.mxu0 %v5612_v40  ;;  %3751 = vmatprep.subr.bf16.mxu1 %v5614_v42  ;;  %v5670_v40 = vcombine.high %v284_v10, %v288_v13  ;;  %v291_v42 = vld [vmem:[#allocation3 + $0x410] sm:$0xff] }
 0x196   :  { %v5675_v31 = vcombine.low %v291_v42, %v295_v54 }
 0x198   :  { %3588 = vmatpush1.bf16.msra.mxu0 %v5611_v21  ;;  %3752 = vmatpush1.bf16.msra.mxu1 %v5613_v23  ;;  %v5669_v21 = vcombine.low %v284_v10, %v288_v13  ;;  %v5676_v23 = vcombine.high %v291_v42, %v295_v54  ;;  %v352_v42 = vld [vmem:[#allocation3 + $0x5f8] sm:$0xff] }
 0x199   :  { %3589 = vmatprep.subr.bf16.mxu0 %v5620_v25  ;;  %3753 = vmatprep.subr.bf16.mxu1 %v5622_v26  ;;  %v5678_v25 = vcombine.high %v292_v55, %v296_v19  ;;  %v299_v26 = vld [vmem:[#allocation3 + $0x450] sm:$0xff] }
 0x19a   :  { %v5683_v38 = vcombine.low %v299_v26, %v303_v27 }
 0x19c   :  { %3590 = vmatpush1.bf16.msra.mxu0 %v5619_v32  ;;  %3754 = vmatpush1.bf16.msra.mxu1 %v5621_v33  ;;  %v5677_v32 = vcombine.low %v292_v55, %v296_v19  ;;  %v5684_v33 = vcombine.high %v299_v26, %v303_v27  ;;  %v360_v26 = vld [vmem:[#allocation3 + $0x638] sm:$0xff] }
 0x19d   :  { %3591 = vmatprep.subr.bf16.mxu0 %v5628_v34  ;;  %3755 = vmatprep.subr.bf16.mxu1 %v5630_v35  ;;  %v5686_v34 = vcombine.high %v300_v29, %v304_v30  ;;  %v307_v35 = vld [vmem:[#allocation3 + $0x490] sm:$0xff] }
 0x19e   :  { %v5691_v48 = vcombine.low %v307_v35, %v311_v37 }
 0x1a0   :  { %3592 = vmatpush1.bf16.msra.mxu0 %v5627_v39  ;;  %3756 = vmatpush1.bf16.msra.mxu1 %v5629_v41  ;;  %v5685_v39 = vcombine.low %v300_v29, %v304_v30  ;;  %v5692_v41 = vcombine.high %v307_v35, %v311_v37  ;;  %v368_v35 = vld [vmem:[#allocation3 + $0x678] sm:$0xff] }
 0x1a1   :  { %3593 = vmatprep.subr.bf16.mxu0 %v5636_v44  ;;  %3757 = vmatprep.subr.bf16.mxu1 %v5638_v45  ;;  %v5694_v44 = vcombine.high %v308_v11, %v312_v12  ;;  %v315_v45 = vld [vmem:[#allocation3 + $0x4d0] sm:$0xff] }
 0x1a2   :  { %v5699_v22 = vcombine.low %v315_v45, %v319_v63 }
 0x1a4   :  { %3594 = vmatpush1.bf16.msra.mxu0 %v5635_v49  ;;  %3758 = vmatpush1.bf16.msra.mxu1 %v5637_v50  ;;  %v5700_v49 = vcombine.high %v315_v45, %v319_v63  ;;  %v5702_v50 = vcombine.high %v316_v46, %v320_v47  ;;  %v376_v45 = vld [vmem:[#allocation3 + $0x6b8] sm:$0xff] }
 0x1a5   :  { %3595 = vmatprep.subr.bf16.mxu0 %v5644_v51  ;;  %3759 = vmatprep.subr.bf16.mxu1 %v5646_v52  ;;  %v323_v51 = vld [vmem:[#allocation3 + $0x510] sm:$0xff] }
 0x1a6   :  { %v327_v52 = vld [vmem:[#allocation3 + $0x530] sm:$0xff] }
 0x1a7   :  { %v5707_v1 = vcombine.low %v323_v51, %v327_v52 }
 0x1a8   :  { %3596 = vmatpush1.bf16.msra.mxu0 %v5643_v58  ;;  %3760 = vmatpush1.bf16.msra.mxu1 %v5645_v59  ;;  %v5708_v58 = vcombine.high %v323_v51, %v327_v52  ;;  %v331_v59 = vld [vmem:[#allocation3 + $0x550] sm:$0xff]  ;;  %v384_v51 = vld [vmem:[#allocation3 + $0x6f8] sm:$0xff] }
 0x1a9   :  { %3597 = vmatprep.subr.bf16.mxu0 %v5652_v60  ;;  %3761 = vmatprep.subr.bf16.mxu1 %v5654_v61  ;;  %v335_v60 = vld [vmem:[#allocation3 + $0x570] sm:$0xff]  ;;  %v332_v61 = vld [vmem:[#allocation3 + $0x558] sm:$0xff] }
 0x1aa   :  { %v5716_v3 = vcombine.high %v331_v59, %v335_v60  ;;  %v5715_v9 = vcombine.low %v331_v59, %v335_v60  ;;  %v5717_v10 = vcombine.low %v332_v61, %v336_v62  ;;  %v392_v59 = vld [vmem:[#allocation3 + $0x738] sm:$0xff] }
 0x1ac   :  { %3598 = vmatpush1.bf16.msra.mxu0 %v5651_v4  ;;  %3762 = vmatpush1.bf16.msra.mxu1 %v5653_v5  ;;  %v5718_v4 = vcombine.high %v332_v61, %v336_v62  ;;  %v339_v5 = vld [vmem:[#allocation3 + $0x590] sm:$0xff] }
 0x1ad   :  { %3599 = vmatprep.subr.bf16.mxu0 %v5660_v6  ;;  %3763 = vmatprep.subr.bf16.mxu1 %v5662_v7  ;;  %v343_v6 = vld [vmem:[#allocation3 + $0x5b0] sm:$0xff]  ;;  %v340_v7 = vld [vmem:[#allocation3 + $0x598] sm:$0xff] }
 0x1ae   :  { %v5724_v13 = vcombine.high %v339_v5, %v343_v6  ;;  %v5723_v54 = vcombine.low %v339_v5, %v343_v6  ;;  %v5725_v55 = vcombine.low %v340_v7, %v344_v8  ;;  %v400_v5 = vld [vmem:[#allocation3 + $0x778] sm:$0xff] }
 0x1b0   :  { %3600 = vmatpush1.bf16.msra.mxu0 %v5659_v15  ;;  %3764 = vmatpush1.bf16.msra.mxu1 %v5661_v16  ;;  %v5726_v15 = vcombine.high %v340_v7, %v344_v8  ;;  %v347_v16 = vld [vmem:[#allocation3 + $0x5d0] sm:$0xff] }
 0x1b1   :  { %3601 = vmatprep.subr.bf16.mxu0 %v5668_v17  ;;  %3765 = vmatprep.subr.bf16.mxu1 %v5670_v40  ;;  %v351_v17 = vld [vmem:[#allocation3 + $0x5f0] sm:$0xff]  ;;  %v348_v40 = vld [vmem:[#allocation3 + $0x5d8] sm:$0xff] }
 0x1b2   :  { %v5732_v19 = vcombine.high %v347_v16, %v351_v17  ;;  %v5731_v27 = vcombine.low %v347_v16, %v351_v17  ;;  %v5733_v29 = vcombine.low %v348_v40, %v352_v42  ;;  %v408_v16 = vld [vmem:[#allocation3 + $0x7b8] sm:$0xff] }
 0x1b4   :  { %3602 = vmatpush1.bf16.msra.mxu0 %v5667_v20  ;;  %3766 = vmatpush1.bf16.msra.mxu1 %v5669_v21  ;;  %v5734_v20 = vcombine.high %v348_v40, %v352_v42  ;;  %v355_v21 = vld [vmem:[#allocation3 + $0x610] sm:$0xff] }
 0x1b5   :  { %3612 = vmatprep.subr.bf16.mxu0 %v5676_v23  ;;  %3776 = vmatprep.subr.bf16.mxu1 %v5678_v25  ;;  %v359_v23 = vld [vmem:[#allocation3 + $0x630] sm:$0xff]  ;;  %v356_v25 = vld [vmem:[#allocation3 + $0x618] sm:$0xff] }
 0x1b6   :  { %v5740_v30 = vcombine.high %v355_v21, %v359_v23  ;;  %v5739_v37 = vcombine.low %v355_v21, %v359_v23  ;;  %v416_v21 = vld [vmem:[#allocation3 + $0x7f8] sm:$0xff] }
 0x1b7   :  { %3604 = vmatmul.mubr.bf16.vlgmr.msra.gmra.mrb[4].mxu0 %v6924_v18  ;;  %3768 = vmatmul.mubr.bf16.vlgmr.msra.gmra.mrb[4].mxu1 %v6924_v18  ;;  %v5693_v18 = vcombine.low %v308_v11, %v312_v12  ;;  %v5741_v11 = vcombine.low %v356_v25, %v360_v26 }
 0x1b8   :  { %3613 = vmatpush1.bf16.msra.mxu0 %v5675_v31  ;;  %3777 = vmatpush1.bf16.msra.mxu1 %v5677_v32  ;;  %v5742_v31 = vcombine.high %v356_v25, %v360_v26  ;;  %v363_v32 = vld [vmem:[#allocation3 + $0x650] sm:$0xff] }
 0x1b9   :  { %3614 = vmatprep.subr.bf16.mxu0 %v5684_v33  ;;  %3778 = vmatprep.subr.bf16.mxu1 %v5686_v34  ;;  %v367_v33 = vld [vmem:[#allocation3 + $0x670] sm:$0xff]  ;;  %v364_v34 = vld [vmem:[#allocation3 + $0x658] sm:$0xff] }
 0x1ba   :  { %3644 = vmatprep.mubr.bf16.mxu0 %v6926_v28  ;;  %3808 = vmatprep.mubr.bf16.mxu1 %v6926_v28  ;;  %v5710_v28 = vcombine.high %v324_v53, %v328_v57  ;;  %v5748_v12 = vcombine.high %v363_v32, %v367_v33  ;;  %v5747_v63 = vcombine.low %v363_v32, %v367_v33  ;;  %v424_v32 = vld [vmem:[#allocation3 + $0x838] sm:$0xff] }
 0x1bb   :  { %v5749_v46 = vcombine.low %v364_v34, %v368_v35 }
 0x1bc   :  { %3615 = vmatpush1.bf16.msra.mxu0 %v5683_v38  ;;  %3779 = vmatpush1.bf16.msra.mxu1 %v5685_v39  ;;  %v5750_v38 = vcombine.high %v364_v34, %v368_v35  ;;  %v371_v39 = vld [vmem:[#allocation3 + $0x690] sm:$0xff] }
 0x1bd   :  { %3616 = vmatprep.subr.bf16.mxu0 %v5692_v41  ;;  %3780 = vmatprep.subr.bf16.mxu1 %v5694_v44  ;;  %v375_v41 = vld [vmem:[#allocation3 + $0x6b0] sm:$0xff]  ;;  %v372_v44 = vld [vmem:[#allocation3 + $0x698] sm:$0xff] }
 0x1be   :  { %v5756_v47 = vcombine.high %v371_v39, %v375_v41  ;;  %v5755_v52 = vcombine.low %v371_v39, %v375_v41  ;;  %v5757_v53 = vcombine.low %v372_v44, %v376_v45  ;;  %v432_v39 = vld [vmem:[#allocation3 + $0x878] sm:$0xff] }
 0x1c0   :  { %3617 = vmatpush1.bf16.msra.mxu0 %v5691_v48  ;;  %3781 = vmatpush1.bf16.msra.mxu1 %v5693_v18  ;;  %v5758_v48 = vcombine.high %v372_v44, %v376_v45  ;;  %v379_v18 = vld [vmem:[#allocation3 + $0x6d0] sm:$0xff] }
 0x1c1   :  { %3618 = vmatprep.subr.bf16.mxu0 %v5700_v49  ;;  %3782 = vmatprep.subr.bf16.mxu1 %v5702_v50  ;;  %v383_v49 = vld [vmem:[#allocation3 + $0x6f0] sm:$0xff]  ;;  %v380_v50 = vld [vmem:[#allocation3 + $0x6d8] sm:$0xff] }
 0x1c2   :  { %v5764_v57 = vcombine.high %v379_v18, %v383_v49  ;;  %v5763_v60 = vcombine.low %v379_v18, %v383_v49  ;;  %v5765_v61 = vcombine.low %v380_v50, %v384_v51  ;;  %v440_v18 = vld [vmem:[#allocation3 + $0x8b8] sm:$0xff] }
 0x1c4   :  { %3619 = vmatpush1.bf16.msra.mxu0 %v5699_v22  ;;  %3783 = vmatpush1.bf16.msra.mxu1 %v5701_v24  ;;  %v5766_v22 = vcombine.high %v380_v50, %v384_v51  ;;  %v387_v24 = vld [vmem:[#allocation3 + $0x710] sm:$0xff] }
 0x1c5   :  { %3620 = vmatprep.subr.bf16.mxu0 %v5708_v58  ;;  %3784 = vmatprep.subr.bf16.mxu1 %v5710_v28  ;;  %v391_v58 = vld [vmem:[#allocation3 + $0x730] sm:$0xff]  ;;  %v388_v28 = vld [vmem:[#allocation3 + $0x718] sm:$0xff] }
 0x1c6   :  { %v5772_v62 = vcombine.high %v387_v24, %v391_v58  ;;  %v5771_v6 = vcombine.low %v387_v24, %v391_v58  ;;  %v5773_v7 = vcombine.low %v388_v28, %v392_v59  ;;  %v448_v24 = vld [vmem:[#allocation3 + $0x8f8] sm:$0xff] }
 0x1c8   :  { %3621 = vmatpush1.bf16.msra.mxu0 %v5707_v1  ;;  %3785 = vmatpush1.bf16.msra.mxu1 %v5709_v2  ;;  %v5774_v1 = vcombine.high %v388_v28, %v392_v59  ;;  %v395_v2 = vld [vmem:[#allocation3 + $0x750] sm:$0xff] }
 0x1c9   :  { %3622 = vmatprep.subr.bf16.mxu0 %v5716_v3  ;;  %3786 = vmatprep.subr.bf16.mxu1 %v5718_v4  ;;  %v399_v3 = vld [vmem:[#allocation3 + $0x770] sm:$0xff]  ;;  %v396_v4 = vld [vmem:[#allocation3 + $0x758] sm:$0xff] }
 0x1ca   :  { %v5780_v8 = vcombine.high %v395_v2, %v399_v3  ;;  %v5779_v17 = vcombine.low %v395_v2, %v399_v3  ;;  %v5781_v40 = vcombine.low %v396_v4, %v400_v5 }
 0x1cc   :  { %3623 = vmatpush1.bf16.msra.mxu0 %v5715_v9  ;;  %3787 = vmatpush1.bf16.msra.mxu1 %v5717_v10  ;;  %v5782_v9 = vcombine.high %v396_v4, %v400_v5  ;;  %v403_v10 = vld [vmem:[#allocation3 + $0x790] sm:$0xff] }
 0x1cd   :  { %3624 = vmatprep.subr.bf16.mxu0 %v5724_v13  ;;  %3788 = vmatprep.subr.bf16.mxu1 %v5726_v15  ;;  %v407_v13 = vld [vmem:[#allocation3 + $0x7b0] sm:$0xff]  ;;  %v404_v15 = vld [vmem:[#allocation3 + $0x798] sm:$0xff] }
 0x1ce   :  { %v5788_v42 = vcombine.high %v403_v10, %v407_v13  ;;  %v5787_v23 = vcombine.low %v403_v10, %v407_v13  ;;  %v5789_v25 = vcombine.low %v404_v15, %v408_v16  ;;  %v459_v5 = vld [vmem:[#allocation3 + $0x950] sm:$0xff] }
 0x1d0   :  { %3625 = vmatpush1.bf16.msra.mxu0 %v5723_v54  ;;  %3789 = vmatpush1.bf16.msra.mxu1 %v5725_v55  ;;  %v5790_v54 = vcombine.high %v404_v15, %v408_v16  ;;  %v411_v55 = vld [vmem:[#allocation3 + $0x7d0] sm:$0xff] }
 0x1d1   :  { %3626 = vmatprep.subr.bf16.mxu0 %v5732_v19  ;;  %3790 = vmatprep.subr.bf16.mxu1 %v5734_v20  ;;  %v415_v19 = vld [vmem:[#allocation3 + $0x7f0] sm:$0xff]  ;;  %v412_v20 = vld [vmem:[#allocation3 + $0x7d8] sm:$0xff] }
 0x1d2   :  { %v5796_v26 = vcombine.high %v411_v55, %v415_v19  ;;  %v5795_v33 = vcombine.low %v411_v55, %v415_v19  ;;  %v5797_v34 = vcombine.low %v412_v20, %v416_v21  ;;  %v467_v16 = vld [vmem:[#allocation3 + $0x990] sm:$0xff] }
 0x1d4   :  { %3627 = vmatpush1.bf16.msra.mxu0 %v5731_v27  ;;  %3791 = vmatpush1.bf16.msra.mxu1 %v5733_v29  ;;  %v5798_v27 = vcombine.high %v412_v20, %v416_v21  ;;  %v419_v29 = vld [vmem:[#allocation3 + $0x810] sm:$0xff] }
 0x1d5   :  { %3628 = vmatprep.subr.bf16.mxu0 %v5740_v30  ;;  %3792 = vmatprep.subr.bf16.mxu1 %v5742_v31  ;;  %v423_v30 = vld [vmem:[#allocation3 + $0x830] sm:$0xff]  ;;  %v420_v31 = vld [vmem:[#allocation3 + $0x818] sm:$0xff] }
 0x1d6   :  { %v5804_v35 = vcombine.high %v419_v29, %v423_v30  ;;  %v5803_v41 = vcombine.low %v419_v29, %v423_v30  ;;  %v5805_v44 = vcombine.low %v420_v31, %v424_v32  ;;  %v475_v21 = vld [vmem:[#allocation3 + $0x9d0] sm:$0xff] }
 0x1d8   :  { %3629 = vmatpush1.bf16.msra.mxu0 %v5739_v37  ;;  %3793 = vmatpush1.bf16.msra.mxu1 %v5741_v11  ;;  %v5806_v37 = vcombine.high %v420_v31, %v424_v32  ;;  %v427_v11 = vld [vmem:[#allocation3 + $0x850] sm:$0xff] }
 0x1d9   :  { %3630 = vmatprep.subr.bf16.mxu0 %v5748_v12  ;;  %3794 = vmatprep.subr.bf16.mxu1 %v5750_v38  ;;  %v431_v12 = vld [vmem:[#allocation3 + $0x870] sm:$0xff]  ;;  %v428_v38 = vld [vmem:[#allocation3 + $0x858] sm:$0xff] }
 0x1da   :  { %v5812_v45 = vcombine.high %v427_v11, %v431_v12  ;;  %v5811_v49 = vcombine.low %v427_v11, %v431_v12  ;;  %v5813_v50 = vcombine.low %v428_v38, %v432_v39  ;;  %v483_v32 = vld [vmem:[#allocation3 + $0xa10] sm:$0xff] }
 0x1dc   :  { %3631 = vmatpush1.bf16.msra.mxu0 %v5747_v63  ;;  %3795 = vmatpush1.bf16.msra.mxu1 %v5749_v46  ;;  %v5814_v63 = vcombine.high %v428_v38, %v432_v39  ;;  %v435_v46 = vld [vmem:[#allocation3 + $0x890] sm:$0xff] }
 0x1dd   :  { %3632 = vmatprep.subr.bf16.mxu0 %v5756_v47  ;;  %3796 = vmatprep.subr.bf16.mxu1 %v5758_v48  ;;  %v439_v47 = vld [vmem:[#allocation3 + $0x8b0] sm:$0xff]  ;;  %v436_v48 = vld [vmem:[#allocation3 + $0x898] sm:$0xff] }
 0x1de   :  { %v5820_v51 = vcombine.high %v435_v46, %v439_v47  ;;  %v5819_v58 = vcombine.low %v435_v46, %v439_v47  ;;  %v491_v39 = vld [vmem:[#allocation3 + $0xa50] sm:$0xff] }
 0x1e0   :  { %3633 = vmatpush1.bf16.msra.mxu0 %v5755_v52  ;;  %3797 = vmatpush1.bf16.msra.mxu1 %v5757_v53  ;;  %v5822_v52 = vcombine.high %v436_v48, %v440_v18  ;;  %v443_v53 = vld [vmem:[#allocation3 + $0x8d0] sm:$0xff] }
 0x1e1   :  { %3634 = vmatprep.subr.bf16.mxu0 %v5764_v57  ;;  %3798 = vmatprep.subr.bf16.mxu1 %v5766_v22  ;;  %v447_v57 = vld [vmem:[#allocation3 + $0x8f0] sm:$0xff]  ;;  %v444_v22 = vld [vmem:[#allocation3 + $0x8d8] sm:$0xff] }
 0x1e2   :  { %v5828_v28 = vcombine.high %v443_v53, %v447_v57  ;;  %v5830_v59 = vcombine.high %v444_v22, %v448_v24  ;;  %v5827_v2 = vcombine.low %v443_v53, %v447_v57  ;;  %v5829_v3 = vcombine.low %v444_v22, %v448_v24  ;;  %v507_v24 = vld [vmem:[#allocation3 + $0xad0] sm:$0xff] }
 0x1e4   :  { %3635 = vmatpush1.bf16.msra.mxu0 %v5763_v60  ;;  %3799 = vmatpush1.bf16.msra.mxu1 %v5765_v61  ;;  %v451_v60 = vld [vmem:[#allocation3 + $0x910] sm:$0xff] }
 0x1e5   :  { %3636 = vmatprep.subr.bf16.mxu0 %v5772_v62  ;;  %3800 = vmatprep.subr.bf16.mxu1 %v5774_v1  ;;  %v455_v61 = vld [vmem:[#allocation3 + $0x930] sm:$0xff]  ;;  %v452_v62 = vld [vmem:[#allocation3 + $0x918] sm:$0xff] }
 0x1e6   :  { %v456_v1 = vld [vmem:[#allocation3 + $0x938] sm:$0xff]  ;;  %v5836_v4 = vcombine.high %v451_v60, %v455_v61 }
 0x1e7   :  { %v5837_v10 = vcombine.low %v452_v62, %v456_v1 }
 0x1e8   :  { %3637 = vmatpush1.bf16.msra.mxu0 %v5771_v6  ;;  %3801 = vmatpush1.bf16.msra.mxu1 %v5773_v7  ;;  %v463_v6 = vld [vmem:[#allocation3 + $0x970] sm:$0xff]  ;;  %v460_v7 = vld [vmem:[#allocation3 + $0x958] sm:$0xff] }
 0x1e9   :  { %3638 = vmatprep.subr.bf16.mxu0 %v5780_v8  ;;  %3802 = vmatprep.subr.bf16.mxu1 %v5782_v9  ;;  %v464_v8 = vld [vmem:[#allocation3 + $0x978] sm:$0xff]  ;;  %v5835_v9 = vcombine.low %v451_v60, %v455_v61  ;;  %v5844_v13 = vcombine.high %v459_v5, %v463_v6 }
 0x1ea   :  { %v5846_v15 = vcombine.high %v460_v7, %v464_v8  ;;  %v5845_v55 = vcombine.low %v460_v7, %v464_v8  ;;  %v523_v8 = vld [vmem:[#allocation3 + $0xb50] sm:$0xff] }
 0x1ec   :  { %3639 = vmatpush1.bf16.msra.mxu0 %v5779_v17  ;;  %3803 = vmatpush1.bf16.msra.mxu1 %v5781_v40  ;;  %v471_v17 = vld [vmem:[#allocation3 + $0x9b0] sm:$0xff]  ;;  %v468_v40 = vld [vmem:[#allocation3 + $0x998] sm:$0xff] }
 0x1ed   :  { %3640 = vmatprep.subr.bf16.mxu0 %v5788_v42  ;;  %3804 = vmatprep.subr.bf16.mxu1 %v5790_v54  ;;  %v472_v42 = vld [vmem:[#allocation3 + $0x9b8] sm:$0xff]  ;;  %v5843_v54 = vcombine.low %v459_v5, %v463_v6  ;;  %v5852_v19 = vcombine.high %v467_v16, %v471_v17 }
 0x1ee   :  { %v5854_v20 = vcombine.high %v468_v40, %v472_v42  ;;  %v5853_v29 = vcombine.low %v468_v40, %v472_v42  ;;  %v531_v42 = vld [vmem:[#allocation3 + $0xb90] sm:$0xff] }
 0x1f0   :  { %3641 = vmatpush1.bf16.msra.mxu0 %v5787_v23  ;;  %3805 = vmatpush1.bf16.msra.mxu1 %v5789_v25  ;;  %v479_v23 = vld [vmem:[#allocation3 + $0x9f0] sm:$0xff]  ;;  %v476_v25 = vld [vmem:[#allocation3 + $0x9d8] sm:$0xff] }
 0x1f1   :  { %3642 = vmatprep.subr.bf16.mxu0 %v5796_v26  ;;  %3806 = vmatprep.subr.bf16.mxu1 %v5798_v27  ;;  %v480_v26 = vld [vmem:[#allocation3 + $0x9f8] sm:$0xff]  ;;  %v5851_v27 = vcombine.low %v467_v16, %v471_v17  ;;  %v5860_v30 = vcombine.high %v475_v21, %v479_v23 }
 0x1f2   :  { %v5862_v31 = vcombine.high %v476_v25, %v480_v26  ;;  %v5861_v11 = vcombine.low %v476_v25, %v480_v26  ;;  %v5392_v25 = vld [vmem:[%s7477_s2] sm:$0xff] }
 0x1f4   :  { %3643 = vmatpush1.bf16.msra.mxu0 %v5795_v33  ;;  %3807 = vmatpush1.bf16.msra.mxu1 %v5797_v34  ;;  %v487_v33 = vld [vmem:[#allocation3 + $0xa30] sm:$0xff]  ;;  %v484_v34 = vld [vmem:[#allocation3 + $0xa18] sm:$0xff] }
 0x1f5   :  { %3653 = vmatprep.subr.bf16.mxu0 %v5804_v35  ;;  %3817 = vmatprep.subr.bf16.mxu1 %v5806_v37  ;;  %v488_v35 = vld [vmem:[#allocation3 + $0xa38] sm:$0xff]  ;;  %v5859_v37 = vcombine.low %v475_v21, %v479_v23  ;;  %v5868_v12 = vcombine.high %v483_v32, %v487_v33 }
 0x1f6   :  { %v5870_v38 = vcombine.high %v484_v34, %v488_v35  ;;  %v5869_v46 = vcombine.low %v484_v34, %v488_v35 }
 0x1f7   :  { %3645 = vmatmul.mubr.bf16.vlgmr.msra.gmra.mrb[4].mxu0 %v6946_v36  ;;  %3809 = vmatmul.mubr.bf16.vlgmr.msra.gmra.mrb[4].mxu1 %v6946_v36  ;;  %v5821_v36 = vcombine.low %v436_v48, %v440_v18  ;;  %v499_v18 = vld [vmem:[#allocation3 + $0xa90] sm:$0xff] }
 0x1f8   :  { %3654 = vmatpush1.bf16.msra.mxu0 %v5803_v41  ;;  %3818 = vmatpush1.bf16.msra.mxu1 %v5805_v44  ;;  %v495_v41 = vld [vmem:[#allocation3 + $0xa70] sm:$0xff]  ;;  %v492_v44 = vld [vmem:[#allocation3 + $0xa58] sm:$0xff] }
 0x1f9   :  { %3655 = vmatprep.subr.bf16.mxu0 %v5812_v45  ;;  %3819 = vmatprep.subr.bf16.mxu1 %v5814_v63  ;;  %v496_v45 = vld [vmem:[#allocation3 + $0xa78] sm:$0xff]  ;;  %v5867_v63 = vcombine.low %v483_v32, %v487_v33  ;;  %v5876_v47 = vcombine.high %v491_v39, %v495_v41 }
 0x1fa   :  { %3685 = vmatprep.mubr.bf16.mxu0 %v6948_v43  ;;  %3849 = vmatprep.mubr.bf16.mxu1 %v6948_v43  ;;  %v5838_v43 = vcombine.high %v452_v62, %v456_v1  ;;  %v5878_v48 = vcombine.high %v492_v44, %v496_v45  ;;  %v5877_v53 = vcombine.low %v492_v44, %v496_v45  ;;  %v515_v1 = vld [vmem:[#allocation3 + $0xb10] sm:$0xff]  ;;  %v544_v32 = vld [vmem:[#allocation3 + $0xbf8] sm:$0xff] }
 0x1fc   :  { %3656 = vmatpush1.bf16.msra.mxu0 %v5811_v49  ;;  %3820 = vmatpush1.bf16.msra.mxu1 %v5813_v50  ;;  %v503_v49 = vld [vmem:[#allocation3 + $0xab0] sm:$0xff]  ;;  %v500_v50 = vld [vmem:[#allocation3 + $0xa98] sm:$0xff] }
 0x1fd   :  { %3657 = vmatprep.subr.bf16.mxu0 %v5820_v51  ;;  %3821 = vmatprep.subr.bf16.mxu1 %v5822_v52  ;;  %v504_v51 = vld [vmem:[#allocation3 + $0xab8] sm:$0xff]  ;;  %v5875_v52 = vcombine.low %v491_v39, %v495_v41  ;;  %v5884_v57 = vcombine.high %v499_v18, %v503_v49 }
 0x1fe   :  { %v5886_v22 = vcombine.high %v500_v50, %v504_v51  ;;  %v5885_v60 = vcombine.low %v500_v50, %v504_v51  ;;  %v548_v39 = vld [vmem:[#allocation3 + $0xc18] sm:$0xff] }
 0x1ff   :  { %v552_v41 = vld [vmem:[#allocation3 + $0xc38] sm:$0xff] }
 0x200   :  { %3658 = vmatpush1.bf16.msra.mxu0 %v5819_v58  ;;  %3822 = vmatpush1.bf16.msra.mxu1 %v5821_v36  ;;  %v511_v58 = vld [vmem:[#allocation3 + $0xaf0] sm:$0xff]  ;;  %v508_v36 = vld [vmem:[#allocation3 + $0xad8] sm:$0xff]  ;;  %v5933_v51 = vcombine.low %v548_v39, %v552_v41 }
 0x201   :  { %3659 = vmatprep.subr.bf16.mxu0 %v5828_v28  ;;  %3823 = vmatprep.subr.bf16.mxu1 %v5830_v59  ;;  %v512_v28 = vld [vmem:[#allocation3 + $0xaf8] sm:$0xff]  ;;  %v5883_v59 = vcombine.low %v499_v18, %v503_v49  ;;  %v5892_v61 = vcombine.high %v507_v24, %v511_v58 }
 0x202   :  { %v5894_v62 = vcombine.high %v508_v36, %v512_v28  ;;  %v5893_v5 = vcombine.low %v508_v36, %v512_v28  ;;  %v556_v18 = vld [vmem:[#allocation3 + $0xc58] sm:$0xff] }
 0x203   :  { %v560_v49 = vld [vmem:[#allocation3 + $0xc78] sm:$0xff] }
 0x204   :  { %3660 = vmatpush1.bf16.msra.mxu0 %v5827_v2  ;;  %3824 = vmatpush1.bf16.msra.mxu1 %v5829_v3  ;;  %v519_v2 = vld [vmem:[#allocation3 + $0xb30] sm:$0xff]  ;;  %v516_v3 = vld [vmem:[#allocation3 + $0xb18] sm:$0xff]  ;;  %v5941_v28 = vcombine.low %v556_v18, %v560_v49 }
 0x205   :  { %3661 = vmatprep.subr.bf16.mxu0 %v5836_v4  ;;  %3825 = vmatprep.subr.bf16.mxu1 %v5838_v43  ;;  %v520_v4 = vld [vmem:[#allocation3 + $0xb38] sm:$0xff]  ;;  %v5891_v43 = vcombine.low %v507_v24, %v511_v58  ;;  %v5900_v6 = vcombine.high %v515_v1, %v519_v2 }
 0x206   :  { %v5902_v7 = vcombine.high %v516_v3, %v520_v4  ;;  %v5901_v16 = vcombine.low %v516_v3, %v520_v4  ;;  %v564_v24 = vld [vmem:[#allocation3 + $0xc98] sm:$0xff] }
 0x207   :  { %v568_v58 = vld [vmem:[#allocation3 + $0xcb8] sm:$0xff] }
 0x208   :  { %3662 = vmatpush1.bf16.msra.mxu0 %v5835_v9  ;;  %3826 = vmatpush1.bf16.msra.mxu1 %v5837_v10  ;;  %v527_v9 = vld [vmem:[#allocation3 + $0xb70] sm:$0xff]  ;;  %v524_v10 = vld [vmem:[#allocation3 + $0xb58] sm:$0xff] }
 0x209   :  { %3663 = vmatprep.subr.bf16.mxu0 %v5844_v13  ;;  %3827 = vmatprep.subr.bf16.mxu1 %v5846_v15  ;;  %v528_v13 = vld [vmem:[#allocation3 + $0xb78] sm:$0xff]  ;;  %v5899_v15 = vcombine.low %v515_v1, %v519_v2  ;;  %v5908_v17 = vcombine.high %v523_v8, %v527_v9 }
 0x20a   :  { %v5910_v40 = vcombine.high %v524_v10, %v528_v13  ;;  %v5909_v21 = vcombine.low %v524_v10, %v528_v13  ;;  %v572_v1 = vld [vmem:[#allocation3 + $0xcd8] sm:$0xff] }
 0x20b   :  { %v576_v2 = vld [vmem:[#allocation3 + $0xcf8] sm:$0xff] }
 0x20c   :  { %3664 = vmatpush1.bf16.msra.mxu0 %v5843_v54  ;;  %3828 = vmatpush1.bf16.msra.mxu1 %v5845_v55  ;;  %v535_v54 = vld [vmem:[#allocation3 + $0xbb0] sm:$0xff]  ;;  %v532_v55 = vld [vmem:[#allocation3 + $0xb98] sm:$0xff]  ;;  %v5957_v10 = vcombine.low %v572_v1, %v576_v2 }
 0x20d   :  { %3665 = vmatprep.subr.bf16.mxu0 %v5852_v19  ;;  %3829 = vmatprep.subr.bf16.mxu1 %v5854_v20  ;;  %v536_v19 = vld [vmem:[#allocation3 + $0xbb8] sm:$0xff]  ;;  %v5907_v20 = vcombine.low %v523_v8, %v527_v9  ;;  %v5916_v23 = vcombine.high %v531_v42, %v535_v54  ;;  %v5915_v33 = vcombine.low %v531_v42, %v535_v54 }
 0x20e   :  { %v5918_v26 = vcombine.high %v532_v55, %v536_v19  ;;  %v5917_v35 = vcombine.low %v532_v55, %v536_v19  ;;  %v584_v8 = vld [vmem:[#allocation3 + $0xd38] sm:$0xff] }
 0x210   :  { %3666 = vmatpush1.bf16.msra.mxu0 %v5851_v27  ;;  %3830 = vmatpush1.bf16.msra.mxu1 %v5853_v29  ;;  %v539_v27 = vld [vmem:[#allocation3 + $0xbd0] sm:$0xff] }
 0x211   :  { %3667 = vmatprep.subr.bf16.mxu0 %v5860_v30  ;;  %3831 = vmatprep.subr.bf16.mxu1 %v5862_v31  ;;  %v543_v29 = vld [vmem:[#allocation3 + $0xbf0] sm:$0xff]  ;;  %v5393_v30 = vmul.f32 0.015625, %v5392_v25  ;;  %v540_v31 = vld [vmem:[#allocation3 + $0xbd8] sm:$0xff] }
 0x212   :  { %v5923_v44 = vcombine.low %v539_v27, %v543_v29  ;;  %v5925_v45 = vcombine.low %v540_v31, %v544_v32  ;;  %v600_v25 = vld [vmem:[#allocation3 + $0xdb8] sm:$0xff] }
 0x213   :  { %v6186_v34 = vadd.f32 -0.5, %v5393_v30 }
 0x214   :  { %3668 = vmatpush1.bf16.msra.mxu0 %v5859_v37  ;;  %3832 = vmatpush1.bf16.msra.mxu1 %v5861_v11  ;;  %v5924_v37 = vcombine.high %v539_v27, %v543_v29  ;;  %v5926_v11 = vcombine.high %v540_v31, %v544_v32  ;;  %v603_v32 = vld [vmem:[#allocation3 + $0xdd0] sm:$0xff] }
 0x215   :  { %3669 = vmatprep.subr.bf16.mxu0 %v5868_v12  ;;  %3833 = vmatprep.subr.bf16.mxu1 %v5870_v38  ;;  %v547_v12 = vld [vmem:[#allocation3 + $0xc10] sm:$0xff] }
 0x216   :  { %v551_v38 = vld [vmem:[#allocation3 + $0xc30] sm:$0xff]  ;;  %5401 = vperm.xlu0 %6466, %v6186_v34  }
 0x217   :  { %v5931_v50 = vcombine.low %v547_v12, %v551_v38 }
 0x218   :  { %3670 = vmatpush1.bf16.msra.mxu0 %v5867_v63  ;;  %3834 = vmatpush1.bf16.msra.mxu1 %v5869_v46  ;;  %v5932_v63 = vcombine.high %v547_v12, %v551_v38  ;;  %v5934_v46 = vcombine.high %v548_v39, %v552_v41 }
 0x219   :  { %3671 = vmatprep.subr.bf16.mxu0 %v5876_v47  ;;  %3835 = vmatprep.subr.bf16.mxu1 %v5878_v48  ;;  %v555_v47 = vld [vmem:[#allocation3 + $0xc50] sm:$0xff] }
 0x21a   :  { %v559_v48 = vld [vmem:[#allocation3 + $0xc70] sm:$0xff] }
 0x21b   :  { %v5939_v36 = vcombine.low %v555_v47, %v559_v48 }
 0x21c   :  { %3672 = vmatpush1.bf16.msra.mxu0 %v5875_v52  ;;  %3836 = vmatpush1.bf16.msra.mxu1 %v5877_v53  ;;  %v5940_v52 = vcombine.high %v555_v47, %v559_v48  ;;  %v5942_v53 = vcombine.high %v556_v18, %v560_v49  ;;  %v611_v48 = vld [vmem:[#allocation3 + $0xe10] sm:$0xff]  ;;  %v612_v49 = vld [vmem:[#allocation3 + $0xe18] sm:$0xff] }
 0x21d   :  { %3673 = vmatprep.subr.bf16.mxu0 %v5884_v57  ;;  %3837 = vmatprep.subr.bf16.mxu1 %v5886_v22  ;;  %v563_v57 = vld [vmem:[#allocation3 + $0xc90] sm:$0xff] }
 0x21e   :  { %v567_v22 = vld [vmem:[#allocation3 + $0xcb0] sm:$0xff] }
 0x21f   :  { %v5947_v3 = vcombine.low %v563_v57, %v567_v22  ;;  %v615_v18 = vld [vmem:[#allocation3 + $0xe30] sm:$0xff] }
 0x220   :  { %3674 = vmatpush1.bf16.msra.mxu0 %v5883_v59  ;;  %3838 = vmatpush1.bf16.msra.mxu1 %v5885_v60  ;;  %v5948_v59 = vcombine.high %v563_v57, %v567_v22  ;;  %v5950_v60 = vcombine.high %v564_v24, %v568_v58  ;;  %v619_v22 = vld [vmem:[#allocation3 + $0xe50] sm:$0xff] }
 0x221   :  { %3675 = vmatprep.subr.bf16.mxu0 %v5892_v61  ;;  %3839 = vmatprep.subr.bf16.mxu1 %v5894_v62  ;;  %v571_v61 = vld [vmem:[#allocation3 + $0xcd0] sm:$0xff] }
 0x222   :  { %v575_v62 = vld [vmem:[#allocation3 + $0xcf0] sm:$0xff] }
 0x223   :  { %v5956_v4 = vcombine.high %v571_v61, %v575_v62  ;;  %v5955_v9 = vcombine.low %v571_v61, %v575_v62  ;;  %v627_v62 = vld [vmem:[#allocation3 + $0xe90] sm:$0xff] }
 0x224   :  { %3676 = vmatpush1.bf16.msra.mxu0 %v5891_v43  ;;  %3840 = vmatpush1.bf16.msra.mxu1 %v5893_v5  ;;  %v5958_v43 = vcombine.high %v572_v1, %v576_v2  ;;  %v579_v5 = vld [vmem:[#allocation3 + $0xd10] sm:$0xff]  ;;  %v628_v2 = vld [vmem:[#allocation3 + $0xe98] sm:$0xff] }
 0x225   :  { %3677 = vmatprep.subr.bf16.mxu0 %v5900_v6  ;;  %3841 = vmatprep.subr.bf16.mxu1 %v5902_v7  ;;  %v583_v6 = vld [vmem:[#allocation3 + $0xd30] sm:$0xff]  ;;  %v580_v7 = vld [vmem:[#allocation3 + $0xd18] sm:$0xff] }
 0x226   :  { %v5964_v13 = vcombine.high %v579_v5, %v583_v6  ;;  %v5963_v42 = vcombine.low %v579_v5, %v583_v6  ;;  %v5965_v54 = vcombine.low %v580_v7, %v584_v8  ;;  %v631_v1 = vld [vmem:[#allocation3 + $0xeb0] sm:$0xff] }
 0x227   :  { %v635_v6 = vld [vmem:[#allocation3 + $0xed0] sm:$0xff] }
 0x228   :  { %3678 = vmatpush1.bf16.msra.mxu0 %v5899_v15  ;;  %3842 = vmatpush1.bf16.msra.mxu1 %v5901_v16  ;;  %v587_v15 = vld [vmem:[#allocation3 + $0xd50] sm:$0xff] }
 0x229   :  { %3679 = vmatprep.subr.bf16.mxu0 %v5908_v17  ;;  %3843 = vmatprep.subr.bf16.mxu1 %v5910_v40  ;;  %v591_v16 = vld [vmem:[#allocation3 + $0xd70] sm:$0xff]  ;;  %v588_v17 = vld [vmem:[#allocation3 + $0xd58] sm:$0xff] }
 0x22a   :  { %v592_v40 = vld [vmem:[#allocation3 + $0xd78] sm:$0xff]  ;;  %v5972_v55 = vcombine.high %v587_v15, %v591_v16 }
 0x22b   :  { %v5974_v19 = vcombine.high %v588_v17, %v592_v40  ;;  %v5973_v27 = vcombine.low %v588_v17, %v592_v40  ;;  %v647_v17 = vld [vmem:[#allocation3 + $0xf30] sm:$0xff]  ;;  %v644_v40 = vld [vmem:[#allocation3 + $0xf18] sm:$0xff] }
 0x22c   :  { %3680 = vmatpush1.bf16.msra.mxu0 %v5907_v20  ;;  %3844 = vmatpush1.bf16.msra.mxu1 %v5909_v21  ;;  %v595_v20 = vld [vmem:[#allocation3 + $0xd90] sm:$0xff] }
 0x22d   :  { %3681 = vmatprep.subr.bf16.mxu0 %v5916_v23  ;;  %3845 = vmatprep.subr.bf16.mxu1 %v5918_v26  ;;  %v599_v21 = vld [vmem:[#allocation3 + $0xdb0] sm:$0xff]  ;;  %v596_v23 = vld [vmem:[#allocation3 + $0xd98] sm:$0xff]  ;;  %v5971_v26 = vcombine.low %v587_v15, %v591_v16 }
 0x22e   :  { %v5980_v29 = vcombine.high %v595_v20, %v599_v21  ;;  %v5982_v31 = vcombine.high %v596_v23, %v600_v25  ;;  %v5979_v39 = vcombine.low %v595_v20, %v599_v21  ;;  %v643_v16 = vld [vmem:[#allocation3 + $0xf10] sm:$0xff] }
 0x22f   :  { %v651_v21 = vld [vmem:[#allocation3 + $0xf50] sm:$0xff] }
 0x230   :  { %3682 = vmatpush1.bf16.msra.mxu0 %v5915_v33  ;;  %3846 = vmatpush1.bf16.msra.mxu1 %v5917_v35  ;;  %v607_v33 = vld [vmem:[#allocation3 + $0xdf0] sm:$0xff] }
 0x231   :  { %3683 = vmatprep.subr.bf16.mxu0 %v5924_v37  ;;  %3847 = vmatprep.subr.bf16.mxu1 %v5926_v11  ;;  %v604_v37 = vld [vmem:[#allocation3 + $0xdd8] sm:$0xff] }
 0x232   :  { %v608_v11 = vld [vmem:[#allocation3 + $0xdf8] sm:$0xff] }
 0x233   :  { %v5990_v47 = vcombine.high %v604_v37, %v608_v11 }
 0x234   :  { %3684 = vmatpush1.bf16.msra.mxu0 %v5923_v44  ;;  %3848 = vmatpush1.bf16.msra.mxu1 %v5925_v45  ;;  %v5981_v45 = vcombine.low %v596_v23, %v600_v25  ;;  %v655_v23 = vld [vmem:[#allocation3 + $0xf70] sm:$0xff]  ;;  %v652_v25 = vld [vmem:[#allocation3 + $0xf58] sm:$0xff] }
 0x235   :  { %3694 = vmatprep.subr.bf16.mxu0 %v5932_v63  ;;  %3858 = vmatprep.subr.bf16.mxu1 %v5934_v46  ;;  %v5988_v63 = vcombine.high %v603_v32, %v607_v33 }
 0x237   :  { %3686 = vmatmul.mubr.bf16.vlgmr.msra.gmra.mrb[4].mxu0 %v6968_v56  ;;  %3850 = vmatmul.mubr.bf16.vlgmr.msra.gmra.mrb[4].mxu1 %v6968_v56  ;;  %v5949_v56 = vcombine.low %v564_v24, %v568_v58  ;;  %v623_v24 = vld [vmem:[#allocation3 + $0xe70] sm:$0xff]  ;;  %v620_v58 = vld [vmem:[#allocation3 + $0xe58] sm:$0xff] }
 0x238   :  { %3695 = vmatpush1.bf16.msra.mxu0 %v5931_v50  ;;  %3859 = vmatpush1.bf16.msra.mxu1 %v5933_v51  ;;  %v616_v50 = vld [vmem:[#allocation3 + $0xe38] sm:$0xff]  ;;  %v5987_v51 = vcombine.low %v603_v32, %v607_v33  ;;  %v659_v33 = vld [vmem:[#allocation3 + $0xf90] sm:$0xff] }
 0x239   :  { %3696 = vmatprep.subr.bf16.mxu0 %v5940_v52  ;;  %3860 = vmatprep.subr.bf16.mxu1 %v5942_v53  ;;  %v5989_v52 = vcombine.low %v604_v37, %v608_v11  ;;  %v5996_v53 = vcombine.high %v611_v48, %v615_v18  ;;  %v5998_v57 = vcombine.high %v612_v49, %v616_v50  ;;  %v663_v37 = vld [vmem:[#allocation3 + $0xfb0] sm:$0xff]  ;;  %v660_v11 = vld [vmem:[#allocation3 + $0xf98] sm:$0xff] }
 0x23a   :  { %3726 = vmatprep.mubr.bf16.mxu0 %v6970_v0  ;;  %3890 = vmatprep.mubr.bf16.mxu1 %v6970_v0  ;;  %v5966_v0 = vcombine.high %v580_v7, %v584_v8  ;;  %v639_v7 = vld [vmem:[#allocation3 + $0xef0] sm:$0xff]  ;;  %v636_v8 = vld [vmem:[#allocation3 + $0xed8] sm:$0xff] }
 0x23c   :  { %3697 = vmatpush1.bf16.msra.mxu0 %v5939_v36  ;;  %3861 = vmatpush1.bf16.msra.mxu1 %v5941_v28  ;;  %v624_v36 = vld [vmem:[#allocation3 + $0xe78] sm:$0xff]  ;;  %v5995_v28 = vcombine.low %v611_v48, %v615_v18  ;;  %v6043_v18 = vcombine.low %v659_v33, %v663_v37 }
 0x23d   :  { %3698 = vmatprep.subr.bf16.mxu0 %v5948_v59  ;;  %3862 = vmatprep.subr.bf16.mxu1 %v5950_v60  ;;  %v5997_v59 = vcombine.low %v612_v49, %v616_v50  ;;  %v6004_v60 = vcombine.high %v619_v22, %v623_v24  ;;  %v6006_v61 = vcombine.high %v620_v58, %v624_v36  ;;  %v672_v48 = vld [vmem:[#allocation3 + $0xff8] sm:$0xff] }
 0x240   :  { %3699 = vmatpush1.bf16.msra.mxu0 %v5947_v3  ;;  %3863 = vmatpush1.bf16.msra.mxu1 %v5949_v56  ;;  %v632_v3 = vld [vmem:[#allocation3 + $0xeb8] sm:$0xff]  ;;  %v6003_v56 = vcombine.low %v619_v22, %v623_v24  ;;  %v7020_v22 = vld [vmem:[%s7476_s1 + $0x8] sm:$0xff] }
 0x241   :  { %3700 = vmatprep.subr.bf16.mxu0 %v5956_v4  ;;  %3864 = vmatprep.subr.bf16.mxu1 %v5958_v43  ;;  %v6005_v4 = vcombine.low %v620_v58, %v624_v36  ;;  %v6012_v43 = vcombine.high %v627_v62, %v631_v1  ;;  %v6014_v5 = vcombine.high %v628_v2, %v632_v3  ;;  %v7025_v24 = vld [vmem:[%s7476_s1 + $0x28] sm:$0xff]  ;;  %v6467_v36 = vld [vmem:[%s7481_s6 + $0x40] sm:$0xff]  }
 0x244   :  { %3701 = vmatpush1.bf16.msra.mxu0 %v5955_v9  ;;  %3865 = vmatpush1.bf16.msra.mxu1 %v5957_v10  ;;  %v640_v9 = vld [vmem:[#allocation3 + $0xef8] sm:$0xff]  ;;  %v6011_v10 = vcombine.low %v627_v62, %v631_v1  ;;  %v6471_v1 = vld [vmem:[%s7481_s6 + $0x48] sm:$0xff]  }
 0x245   :  { %3702 = vmatprep.subr.bf16.mxu0 %v5964_v13  ;;  %3866 = vmatprep.subr.bf16.mxu1 %v5966_v0  ;;  %v6013_v13 = vcombine.low %v628_v2, %v632_v3  ;;  %v6020_v0 = vcombine.high %v635_v6, %v639_v7  ;;  %v6022_v15 = vcombine.high %v636_v8, %v640_v9  ;;  %v6470_v62 = vld [vmem:[%s7481_s6 + $0x80] sm:$0xff]   ;;  %v6472_v2 = vld [vmem:[%s7481_s6 + $0xc8] sm:$0xff]  }
 0x248   :  { %3703 = vmatpush1.bf16.msra.mxu0 %v5963_v42  ;;  %3867 = vmatpush1.bf16.msra.mxu1 %v5965_v54  ;;  %v648_v42 = vld [vmem:[#allocation3 + $0xf38] sm:$0xff]  ;;  %v6019_v54 = vcombine.low %v635_v6, %v639_v7  ;;  %v6477_v6 = vld [vmem:[%s7481_s6 + $0x10] sm:$0xff]  }
 0x249   :  { %3704 = vmatprep.subr.bf16.mxu0 %v5972_v55  ;;  %3868 = vmatprep.subr.bf16.mxu1 %v5974_v19  ;;  %v6021_v55 = vcombine.low %v636_v8, %v640_v9  ;;  %v6028_v19 = vcombine.high %v643_v16, %v647_v17  ;;  %v6030_v20 = vcombine.high %v644_v40, %v648_v42  ;;  %v6478_v7 = vld [vmem:[%s7481_s6 + $0x90] sm:$0xff]   ;;  %v6479_v8 = vld [vmem:[%s7481_s6 + $0x58] sm:$0xff]  }
 0x24a   :  { %v6999_v30 = vpop.f32.mrb[0].mxu0  ;;  %v7001_v34 = vpop.f32.mrb[0].mxu1  ;;  %v6480_v9 = vld [vmem:[%s7481_s6 + $0xd8] sm:$0xff]  }
 0x24b   :  { %v7003_v35 = vpop.f32.mrb[1].mxu0  ;;  %v7005_v12 = vpop.f32.mrb[1].mxu1 }
 0x24c   :  { %v3404_v38 = vpop.f32.mrb[2].mxu0  ;;  %3705 = vmatpush1.bf16.msra.mxu0 %v5971_v26  ;;  %v3568_v41 = vpop.f32.mrb[2].mxu1  ;;  %3869 = vmatpush1.bf16.msra.mxu1 %v5973_v27  ;;  %v656_v26 = vld [vmem:[#allocation3 + $0xf78] sm:$0xff]  ;;  %v6027_v27 = vcombine.low %v643_v16, %v647_v17 }
 0x24d   :  { %v3405_v44 = vpop.f32.mrb[3].mxu0  ;;  %3706 = vmatprep.subr.bf16.mxu0 %v5980_v29  ;;  %v3569_v46 = vpop.f32.mrb[3].mxu1  ;;  %3870 = vmatprep.subr.bf16.mxu1 %v5982_v31  ;;  %v6029_v29 = vcombine.low %v644_v40, %v648_v42  ;;  %v6036_v31 = vcombine.high %v651_v21, %v655_v23  ;;  %v6038_v32 = vcombine.high %v652_v25, %v656_v26  ;;  %v664_v38 = vld [vmem:[#allocation3 + $0xfb8] sm:$0xff]  ;;  %v6487_v40 = vld [vmem:[%s7481_s6 + $0x68] sm:$0xff]  }
 0x24e   :  { %v6037_v41 = vcombine.low %v652_v25, %v656_v26  ;;  %v6044_v44 = vcombine.high %v659_v33, %v663_v37  ;;  %v671_v46 = vld [vmem:[#allocation3 + $0xff0] sm:$0xff]  ;;  %v6045_v49 = vcombine.low %v660_v11, %v664_v38  ;;  %v6485_v16 = vld [vmem:[%s7481_s6 + $0x20] sm:$0xff]   ;;  %v6488_v42 = vld [vmem:[%s7481_s6 + $0xe8] sm:$0xff]   ;;  %v4061_v33 = vcombine.low %v7020_v22, %v7025_v24 }
 0x24f   :  { %v6486_v17 = vld [vmem:[%s7481_s6 + $0xa0] sm:$0xff]   ;;  %v6495_v25 = vld [vmem:[%s7481_s6 + $0x78] sm:$0xff]  }
 0x250   :  { %3707 = vmatpush1.bf16.msra.mxu0 %v5979_v39  ;;  %3871 = vmatpush1.bf16.msra.mxu1 %v5981_v45  ;;  %v6035_v39 = vcombine.low %v651_v21, %v655_v23  ;;  %v6046_v45 = vcombine.high %v660_v11, %v664_v38  ;;  %v6493_v21 = vld [vmem:[%s7481_s6 + $0x30] sm:$0xff]   ;;  %v6496_v26 = vld [vmem:[%s7481_s6 + $0xf8] sm:$0xff]  }
 0x251   :  { %3708 = vmatprep.subr.bf16.mxu0 %v5988_v63  ;;  %3872 = vmatprep.subr.bf16.mxu1 %v5990_v47  ;;  %v667_v63 = vld [vmem:[#allocation3 + $0xfd0] sm:$0xff]  ;;  %v668_v47 = vld [vmem:[#allocation3 + $0xfd8] sm:$0xff] }
 0x252   :  { %v6052_v50 = vcombine.high %v667_v63, %v671_v46  ;;  %v6053_v58 = vcombine.low %v668_v47, %v672_v48  ;;  %v6494_v23 = vld [vmem:[%s7481_s6 + $0xb0] sm:$0xff]   ;;  %v7143_v37 = vld [vmem:[%s7476_s1 + $0x18] sm:$0xff] }
 0x253   :  { %v7148_v11 = vld [vmem:[%s7476_s1 + $0x38] sm:$0xff] }
 0x254   :  { %3709 = vmatpush1.bf16.msra.mxu0 %v5987_v51  ;;  %3873 = vmatpush1.bf16.msra.mxu1 %v5989_v52  ;;  %v6054_v51 = vcombine.high %v668_v47, %v672_v48  ;;  %v7010_v52 = vld [vmem:[%s7476_s1] sm:$0xff]  ;;  %v6498_v38 = vld [vmem:[%s7481_s6 + $0xb8] sm:$0xff]  }
 0x255   :  { %3710 = vmatprep.subr.bf16.mxu0 %v5996_v53  ;;  %3874 = vmatprep.subr.bf16.mxu1 %v5998_v57  ;;  %v7015_v53 = vld [vmem:[%s7476_s1 + $0x20] sm:$0xff]  ;;  %v6051_v57 = vcombine.low %v667_v63, %v671_v46  ;;  %v4066_v63 = vcombine.high %v7143_v37, %v7148_v11  ;;  %v4077_v46 = vpack.c.bf16 %v4061_v33, %v4061_v33  ;;  %v6540_v33 = vld [vmem:[%s7480_s5 + $0xd0] sm:$0xff]  }
 0x256   :  { %v6501_v47 = vld [vmem:[%s7481_s6 + $0x100] sm:$0xff]  }
 0x257   :  { %v6502_v48 = vld [vmem:[%s7481_s6 + $0x180] sm:$0xff]  }
 0x258   :  { %3711 = vmatpush1.bf16.msra.mxu0 %v5995_v28  ;;  %3875 = vmatpush1.bf16.msra.mxu1 %v5997_v59  ;;  %v6468_v28 = vld [vmem:[%s7481_s6 + $0xc0] sm:$0xff]   ;;  %v4060_v59 = vcombine.high %v7010_v52, %v7015_v53 }
 0x259   :  { %3712 = vmatprep.subr.bf16.mxu0 %v6004_v60  ;;  %3876 = vmatprep.subr.bf16.mxu1 %v6006_v61  ;;  %v4062_v60 = vcombine.high %v7020_v22, %v7025_v24  ;;  %v6469_v61 = vld [vmem:[%s7481_s6] sm:$0xff]   ;;  %v6508_v22 = vld [vmem:[%s7481_s6 + $0x1d0] sm:$0xff]  }
 0x25a   :  { %v4076_v3 = vpack.c.bf16 %v4060_v59, %v4060_v59  ;;  %v6509_v24 = vld [vmem:[%s7481_s6 + $0x110] sm:$0xff]   ;;  %v6513_v59 = vld [vmem:[%s7481_s6 + $0x118] sm:$0xff]  }
 0x25c   :  { %3713 = vmatpush1.bf16.msra.mxu0 %v6003_v56  ;;  %3877 = vmatpush1.bf16.msra.mxu1 %v6005_v4  ;;  %v4078_v56 = vpack.c.bf16 %v4062_v60, %v4062_v60  ;;  %v6473_v4 = vld [vmem:[%s7481_s6 + $0x8] sm:$0xff]   ;;  %v6514_v60 = vld [vmem:[%s7481_s6 + $0x198] sm:$0xff]  }
 0x25d   :  { %3714 = vmatprep.subr.bf16.mxu0 %v6012_v43  ;;  %3878 = vmatprep.subr.bf16.mxu1 %v6014_v5  ;;  %v6474_v43 = vld [vmem:[%s7481_s6 + $0x88] sm:$0xff]   ;;  %v6475_v5 = vld [vmem:[%s7481_s6 + $0x50] sm:$0xff]  }
 0x260   :  { %3715 = vmatpush1.bf16.msra.mxu0 %v6011_v10  ;;  %3879 = vmatpush1.bf16.msra.mxu1 %v6013_v13  ;;  %v6481_v10 = vld [vmem:[%s7481_s6 + $0x18] sm:$0xff]  }
 0x261   :  { %3716 = vmatprep.subr.bf16.mxu0 %v6020_v0  ;;  %3880 = vmatprep.subr.bf16.mxu1 %v6022_v15  ;;  %v6482_v13 = vld [vmem:[%s7481_s6 + $0x98] sm:$0xff]   ;;  %v6483_v0 = vld [vmem:[%s7481_s6 + $0x60] sm:$0xff]  }
 0x262   :  { %v6484_v15 = vld [vmem:[%s7481_s6 + $0xe0] sm:$0xff]  }
 0x264   :  { %3717 = vmatpush1.bf16.msra.mxu0 %v6019_v54  ;;  %3881 = vmatpush1.bf16.msra.mxu1 %v6021_v55  ;;  %v6489_v54 = vld [vmem:[%s7481_s6 + $0x28] sm:$0xff]  }
 0x265   :  { %3718 = vmatprep.subr.bf16.mxu0 %v6028_v19  ;;  %3882 = vmatprep.subr.bf16.mxu1 %v6030_v20  ;;  %v6490_v55 = vld [vmem:[%s7481_s6 + $0xa8] sm:$0xff]   ;;  %v6491_v19 = vld [vmem:[%s7481_s6 + $0x70] sm:$0xff]  }
 0x266   :  { %v6492_v20 = vld [vmem:[%s7481_s6 + $0xf0] sm:$0xff]  }
 0x268   :  { %3719 = vmatpush1.bf16.msra.mxu0 %v6027_v27  ;;  %3883 = vmatpush1.bf16.msra.mxu1 %v6029_v29  ;;  %v4059_v27 = vcombine.low %v7010_v52, %v7015_v53  ;;  %v7128_v29 = vld [vmem:[%s7476_s1 + $0x10] sm:$0xff]  ;;  %v6505_v52 = vld [vmem:[%s7481_s6 + $0x108] sm:$0xff]  }
 0x269   :  { %3720 = vmatprep.subr.bf16.mxu0 %v6036_v31  ;;  %3884 = vmatprep.subr.bf16.mxu1 %v6038_v32  ;;  %v7133_v31 = vld [vmem:[%s7476_s1 + $0x30] sm:$0xff]  ;;  %v6497_v32 = vld [vmem:[%s7481_s6 + $0x38] sm:$0xff]   ;;  %v6506_v53 = vld [vmem:[%s7481_s6 + $0x188] sm:$0xff]  }
 0x26c   :  { %3721 = vmatpush1.bf16.msra.mxu0 %v6035_v39  ;;  %3885 = vmatpush1.bf16.msra.mxu1 %v6037_v41  ;;  %v6499_v39 = vld [vmem:[%s7481_s6 + $0x140] sm:$0xff]  }
 0x26d   :  { %3722 = vmatprep.subr.bf16.mxu0 %v6044_v44  ;;  %3886 = vmatprep.subr.bf16.mxu1 %v6046_v45  ;;  %v6500_v41 = vld [vmem:[%s7481_s6 + $0x1c0] sm:$0xff]   ;;  %v4064_v44 = vcombine.high %v7128_v29, %v7133_v31  ;;  %v4075_v45 = vpack.c.bf16 %v4059_v27, %v4059_v27 }
 0x270   :  { %3723 = vmatpush1.bf16.msra.mxu0 %v6043_v18  ;;  %3887 = vmatpush1.bf16.msra.mxu1 %v6045_v49  ;;  %v6503_v18 = vld [vmem:[%s7481_s6 + $0x148] sm:$0xff]  }
 0x271   :  { %3724 = vmatprep.subr.bf16.mxu0 %v6052_v50  ;;  %3888 = vmatprep.subr.bf16.mxu1 %v6054_v51  ;;  %v6504_v49 = vld [vmem:[%s7481_s6 + $0x1c8] sm:$0xff]   ;;  %v4080_v50 = vpack.c.bf16 %v4064_v44, %v4064_v44  ;;  %v4082_v51 = vpack.c.bf16 %v4066_v63, %v4066_v63  ;;  %v6546_v44 = vld [vmem:[%s7480_s5 + $0x98] sm:$0xff]   ;;  %v6548_v63 = vld [vmem:[%s7480_s5 + $0xe0] sm:$0xff]  }
 0x274   :  { %3725 = vmatpush1.bf16.msra.mxu0 %v6051_v57  ;;  %3889 = vmatpush1.bf16.msra.mxu1 %v6053_v58  ;;  %v6507_v57 = vld [vmem:[%s7481_s6 + $0x150] sm:$0xff]  }
 0x275   :  { %6191 = vmatprep.subr.bf16.mxu0 %v6467_v36  ;;  %6213 = vmatprep.subr.bf16.mxu1 %v6468_v28  ;;  %v6510_v58 = vld [vmem:[%s7481_s6 + $0x190] sm:$0xff]   ;;  %v6511_v36 = vld [vmem:[%s7481_s6 + $0x158] sm:$0xff]  }
 0x276   :  { %v6512_v28 = vld [vmem:[%s7481_s6 + $0x1d8] sm:$0xff]  }
 0x277   :  { %3727 = vmatmul.mubr.bf16.vlgmr.msra.gmra.mrb[4].mxu0 %v6978_v14  ;;  %3891 = vmatmul.mubr.bf16.vlgmr.msra.gmra.mrb[4].mxu1 %v6978_v14  ;;  %v6476_v14 = vld [vmem:[%s7481_s6 + $0xd0] sm:$0xff]  }
 0x278   :  { %6192 = vmatpush3.bf16.msra.mxu0 %v6469_v61  ;;  %6214 = vmatpush3.bf16.msra.mxu1 %v6470_v62  ;;  %v6515_v61 = vld [vmem:[%s7481_s6 + $0x160] sm:$0xff]  }
 0x279   :  { %6193 = vmatprep.subr.bf16.mxu0 %v6471_v1  ;;  %6215 = vmatprep.subr.bf16.mxu1 %v6472_v2  ;;  %v6516_v62 = vld [vmem:[%s7481_s6 + $0x1e0] sm:$0xff]  }
 0x27a   :  { %4627 = vmatprep.mubr.bf16.mxu0 %v4076_v3  ;;  %4667 = vmatprep.mubr.bf16.mxu1 %v4078_v56  ;;  %v6517_v1 = vld [vmem:[%s7481_s6 + $0x120] sm:$0xff]   ;;  %v6519_v3 = vld [vmem:[%s7481_s6 + $0x168] sm:$0xff]  }
 0x27b   :  { %v6518_v2 = vld [vmem:[%s7481_s6 + $0x1a0] sm:$0xff]   ;;  %v6520_v56 = vld [vmem:[%s7481_s6 + $0x1e8] sm:$0xff]  }
 0x27c   :  { %6194 = vmatpush3.bf16.msra.mxu0 %v6473_v4  ;;  %6216 = vmatpush3.bf16.msra.mxu1 %v6474_v43  ;;  %v6521_v4 = vld [vmem:[%s7481_s6 + $0x128] sm:$0xff]  }
 0x27d   :  { %6195 = vmatprep.subr.bf16.mxu0 %v6475_v5  ;;  %6217 = vmatprep.subr.bf16.mxu1 %v6476_v14  ;;  %v6522_v43 = vld [vmem:[%s7481_s6 + $0x1a8] sm:$0xff]   ;;  %v6523_v5 = vld [vmem:[%s7481_s6 + $0x170] sm:$0xff]  }
 0x27e   :  { %v6524_v14 = vld [vmem:[%s7481_s6 + $0x1f0] sm:$0xff]  }
 0x280   :  { %6196 = vmatpush3.bf16.msra.mxu0 %v6477_v6  ;;  %6218 = vmatpush3.bf16.msra.mxu1 %v6478_v7  ;;  %v7235_v6 = vpop.permute.xlu0 %680  ;;  %v6525_v7 = vld [vmem:[%s7481_s6 + $0x130] sm:$0xff]  }
 0x281   :  { %6197 = vmatprep.subr.bf16.mxu0 %v6479_v8  ;;  %6219 = vmatprep.subr.bf16.mxu1 %v6480_v9  ;;  %v6526_v8 = vld [vmem:[%s7481_s6 + $0x1b0] sm:$0xff]   ;;  %v6527_v9 = vld [vmem:[%s7481_s6 + $0x178] sm:$0xff]  }
 0x284   :  { %6198 = vmatpush3.bf16.msra.mxu0 %v6481_v10  ;;  %6220 = vmatpush3.bf16.msra.mxu1 %v6482_v13  ;;  %v6528_v10 = vld [vmem:[%s7481_s6 + $0x1f8] sm:$0xff]   ;;  %v6397_v13 = vadd.f32 %v7003_v35, %v7235_v6 }
 0x285   :  { %6199 = vmatprep.subr.bf16.mxu0 %v6483_v0  ;;  %6221 = vmatprep.subr.bf16.mxu1 %v6484_v15  ;;  %v4063_v0 = vcombine.low %v7128_v29, %v7133_v31  ;;  %v6399_v15 = vadd.f32 %v7005_v12, %v7235_v6  ;;  %v6530_v35 = vld [vmem:[%s7481_s6 + $0x1b8] sm:$0xff]   ;;  %v6532_v12 = vld [vmem:[%s7480_s5 + $0xc0] sm:$0xff]   ;;  %v6537_v29 = vld [vmem:[%s7480_s5 + $0x8] sm:$0xff]  }
 0x286   :  { %v6538_v31 = vld [vmem:[%s7480_s5 + $0x88] sm:$0xff]  }
 0x288   :  { %6200 = vmatpush3.bf16.msra.mxu0 %v6485_v16  ;;  %6222 = vmatpush3.bf16.msra.mxu1 %v6486_v17  ;;  %v6529_v16 = vld [vmem:[%s7481_s6 + $0x138] sm:$0xff]   ;;  %v4065_v17 = vcombine.low %v7143_v37, %v7148_v11  ;;  %v6541_v37 = vld [vmem:[%s7480_s5 + $0x10] sm:$0xff]  }
 0x289   :  { %6201 = vmatprep.subr.bf16.mxu0 %v6487_v40  ;;  %6223 = vmatprep.subr.bf16.mxu1 %v6488_v42  ;;  %v6531_v40 = vld [vmem:[%s7480_s5 + $0x40] sm:$0xff]   ;;  %v3900_v42 = vmax.f32 %v6397_v13, 0.0  ;;  %v6542_v11 = vld [vmem:[%s7480_s5 + $0x90] sm:$0xff]   ;;  %v6576_v13 = vld [vmem:[%s7480_s5 + $0x1d8] sm:$0xff]  }
 0x28c   :  { %6202 = vmatpush3.bf16.msra.mxu0 %v6489_v54  ;;  %6224 = vmatpush3.bf16.msra.mxu1 %v6490_v55  ;;  %v4079_v54 = vpack.c.bf16 %v4063_v0, %v4063_v0  ;;  %v3902_v55 = vmax.f32 %v6399_v15, 0.0  ;;  %v6577_v0 = vld [vmem:[%s7480_s5 + $0x118] sm:$0xff]  }
 0x28d   :  { %6203 = vmatprep.subr.bf16.mxu0 %v6491_v19  ;;  %6225 = vmatprep.subr.bf16.mxu1 %v6492_v20  ;;  %v4081_v19 = vpack.c.bf16 %v4065_v17, %v4065_v17  ;;  %v6533_v20 = vld [vmem:[%s7480_s5] sm:$0xff]   ;;  %v6578_v15 = vld [vmem:[%s7480_s5 + $0x198] sm:$0xff]  }
 0x28e   :  { %v3910_v27 = vpack.c.bf16 %v3902_v55, %v3902_v55  ;;  %v6580_v17 = vld [vmem:[%s7480_s5 + $0x1e0] sm:$0xff]   ;;  %v6586_v55 = vld [vmem:[%s7480_s5 + $0x1a8] sm:$0xff]  }
 0x290   :  { %6204 = vmatpush3.bf16.msra.mxu0 %v6493_v21  ;;  %6226 = vmatpush3.bf16.msra.mxu1 %v6494_v23  ;;  %v6534_v21 = vld [vmem:[%s7480_s5 + $0x80] sm:$0xff]   ;;  %v6535_v23 = vld [vmem:[%s7480_s5 + $0x48] sm:$0xff]  }
 0x291   :  { %6205 = vmatprep.subr.bf16.mxu0 %v6495_v25  ;;  %6227 = vmatprep.subr.bf16.mxu1 %v6496_v26  ;;  %v3908_v25 = vpack.c.bf16 %v3900_v42, %v3900_v42  ;;  %v6536_v26 = vld [vmem:[%s7480_s5 + $0xc8] sm:$0xff]  }
 0x292   :  { %v6584_v42 = vld [vmem:[%s7480_s5 + $0x1e8] sm:$0xff]  }
 0x294   :  { %6206 = vmatpush3.bf16.msra.mxu0 %v6497_v32  ;;  %6228 = vmatpush3.bf16.msra.mxu1 %v6498_v38  ;;  %v6539_v32 = vld [vmem:[%s7480_s5 + $0x50] sm:$0xff]   ;;  %v6543_v38 = vld [vmem:[%s7480_s5 + $0x58] sm:$0xff]  }
 0x295   :  { %6235 = vmatprep.subr.bf16.mxu0 %v6499_v39  ;;  %6257 = vmatprep.subr.bf16.mxu1 %v6500_v41  ;;  %v6544_v39 = vld [vmem:[%s7480_s5 + $0xd8] sm:$0xff]  }
 0x296   :  { %v6545_v41 = vld [vmem:[%s7480_s5 + $0x18] sm:$0xff]  }
 0x297   :  { %4628 = vmatmul.mubr.bf16.vlgmr.msra.gmra.mrb[8].mxu0 %v4075_v45  ;;  %4668 = vmatmul.mubr.bf16.vlgmr.msra.gmra.mrb[8].mxu1 %v4077_v46  ;;  %v6547_v45 = vld [vmem:[%s7480_s5 + $0x60] sm:$0xff]  }
 0x298   :  { %6236 = vmatpush3.bf16.msra.mxu0 %v6501_v47  ;;  %6258 = vmatpush3.bf16.msra.mxu1 %v6502_v48  ;;  %v6549_v46 = vld [vmem:[%s7480_s5 + $0x20] sm:$0xff]   ;;  %v6551_v48 = vld [vmem:[%s7480_s5 + $0x68] sm:$0xff]  }
 0x299   :  { %6237 = vmatprep.subr.bf16.mxu0 %v6503_v18  ;;  %6259 = vmatprep.subr.bf16.mxu1 %v6504_v49  ;;  %v6550_v47 = vld [vmem:[%s7480_s5 + $0xa0] sm:$0xff]   ;;  %v6552_v18 = vld [vmem:[%s7480_s5 + $0xe8] sm:$0xff]  }
 0x29a   :  { %4707 = vmatprep.mubr.bf16.mxu0 %v4080_v50  ;;  %4747 = vmatprep.mubr.bf16.mxu1 %v4082_v51  ;;  %v6553_v49 = vld [vmem:[%s7480_s5 + $0x28] sm:$0xff]   ;;  %v6555_v51 = vld [vmem:[%s7480_s5 + $0x70] sm:$0xff]  }
 0x29b   :  { %v6554_v50 = vld [vmem:[%s7480_s5 + $0xa8] sm:$0xff]  }
 0x29c   :  { %6238 = vmatpush3.bf16.msra.mxu0 %v6505_v52  ;;  %6260 = vmatpush3.bf16.msra.mxu1 %v6506_v53  ;;  %v6556_v52 = vld [vmem:[%s7480_s5 + $0xf0] sm:$0xff]  }
 0x29d   :  { %6239 = vmatprep.subr.bf16.mxu0 %v6507_v57  ;;  %6261 = vmatprep.subr.bf16.mxu1 %v6508_v22  ;;  %v6557_v53 = vld [vmem:[%s7480_s5 + $0x30] sm:$0xff]   ;;  %v6396_v57 = vadd.f32 %v6999_v30, %v7235_v6  ;;  %v6561_v30 = vld [vmem:[%s7480_s5 + $0x38] sm:$0xff]  }
 0x29e   :  { %v6558_v22 = vld [vmem:[%s7480_s5 + $0xb0] sm:$0xff]  }
 0x2a0   :  { %6240 = vmatpush3.bf16.msra.mxu0 %v6509_v24  ;;  %6262 = vmatpush3.bf16.msra.mxu1 %v6510_v58  ;;  %v6559_v24 = vld [vmem:[%s7480_s5 + $0x78] sm:$0xff]   ;;  %v6398_v58 = vadd.f32 %v7001_v34, %v7235_v6  ;;  %v6563_v34 = vld [vmem:[%s7480_s5 + $0x140] sm:$0xff]  }
 0x2a1   :  { %6241 = vmatprep.subr.bf16.mxu0 %v6511_v36  ;;  %6263 = vmatprep.subr.bf16.mxu1 %v6512_v28  ;;  %v6560_v36 = vld [vmem:[%s7480_s5 + $0xf8] sm:$0xff]   ;;  %v3899_v28 = vmax.f32 %v6396_v57, 0.0 }
 0x2a4   :  { %6242 = vmatpush3.bf16.msra.mxu0 %v6513_v59  ;;  %6264 = vmatpush3.bf16.msra.mxu1 %v6514_v60  ;;  %v6562_v59 = vld [vmem:[%s7480_s5 + $0xb8] sm:$0xff]   ;;  %v3901_v60 = vmax.f32 %v6398_v58, 0.0 }
 0x2a5   :  { %6243 = vmatprep.subr.bf16.mxu0 %v6515_v61  ;;  %6265 = vmatprep.subr.bf16.mxu1 %v6516_v62  ;;  %v6564_v61 = vld [vmem:[%s7480_s5 + $0x1c0] sm:$0xff]  }
 0x2a6   :  { %v6565_v62 = vld [vmem:[%s7480_s5 + $0x100] sm:$0xff]  }
 0x2a8   :  { %6244 = vmatpush3.bf16.msra.mxu0 %v6517_v1  ;;  %6266 = vmatpush3.bf16.msra.mxu1 %v6518_v2  ;;  %v3907_v1 = vpack.c.bf16 %v3899_v28, %v3899_v28  ;;  %v6566_v2 = vld [vmem:[%s7480_s5 + $0x180] sm:$0xff]  }
 0x2a9   :  { %6245 = vmatprep.subr.bf16.mxu0 %v6519_v3  ;;  %6267 = vmatprep.subr.bf16.mxu1 %v6520_v56  ;;  %v6567_v3 = vld [vmem:[%s7480_s5 + $0x148] sm:$0xff]   ;;  %v3909_v56 = vpack.c.bf16 %v3901_v60, %v3901_v60 }
 0x2ac   :  { %6246 = vmatpush3.bf16.msra.mxu0 %v6521_v4  ;;  %6268 = vmatpush3.bf16.msra.mxu1 %v6522_v43  ;;  %v6568_v4 = vld [vmem:[%s7480_s5 + $0x1c8] sm:$0xff]  }
 0x2ad   :  { %6247 = vmatprep.subr.bf16.mxu0 %v6523_v5  ;;  %6269 = vmatprep.subr.bf16.mxu1 %v6524_v14  ;;  %v6569_v43 = vld [vmem:[%s7480_s5 + $0x108] sm:$0xff]   ;;  %v6571_v14 = vld [vmem:[%s7480_s5 + $0x150] sm:$0xff]  }
 0x2ae   :  { %v6570_v5 = vld [vmem:[%s7480_s5 + $0x188] sm:$0xff]  }
 0x2b0   :  { %6248 = vmatpush3.bf16.msra.mxu0 %v6525_v7  ;;  %6270 = vmatpush3.bf16.msra.mxu1 %v6526_v8  ;;  %v6572_v7 = vld [vmem:[%s7480_s5 + $0x1d0] sm:$0xff]  }
 0x2b1   :  { %6249 = vmatprep.subr.bf16.mxu0 %v6527_v9  ;;  %6271 = vmatprep.subr.bf16.mxu1 %v6528_v10  ;;  %v6573_v8 = vld [vmem:[%s7480_s5 + $0x110] sm:$0xff]   ;;  %v6575_v10 = vld [vmem:[%s7480_s5 + $0x158] sm:$0xff]  }
 0x2b2   :  { %v6574_v9 = vld [vmem:[%s7480_s5 + $0x190] sm:$0xff]  }
 0x2b4   :  { %6250 = vmatpush3.bf16.msra.mxu0 %v6529_v16  ;;  %6272 = vmatpush3.bf16.msra.mxu1 %v6530_v35  ;;  %v6579_v16 = vld [vmem:[%s7480_s5 + $0x160] sm:$0xff]  }
 0x2b5   :  { %6279 = vmatprep.subr.bf16.mxu0 %v6531_v40  ;;  %6301 = vmatprep.subr.bf16.mxu1 %v6532_v12  ;;  %v6581_v35 = vld [vmem:[%s7480_s5 + $0x120] sm:$0xff]   ;;  %v6583_v12 = vld [vmem:[%s7480_s5 + $0x168] sm:$0xff]  }
 0x2b6   :  { %v6582_v40 = vld [vmem:[%s7480_s5 + $0x1a0] sm:$0xff]  }
 0x2b7   :  { %4708 = vmatmul.mubr.bf16.vlgmr.msra.gmra.mrb[12].mxu0 %v4079_v54  ;;  %4748 = vmatmul.mubr.bf16.vlgmr.msra.gmra.mrb[12].mxu1 %v4081_v19  ;;  %v6585_v54 = vld [vmem:[%s7480_s5 + $0x128] sm:$0xff]   ;;  %v6587_v19 = vld [vmem:[%s7480_s5 + $0x170] sm:$0xff]  }
 0x2b8   :  { %6280 = vmatpush3.bf16.msra.mxu0 %v6533_v20  ;;  %5171 = vmatprep.mubr.bf16.mxu0 %v3908_v25  ;;  %v6588_v20 = vld [vmem:[%s7480_s5 + $0x1f0] sm:$0xff]   ;;  %v6591_v25 = vld [vmem:[%s7480_s5 + $0x178] sm:$0xff]  }
 0x2b9   :  { %6302 = vmatpush3.bf16.msra.mxu1 %v6534_v21  ;;  %5211 = vmatprep.mubr.bf16.mxu1 %v3910_v27  ;;  %v6589_v21 = vld [vmem:[%s7480_s5 + $0x130] sm:$0xff]   ;;  %v6593_v27 = vld [vmem:[%s7480_s5 + $0x138] sm:$0xff]  }
 0x2ba   :  { %6281 = vmatprep.subr.bf16.mxu0 %v6535_v23  ;;  %6303 = vmatprep.subr.bf16.mxu1 %v6536_v26  ;;  %v6590_v23 = vld [vmem:[%s7480_s5 + $0x1b0] sm:$0xff]   ;;  %v6592_v26 = vld [vmem:[%s7480_s5 + $0x1f8] sm:$0xff]  }
 0x2bc   :  { %6282 = vmatpush3.bf16.msra.mxu0 %v6537_v29  ;;  %v6594_v29 = vld [vmem:[%s7480_s5 + $0x1b8] sm:$0xff]  }
 0x2bd   :  { %6304 = vmatpush3.bf16.msra.mxu1 %v6538_v31  ;;  %6283 = vmatprep.subr.bf16.mxu0 %v6539_v32 }
 0x2be   :  { %6305 = vmatprep.subr.bf16.mxu1 %v6540_v33 }
 0x2c0   :  { %6284 = vmatpush3.bf16.msra.mxu0 %v6541_v37 }
 0x2c1   :  { %6306 = vmatpush3.bf16.msra.mxu1 %v6542_v11  ;;  %6285 = vmatprep.subr.bf16.mxu0 %v6543_v38 }
 0x2c2   :  { %6307 = vmatprep.subr.bf16.mxu1 %v6544_v39 }
 0x2c4   :  { %6286 = vmatpush3.bf16.msra.mxu0 %v6545_v41 }
 0x2c5   :  { %6308 = vmatpush3.bf16.msra.mxu1 %v6546_v44  ;;  %6287 = vmatprep.subr.bf16.mxu0 %v6547_v45 }
 0x2c6   :  { %6309 = vmatprep.subr.bf16.mxu1 %v6548_v63 }
 0x2c8   :  { %6288 = vmatpush3.bf16.msra.mxu0 %v6549_v46 }
 0x2c9   :  { %6310 = vmatpush3.bf16.msra.mxu1 %v6550_v47  ;;  %6289 = vmatprep.subr.bf16.mxu0 %v6551_v48 }
 0x2ca   :  { %6311 = vmatprep.subr.bf16.mxu1 %v6552_v18 }
 0x2cc   :  { %6290 = vmatpush3.bf16.msra.mxu0 %v6553_v49 }
 0x2cd   :  { %6312 = vmatpush3.bf16.msra.mxu1 %v6554_v50  ;;  %6291 = vmatprep.subr.bf16.mxu0 %v6555_v51 }
 0x2ce   :  { %6313 = vmatprep.subr.bf16.mxu1 %v6556_v52 }
 0x2d0   :  { %6292 = vmatpush3.bf16.msra.mxu0 %v6557_v53 }
 0x2d1   :  { %6314 = vmatpush3.bf16.msra.mxu1 %v6558_v22  ;;  %6293 = vmatprep.subr.bf16.mxu0 %v6559_v24 }
 0x2d2   :  { %6315 = vmatprep.subr.bf16.mxu1 %v6560_v36 }
 0x2d4   :  { %6294 = vmatpush3.bf16.msra.mxu0 %v6561_v30 }
 0x2d5   :  { %6316 = vmatpush3.bf16.msra.mxu1 %v6562_v59  ;;  %6323 = vmatprep.subr.bf16.mxu0 %v6563_v34 }
 0x2d6   :  { %6345 = vmatprep.subr.bf16.mxu1 %v6564_v61 }
 0x2d7   :  { %5172 = vmatmul.mubr.bf16.vlgmr.msra.gmra.mrb[16].mxu0 %v3907_v1 }
 0x2d8   :  { %5212 = vmatmul.mubr.bf16.vlgmr.msra.gmra.mrb[16].mxu1 %v3909_v56  ;;  %6324 = vmatpush3.bf16.msra.mxu0 %v6565_v62 }
 0x2d9   :  { %6346 = vmatpush3.bf16.msra.mxu1 %v6566_v2  ;;  %6325 = vmatprep.subr.bf16.mxu0 %v6567_v3 }
 0x2da   :  { %6347 = vmatprep.subr.bf16.mxu1 %v6568_v4 }
 0x2dc   :  { %6326 = vmatpush3.bf16.msra.mxu0 %v6569_v43 }
 0x2dd   :  { %6348 = vmatpush3.bf16.msra.mxu1 %v6570_v5  ;;  %6327 = vmatprep.subr.bf16.mxu0 %v6571_v14 }
 0x2de   :  { %6349 = vmatprep.subr.bf16.mxu1 %v6572_v7 }
 0x2e0   :  { %6328 = vmatpush3.bf16.msra.mxu0 %v6573_v8 }
 0x2e1   :  { %6350 = vmatpush3.bf16.msra.mxu1 %v6574_v9  ;;  %6329 = vmatprep.subr.bf16.mxu0 %v6575_v10 }
 0x2e2   :  { %6351 = vmatprep.subr.bf16.mxu1 %v6576_v13 }
 0x2e4   :  { %6330 = vmatpush3.bf16.msra.mxu0 %v6577_v0 }
 0x2e5   :  { %6352 = vmatpush3.bf16.msra.mxu1 %v6578_v15  ;;  %6331 = vmatprep.subr.bf16.mxu0 %v6579_v16 }
 0x2e6   :  { %6353 = vmatprep.subr.bf16.mxu1 %v6580_v17 }
 0x2e8   :  { %6332 = vmatpush3.bf16.msra.mxu0 %v6581_v35 }
 0x2e9   :  { %6354 = vmatpush3.bf16.msra.mxu1 %v6582_v40  ;;  %6333 = vmatprep.subr.bf16.mxu0 %v6583_v12 }
 0x2ea   :  { %6355 = vmatprep.subr.bf16.mxu1 %v6584_v42 }
 0x2ec   :  { %6334 = vmatpush3.bf16.msra.mxu0 %v6585_v54  ;;  %v5308_v54 = vld [vmem:[#allocation7] sm:$0xff] }
 0x2ed   :  { %6356 = vmatpush3.bf16.msra.mxu1 %v6586_v55  ;;  %6335 = vmatprep.subr.bf16.mxu0 %v6587_v19  ;;  %v5309_v55 = vld [vmem:[#allocation7 + $0x8] sm:$0xff] }
 0x2ee   :  { %6357 = vmatprep.subr.bf16.mxu1 %v6588_v20  ;;  %v6391_v19 = vpack.c.bf16 %v5309_v55, %v5308_v54 }
 0x2f0   :  { %6336 = vmatpush3.bf16.msra.mxu0 %v6589_v21  ;;  %v6746_v21 = vmov 0.0|0.0  }
 0x2f1   :  { %6358 = vmatpush3.bf16.msra.mxu1 %v6590_v23  ;;  %6337 = vmatprep.subr.bf16.mxu0 %v6591_v25  ;;  %v6748_v23 = vmov 0.0   ;;  %v5395_v25 = vld [vmem:[%s7485_s10] sm:$0xff] }
 0x2f2   :  { %6359 = vmatprep.subr.bf16.mxu1 %v6592_v26  ;;  %v5396_v26 = vld [vmem:[%s7485_s10 + $0x8] sm:$0xff] }
 0x2f4   :  { %6338 = vmatpush3.bf16.msra.mxu0 %v6593_v27  ;;  %v6394_v27 = vpack.c.bf16 %v5396_v26, %v5395_v25 }
 0x2f5   :  { %6360 = vmatpush3.bf16.msra.mxu1 %v6594_v29  ;;  %6390 = vmatprep.subr.bf16.mxu0 %v6746_v21 }
 0x2f6   :  { %6393 = vmatprep.subr.bf16.mxu1 %v6746_v21 }
 0x34a   :  { %v3728_v31 = vpop.f32.mrb[4].mxu0  ;;  %v3892_v33 = vpop.f32.mrb[4].mxu1 }
 0x34b   :  { %v6400_v32 = vadd.f32 %v3728_v31, %v7235_v6  ;;  %v3730_v37 = vpop.f32.mrb[5].mxu0  ;;  %v6402_v11 = vadd.f32 %v3892_v33, %v7235_v6  ;;  %v3894_v39 = vpop.f32.mrb[5].mxu1 }
 0x34c   :  { %v6401_v38 = vadd.f32 %v3730_v37, %v7235_v6  ;;  %v3732_v41 = vpop.f32.mrb[6].mxu0  ;;  %v6403_v45 = vadd.f32 %v3894_v39, %v7235_v6  ;;  %v3896_v63 = vpop.f32.mrb[6].mxu1 }
 0x34d   :  { %v3903_v44 = vmax.f32 %v6400_v32, 0.0  ;;  %v3733_v46 = vpop.f32.mrb[7].mxu0  ;;  %v3905_v47 = vmax.f32 %v6402_v11, 0.0  ;;  %v3897_v18 = vpop.f32.mrb[7].mxu1  ;;  %v6183_v63 = vld [vmem:[#allocation5] ss:$0 sm:$0xff] }
 0x34e   :  { %v3904_v48 = vmax.f32 %v6401_v38, 0.0  ;;  %v3906_v49 = vmax.f32 %v6403_v45, 0.0  ;;  %v5397_v18 = vld [vmem:[%s7485_s10 + $0x10] sm:$0x3] }
 0x34f   :  { %v3911_v51 = vpack.c.bf16 %v3903_v44, %v3903_v44  ;;  %v3913_v53 = vpack.c.bf16 %v3905_v47, %v3905_v47 }
 0x350   :  { %v3912_v50 = vpack.c.bf16 %v3904_v48, %v3904_v48  ;;  %v3914_v52 = vpack.c.bf16 %v3906_v49, %v3906_v49  ;;  %v6184_v49 = vld [vmem:[#allocation8] ss:$0 sm:$0xff] }
 0x352   :  { %5251 = vmatprep.mubr.bf16.mxu0 %v3912_v50  ;;  %5291 = vmatprep.mubr.bf16.mxu1 %v3914_v52 }
 0x353   :  { %5252 = vmatmul.mubr.bf16.vlgmr.msra.gmra.mrb[20].mxu0 %v3911_v51  ;;  %5292 = vmatmul.mubr.bf16.vlgmr.msra.gmra.mrb[20].mxu1 %v3913_v53 }
 0x354   :  { %6392 = vmatpush3.bf16.msra.mxu0 %v6391_v19  ;;  %6378 = vmatprep.mubr.msk.f32.mxu0 %vm6747_vm0, %v6748_v23 }
 0x355   :  { %6387 = vmatprep.mubr.msk.f32.mxu1 %vm6747_vm0, %v6748_v23  ;;  %6395 = vmatpush3.bf16.msra.mxu1 %v6394_v27 }
 0x356   :  { %6385 = vmatprep.subr.mxu1 %v6748_v23 }
 0x359   :  { %6386 = vmatpush3.msk.msra.mxu1 %vm5415_vm2, %v5397_v18 }
 0x36a   :  { %v6207_v57 = vpop.f32.mrb[8].mxu0  ;;  %v6229_v22 = vpop.f32.mrb[8].mxu1 }
 0x36b   :  { %v6208_v24 = vpop.f32.mrb[9].mxu0  ;;  %v6230_v36 = vpop.f32.mrb[9].mxu1 }
 0x36c   :  { %v6209_v58 = vadd.f32 %v6208_v24, %v6207_v57  ;;  %v6210_v6 = vpop.f32.mrb[10].mxu0  ;;  %v6231_v30 = vadd.f32 %v6230_v36, %v6229_v22  ;;  %v6232_v28 = vpop.f32.mrb[10].mxu1  ;;  %v6187_v57 = vld [vmem:[#allocation10] ss:$0 sm:$0xff]  ;;  %v6190_v36 = vld [vmem:[#allocation11] ss:$0 sm:$0xff] }
 0x36d   :  { %v6211_v59 = vpop.f32.mrb[11].mxu0  ;;  %v6233_v34 = vpop.f32.mrb[11].mxu1 }
 0x36e   :  { %v4670_v60 = vadd.f32 %v6231_v30, %v6209_v58  ;;  %v5402_v22 = vpop.permute.xlu0 %5401 }
 0x36f   :  { %v5410_v24 = vmul.f32 %v6187_v57, %v5402_v22 }
 0x38a   :  { %v6251_v61 = vpop.f32.mrb[12].mxu0  ;;  %v6273_v62 = vpop.f32.mrb[12].mxu1 }
 0x38b   :  { %v6252_v1 = vpop.f32.mrb[13].mxu0  ;;  %v6274_v3 = vpop.f32.mrb[13].mxu1 }
 0x38c   :  { %v6253_v2 = vadd.f32 %v6252_v1, %v6251_v61  ;;  %v6254_v56 = vpop.f32.mrb[14].mxu0  ;;  %v6275_v4 = vadd.f32 %v6274_v3, %v6273_v62  ;;  %v6276_v43 = vpop.f32.mrb[14].mxu1 }
 0x38d   :  { %v6255_v5 = vpop.f32.mrb[15].mxu0  ;;  %v6277_v7 = vpop.f32.mrb[15].mxu1 }
 0x38e   :  { %v4710_v14 = vadd.f32 %v6253_v2, %v4670_v60 }
 0x390   :  { %v4750_v8 = vadd.f32 %v6275_v4, %v4710_v14 }
 0x3aa   :  { %v6295_v9 = vpop.f32.mrb[16].mxu0 }
 0x3ab   :  { %v6317_v10 = vpop.f32.mrb[16].mxu1  ;;  %v6296_v13 = vpop.f32.mrb[17].mxu0 }
 0x3ac   :  { %v6297_v0 = vadd.f32 %v6296_v13, %v6295_v9  ;;  %v6318_v15 = vpop.f32.mrb[17].mxu1  ;;  %v6298_v16 = vpop.f32.mrb[18].mxu0 }
 0x3ad   :  { %v6319_v17 = vadd.f32 %v6318_v15, %v6317_v10  ;;  %v6320_v35 = vpop.f32.mrb[18].mxu1  ;;  %v6299_v40 = vpop.f32.mrb[19].mxu0 }
 0x3ae   :  { %v5174_v12 = vadd.f32 %v6297_v0, %v4750_v8  ;;  %v6321_v42 = vpop.f32.mrb[19].mxu1 }
 0x3b0   :  { %v5214_v20 = vadd.f32 %v6319_v17, %v5174_v12 }
 0x426   :  { %v6339_v29 = vpop.f32.mrb[20].mxu0  ;;  %v6361_v31 = vpop.f32.mrb[20].mxu1 }
 0x427   :  { %v6340_v32 = vpop.f32.mrb[21].mxu0  ;;  %v6362_v37 = vpop.f32.mrb[21].mxu1 }
 0x428   :  { %v6341_v33 = vadd.f32 %v6340_v32, %v6339_v29  ;;  %v6342_v11 = vpop.f32.mrb[22].mxu0  ;;  %v6363_v38 = vadd.f32 %v6362_v37, %v6361_v31  ;;  %v6364_v39 = vpop.f32.mrb[22].mxu1 }
 0x429   :  { %v6343_v41 = vpop.f32.mrb[23].mxu0  ;;  %v6365_v45 = vpop.f32.mrb[23].mxu1 }
 0x42a   :  { %v5254_v44 = vadd.f32 %v6341_v33, %v5214_v20 }
 0x42c   :  { %v5294_v46 = vadd.f32 %v6363_v38, %v5254_v44 }
 0x42e   :  { %v5306_v47 = vadd.f32 %v6183_v63, %v5294_v46 }
 0x430   :  { %v5307_v48 = vmax.f32 %v5306_v47, 0.0 }
 0x432   :  { %6379 = vmatmul.mubr.msk.f32.vlgmr.msra.gmra.mrb[24].mxu0 %vm5317_vm1, %v5307_v48 }
 0x505   :  { %v5387_v50 = vpop.f32.mrb[24].mxu0 }
 0x506   :  { %v5388_v51 = vadd.f32 %v6184_v49, %v5387_v50  ;;  %v6380_v52 = vpop.f32.mrb[25].mxu0 }
 0x508   :  { %v5391_v53 = vmax.f32 %v5388_v51, 0.0 }
 0x50a   :  { %6388 = vmatmul.mubr.msk.f32.vlgmr.msra.gmra.mrb[24].mxu1 %vm5411_vm3, %v5391_v53 }
 0x5dd   :  { %v5485_v58 = vpop.f32.mrb[24].mxu1 }
 0x5de   :  { %v5486_v6 = vadd.f32 %v5485_v58, %v5410_v24  ;;  %v6389_v30 = vpop.f32.mrb[25].mxu1 }
 0x5e0   :  { %v5496_v28 = vadd.f32 %v6190_v36, %v5486_v6 }
 0x5e2   :  { %5498 = vst.msk [vmem:[#allocation13] sm:$0xff] %vm5497_vm4, %v5496_v28 }
 0x5e9   :  { %v5516_v59 = vld [vmem:[#allocation13] sm:$0xf] }
 0x5ea   :  { %5517 = vst [vmem:[%s7488_s13] sm:$0xf] %v5516_v59 }
 0x5eb   :  { %5534 = vsyncpa [#allocation4], 1 }
 0x5ec   :  { %5535 = vsyncpa [#allocation6], 1 }
 0x5ed   :  { %5536 = vsyncpa [#allocation9], 1 }
 0x5ee   :  { %5537 = vsyncpa [#allocation12], 1 }

</bundles_post_ra>
